<compile_context>
chip_gen: v5e
topology: v5e:2x2
jax: 0.10.0
libtpu: 0.0.40
codegen_flags: <defaults>
</compile_context>

<pallas_src>
import functools
import math

import jax
import jax.numpy as jnp
from jax import lax
from jax.experimental import pallas as pl
from jax.experimental.pallas import tpu as pltpu


def _pick_row_tile(n, max_tile=8):
    for t in (max_tile, 4, 2, 1):
        if n % t == 0:
            return t
    return 1


def _tri_attn_fused_kernel(x_ref, wq_ref, bq_ref, wk_ref, bk_ref, wv_ref, bv_ref,
                           bias_ref, mad_ref, o_ref, *, tile_i, num_heads):
    # x_ref:    (1, TILE_I, N, D)   input rows for this (batch, row-tile)
    # w*_ref:   (H, D, Dh)  bf16    per-head projection weights (q pre-scaled by 1/sqrt(Dh))
    # b*_ref:   (H, 1, Dh)  f32     per-head projection biases  (q pre-scaled)
    # bias_ref: (1, H, N, N) f32    pair bias b[j, k] per head (resident per batch)
    # mad_ref:  (1, TILE_I, N) f32  additive mask over k for each row i (0 / -1e9)
    # o_ref:    (1, TILE_I, N, H*Dh)
    for r in range(tile_i):                       # static unroll over rows in the tile
        xr = x_ref[0, r].astype(jnp.bfloat16)     # [N, D]  (row i; serves both j and k roles)
        mad_row = mad_ref[0, r:r + 1, :]          # [1, N]  broadcasts over j

        head_outs = []
        for h in range(num_heads):                # static unroll over heads
            # Fused linear projections (MXU, bf16 x bf16 -> f32 accumulate).
            q = jnp.dot(xr, wq_ref[h], preferred_element_type=jnp.float32) + bq_ref[h]  # [N, Dh]
            k = jnp.dot(xr, wk_ref[h], preferred_element_type=jnp.float32) + bk_ref[h]
            v = jnp.dot(xr, wv_ref[h], preferred_element_type=jnp.float32) + bv_ref[h]

            # Logits s[j, k] = q_j . k_k  (scale already folded into q); contract last
            # dims directly -- no explicit transpose/relayout of k.
            s = lax.dot_general(q.astype(jnp.bfloat16), k.astype(jnp.bfloat16),
                                (((1,), (1,)), ((), ())),
                                preferred_element_type=jnp.float32)
            s = s + bias_ref[0, h] + mad_row      # f32: pair bias[j,k] + mask over k

            # Numerically stable softmax over k (kept in f32).
            m = jnp.max(s, axis=-1, keepdims=True)
            p = jnp.exp(s - m)
            l = jnp.sum(p, axis=-1, keepdims=True)
            attn = p * pl.reciprocal(l, approx=True)

            head_outs.append(jnp.dot(attn.astype(jnp.bfloat16), v.astype(jnp.bfloat16),
                                     preferred_element_type=jnp.float32))   # [N, Dh]

        # One lane-dense store per row: [N, H*Dh] slab.
        if num_heads == 1:
            row_out = head_outs[0]
        else:
            row_out = jnp.concatenate(head_outs, axis=-1)
        o_ref[0, r] = row_out.astype(o_ref.dtype)


def fake_module_forward(params, x, mask, num_heads):
    """x: [B, N, N, D]; mask: [B, N, N] bool (True = valid). Returns [B, N, N, H, Dh]."""
    B, N, _, D = x.shape
    Dh = D
    scale = 1.0 / math.sqrt(Dh)

    wq, bq = params["q"]
    wk, bk = params["k"]
    wv, bv = params["v"]
    wb, bb = params["b"]

    def per_head(w, b, s=1.0):
        # [D, H*Dh] -> [H, D, Dh] (tiny weight-only transpose), bf16 for the MXU.
        wh = (jnp.transpose(w.reshape(D, num_heads, Dh), (1, 0, 2)) * s).astype(jnp.bfloat16)
        bh = (b.reshape(num_heads, 1, Dh) * s).astype(jnp.float32)
        return wh, bh

    wq_h, bq_h = per_head(wq, bq, scale)   # fold softmax scale into the q projection
    wk_h, bk_h = per_head(wk, bk)
    wv_h, bv_h = per_head(wv, bv)

    # Small pair-bias projection stays in XLA; transpose to head-major [B, H, N, N].
    bias_t = jnp.transpose(x @ wb + bb, (0, 3, 1, 2)).astype(jnp.float32)
    # Additive mask over k; keep f32 (the -1e9 would overflow bf16).
    mad = jnp.where(mask, 0.0, -1e9).astype(jnp.float32)

    tile_i = _pick_row_tile(N)
    kernel = functools.partial(_tri_attn_fused_kernel, tile_i=tile_i, num_heads=num_heads)

    out = pl.pallas_call(
        kernel,
        out_shape=jax.ShapeDtypeStruct((B, N, N, num_heads * Dh), x.dtype),
        grid_spec=pltpu.PrefetchScalarGridSpec(
            num_scalar_prefetch=0,
            grid=(B, N // tile_i),
            in_specs=[
                pl.BlockSpec((1, tile_i, N, D), lambda b, i: (b, i, 0, 0)),      # x row tile
                pl.BlockSpec((num_heads, D, Dh), lambda b, i: (0, 0, 0)),        # wq (resident)
                pl.BlockSpec((num_heads, 1, Dh), lambda b, i: (0, 0, 0)),        # bq (resident)
                pl.BlockSpec((num_heads, D, Dh), lambda b, i: (0, 0, 0)),        # wk
                pl.BlockSpec((num_heads, 1, Dh), lambda b, i: (0, 0, 0)),        # bk
                pl.BlockSpec((num_heads, D, Dh), lambda b, i: (0, 0, 0)),        # wv
                pl.BlockSpec((num_heads, 1, Dh), lambda b, i: (0, 0, 0)),        # bv
                pl.BlockSpec((1, num_heads, N, N), lambda b, i: (b, 0, 0, 0)),   # pair bias (resident per batch)
                pl.BlockSpec((1, tile_i, N), lambda b, i: (b, i, 0)),            # additive mask
            ],
            out_specs=pl.BlockSpec((1, tile_i, N, num_heads * Dh),
                                   lambda b, i: (b, i, 0, 0)),
        ),
        compiler_params=pltpu.CompilerParams(
            dimension_semantics=("parallel", "parallel")),
    )(x, wq_h, bq_h, wk_h, bk_h, wv_h, bv_h, bias_t, mad)

    # Free reshape back to the '... h d' convention: [B, N, N, H, Dh].
    return out.reshape(B, N, N, num_heads, Dh)


def init_params(key, d, h):
    """Deterministic init mirroring torch.nn.Linear defaults (uniform +-1/sqrt(fan_in))."""
    bound = 1.0 / math.sqrt(d)
    ks = jax.random.split(key, 8)

    def lin(kw, kb, out_dim):
        w = jax.random.uniform(kw, (d, out_dim), jnp.float32, -bound, bound)
        b = jax.random.uniform(kb, (out_dim,), jnp.float32, -bound, bound)
        return w, b

    return {
        "q": lin(ks[0], ks[1], h * d),
        "k": lin(ks[2], ks[3], h * d),
        "v": lin(ks[4], ks[5], h * d),
        "b": lin(ks[6], ks[7], h),
    }


def triangle_attention_ref(q, k, v, bias, mask):
    """Pure-JAX (f32) reference for correctness checking."""
    Dh = q.shape[-1]
    scale = 1.0 / math.sqrt(Dh)
    logits = jnp.einsum("bijhd,bikhd->bhijk", q, k) * scale
    logits = logits + jnp.transpose(bias, (0, 3, 1, 2))[:, :, None, :, :]
    logits = logits + jnp.where(mask, 0.0, -1e9)[:, None, :, None, :]
    a = jax.nn.softmax(logits, axis=-1)
    return jnp.einsum("bhijk,bikhd->bijhd", a, v)


if __name__ == "__main__":
    B, N, D, H = 2, 16, 32, 2   # batch, pair rows/cols, hidden (= per-head dim), heads

    key = jax.random.PRNGKey(0)
    kp, kx, km = jax.random.split(key, 3)

    params = init_params(kp, D, H)
    x = jax.random.normal(kx, (B, N, N, D), jnp.float32)
    mask = jax.random.bernoulli(km, 0.9, (B, N, N))
    mask = mask.at[..., 0].set(True)   # guarantee at least one valid key per row

    out = jax.block_until_ready(fake_module_forward(params, x, mask, H))

    # Verify against the pure-JAX f32 reference (kernel uses bf16 MXU operands with
    # f32 accumulation, so allow a bf16-level tolerance).
    def proj(name):
        w, b = params[name]
        return x @ w + b

    q = proj("q").reshape(B, N, N, H, D)
    k = proj("k").reshape(B, N, N, H, D)
    v = proj("v").reshape(B, N, N, H, D)
    bias = proj("b")
    ref = jax.block_until_ready(triangle_attention_ref(q, k, v, bias, mask))

    assert out.shape == (B, N, N, H, D), out.shape
    max_err = float(jnp.max(jnp.abs(out - ref)))
    assert jnp.allclose(out, ref, rtol=3e-2, atol=3e-2), max_err

    print("KERNEL_OK")
</pallas_src>

<mosaic_0001>
module attributes {stable_mosaic.version = 11 : i64} {
  func.func @_tri_attn_fused_kernel(%arg0: i32, %arg1: i32, %arg2: memref<1x8x16x32xf32, #tpu.memory_space<vmem>>, %arg3: memref<2x32x32xbf16, #tpu.memory_space<vmem>>, %arg4: memref<2x1x32xf32, #tpu.memory_space<vmem>>, %arg5: memref<2x32x32xbf16, #tpu.memory_space<vmem>>, %arg6: memref<2x1x32xf32, #tpu.memory_space<vmem>>, %arg7: memref<2x32x32xbf16, #tpu.memory_space<vmem>>, %arg8: memref<2x1x32xf32, #tpu.memory_space<vmem>>, %arg9: memref<1x2x16x16xf32, #tpu.memory_space<vmem>>, %arg10: memref<1x8x16xf32, #tpu.memory_space<vmem>>, %arg11: memref<1x8x16x64xf32, #tpu.memory_space<vmem>>) attributes {dimension_semantics = [#tpu.dimension_semantics<parallel>, #tpu.dimension_semantics<parallel>], iteration_bounds = array<i64: 2, 2>, scalar_prefetch = 0 : i64, scratch_operands = 0 : i64, tpu.core_type = #tpu.core_type<tc>, window_params = [{transform_indices = @transform_0, window_bounds = array<i64: 1, 8, 16, 32>}, {pipeline_mode = #tpu.pipeline_mode<synchronous>, transform_indices = @transform_1, window_bounds = array<i64: 2, 32, 32>}, {pipeline_mode = #tpu.pipeline_mode<synchronous>, transform_indices = @transform_2, window_bounds = array<i64: 2, 1, 32>}, {pipeline_mode = #tpu.pipeline_mode<synchronous>, transform_indices = @transform_3, window_bounds = array<i64: 2, 32, 32>}, {pipeline_mode = #tpu.pipeline_mode<synchronous>, transform_indices = @transform_4, window_bounds = array<i64: 2, 1, 32>}, {pipeline_mode = #tpu.pipeline_mode<synchronous>, transform_indices = @transform_5, window_bounds = array<i64: 2, 32, 32>}, {pipeline_mode = #tpu.pipeline_mode<synchronous>, transform_indices = @transform_6, window_bounds = array<i64: 2, 1, 32>}, {transform_indices = @transform_7, window_bounds = array<i64: 1, 2, 16, 16>}, {transform_indices = @transform_8, window_bounds = array<i64: 1, 8, 16>}, {transform_indices = @transform_9, window_bounds = array<i64: 1, 8, 16, 64>}]} {
    %c0 = arith.constant 0 : index
    %c0_0 = arith.constant 0 : index
    %c0_1 = arith.constant 0 : index
    %c0_2 = arith.constant 0 : index
    %0 = vector.load %arg2[%c0, %c0_0, %c0_1, %c0_2] : memref<1x8x16x32xf32, #tpu.memory_space<vmem>>, vector<1x1x16x32xf32>
    %1 = vector.shape_cast %0 : vector<1x1x16x32xf32> to vector<16x32xf32>
    %2 = arith.truncf %1 : vector<16x32xf32> to vector<16x32xbf16>
    %c0_3 = arith.constant 0 : index
    %c0_4 = arith.constant 0 : index
    %c0_5 = arith.constant 0 : index
    %3 = vector.load %arg10[%c0_3, %c0_4, %c0_5] : memref<1x8x16xf32, #tpu.memory_space<vmem>>, vector<1x1x16xf32>
    %4 = vector.shape_cast %3 : vector<1x1x16xf32> to vector<1x16xf32>
    %c0_6 = arith.constant 0 : index
    %c0_7 = arith.constant 0 : index
    %c0_8 = arith.constant 0 : index
    %5 = vector.load %arg3[%c0_6, %c0_7, %c0_8] : memref<2x32x32xbf16, #tpu.memory_space<vmem>>, vector<1x32x32xbf16>
    %6 = vector.shape_cast %5 : vector<1x32x32xbf16> to vector<32x32xbf16>
    %cst = arith.constant dense<0.000000e+00> : vector<16x32xf32>
    %7 = tpu.matmul %2, %6, %cst {dimension_numbers = #tpu.dot_dimension_numbers<[1], [0], [0], [1], [0, 0, 1, 1], [], []>} : vector<16x32xbf16>, vector<32x32xbf16>, vector<16x32xf32> -> vector<16x32xf32>
    %c0_9 = arith.constant 0 : index
    %c0_10 = arith.constant 0 : index
    %c0_11 = arith.constant 0 : index
    %8 = vector.load %arg4[%c0_9, %c0_10, %c0_11] : memref<2x1x32xf32, #tpu.memory_space<vmem>>, vector<1x1x32xf32>
    %9 = vector.shape_cast %8 : vector<1x1x32xf32> to vector<1x32xf32>
    %10 = vector.broadcast %9 : vector<1x32xf32> to vector<16x32xf32>
    %11 = arith.addf %7, %10 : vector<16x32xf32>
    %c0_12 = arith.constant 0 : index
    %c0_13 = arith.constant 0 : index
    %c0_14 = arith.constant 0 : index
    %12 = vector.load %arg5[%c0_12, %c0_13, %c0_14] : memref<2x32x32xbf16, #tpu.memory_space<vmem>>, vector<1x32x32xbf16>
    %13 = vector.shape_cast %12 : vector<1x32x32xbf16> to vector<32x32xbf16>
    %cst_15 = arith.constant dense<0.000000e+00> : vector<16x32xf32>
    %14 = tpu.matmul %2, %13, %cst_15 {dimension_numbers = #tpu.dot_dimension_numbers<[1], [0], [0], [1], [0, 0, 1, 1], [], []>} : vector<16x32xbf16>, vector<32x32xbf16>, vector<16x32xf32> -> vector<16x32xf32>
    %c0_16 = arith.constant 0 : index
    %c0_17 = arith.constant 0 : index
    %c0_18 = arith.constant 0 : index
    %15 = vector.load %arg6[%c0_16, %c0_17, %c0_18] : memref<2x1x32xf32, #tpu.memory_space<vmem>>, vector<1x1x32xf32>
    %16 = vector.shape_cast %15 : vector<1x1x32xf32> to vector<1x32xf32>
    %17 = vector.broadcast %16 : vector<1x32xf32> to vector<16x32xf32>
    %18 = arith.addf %14, %17 : vector<16x32xf32>
    %c0_19 = arith.constant 0 : index
    %c0_20 = arith.constant 0 : index
    %c0_21 = arith.constant 0 : index
    %19 = vector.load %arg7[%c0_19, %c0_20, %c0_21] : memref<2x32x32xbf16, #tpu.memory_space<vmem>>, vector<1x32x32xbf16>
    %20 = vector.shape_cast %19 : vector<1x32x32xbf16> to vector<32x32xbf16>
    %cst_22 = arith.constant dense<0.000000e+00> : vector<16x32xf32>
    %21 = tpu.matmul %2, %20, %cst_22 {dimension_numbers = #tpu.dot_dimension_numbers<[1], [0], [0], [1], [0, 0, 1, 1], [], []>} : vector<16x32xbf16>, vector<32x32xbf16>, vector<16x32xf32> -> vector<16x32xf32>
    %c0_23 = arith.constant 0 : index
    %c0_24 = arith.constant 0 : index
    %c0_25 = arith.constant 0 : index
    %22 = vector.load %arg8[%c0_23, %c0_24, %c0_25] : memref<2x1x32xf32, #tpu.memory_space<vmem>>, vector<1x1x32xf32>
    %23 = vector.shape_cast %22 : vector<1x1x32xf32> to vector<1x32xf32>
    %24 = vector.broadcast %23 : vector<1x32xf32> to vector<16x32xf32>
    %25 = arith.addf %21, %24 : vector<16x32xf32>
    %26 = arith.truncf %11 : vector<16x32xf32> to vector<16x32xbf16>
    %27 = arith.truncf %18 : vector<16x32xf32> to vector<16x32xbf16>
    %cst_26 = arith.constant dense<0.000000e+00> : vector<16x16xf32>
    %28 = tpu.matmul %26, %27, %cst_26 {dimension_numbers = #tpu.dot_dimension_numbers<[1], [1], [0], [0], [0, 0, 1, 0], [], []>} : vector<16x32xbf16>, vector<16x32xbf16>, vector<16x16xf32> -> vector<16x16xf32>
    %c0_27 = arith.constant 0 : index
    %c0_28 = arith.constant 0 : index
    %c0_29 = arith.constant 0 : index
    %c0_30 = arith.constant 0 : index
    %29 = vector.load %arg9[%c0_27, %c0_28, %c0_29, %c0_30] : memref<1x2x16x16xf32, #tpu.memory_space<vmem>>, vector<1x1x16x16xf32>
    %30 = vector.shape_cast %29 : vector<1x1x16x16xf32> to vector<16x16xf32>
    %31 = arith.addf %28, %30 : vector<16x16xf32>
    %32 = vector.broadcast %4 : vector<1x16xf32> to vector<16x16xf32>
    %33 = arith.addf %31, %32 : vector<16x16xf32>
    %cst_31 = arith.constant dense<0xFF800000> : vector<16xf32>
    %34 = vector.multi_reduction <maximumf>, %33, %cst_31 [1] : vector<16x16xf32> to vector<16xf32>
    %35 = vector.shape_cast %34 : vector<16xf32> to vector<16x1xf32>
    %36 = vector.broadcast %35 : vector<16x1xf32> to vector<16x16xf32>
    %37 = arith.subf %33, %36 : vector<16x16xf32>
    %38 = math.exp %37 : vector<16x16xf32>
    %cst_32 = arith.constant dense<0.000000e+00> : vector<16xf32>
    %39 = vector.multi_reduction <add>, %38, %cst_32 [1] : vector<16x16xf32> to vector<16xf32>
    %40 = vector.shape_cast %39 : vector<16xf32> to vector<16x1xf32>
    %41 = tpu.reciprocal %40 {approx = true} : vector<16x1xf32> -> vector<16x1xf32>
    %42 = vector.broadcast %41 : vector<16x1xf32> to vector<16x16xf32>
    %43 = arith.mulf %38, %42 : vector<16x16xf32>
    %44 = arith.truncf %43 : vector<16x16xf32> to vector<16x16xbf16>
    %45 = arith.truncf %25 : vector<16x32xf32> to vector<16x32xbf16>
    %cst_33 = arith.constant dense<0.000000e+00> : vector<16x32xf32>
    %46 = tpu.matmul %44, %45, %cst_33 {dimension_numbers = #tpu.dot_dimension_numbers<[1], [0], [0], [1], [0, 0, 1, 1], [], []>} : vector<16x16xbf16>, vector<16x32xbf16>, vector<16x32xf32> -> vector<16x32xf32>
    %c1 = arith.constant 1 : index
    %c0_34 = arith.constant 0 : index
    %c0_35 = arith.constant 0 : index
    %47 = vector.load %arg3[%c1, %c0_34, %c0_35] : memref<2x32x32xbf16, #tpu.memory_space<vmem>>, vector<1x32x32xbf16>
    %48 = vector.shape_cast %47 : vector<1x32x32xbf16> to vector<32x32xbf16>
    %cst_36 = arith.constant dense<0.000000e+00> : vector<16x32xf32>
    %49 = tpu.matmul %2, %48, %cst_36 {dimension_numbers = #tpu.dot_dimension_numbers<[1], [0], [0], [1], [0, 0, 1, 1], [], []>} : vector<16x32xbf16>, vector<32x32xbf16>, vector<16x32xf32> -> vector<16x32xf32>
    %c1_37 = arith.constant 1 : index
    %c0_38 = arith.constant 0 : index
    %c0_39 = arith.constant 0 : index
    %50 = vector.load %arg4[%c1_37, %c0_38, %c0_39] : memref<2x1x32xf32, #tpu.memory_space<vmem>>, vector<1x1x32xf32>
    %51 = vector.shape_cast %50 : vector<1x1x32xf32> to vector<1x32xf32>
    %52 = vector.broadcast %51 : vector<1x32xf32> to vector<16x32xf32>
    %53 = arith.addf %49, %52 : vector<16x32xf32>
    %c1_40 = arith.constant 1 : index
    %c0_41 = arith.constant 0 : index
    %c0_42 = arith.constant 0 : index
    %54 = vector.load %arg5[%c1_40, %c0_41, %c0_42] : memref<2x32x32xbf16, #tpu.memory_space<vmem>>, vector<1x32x32xbf16>
    %55 = vector.shape_cast %54 : vector<1x32x32xbf16> to vector<32x32xbf16>
    %cst_43 = arith.constant dense<0.000000e+00> : vector<16x32xf32>
    %56 = tpu.matmul %2, %55, %cst_43 {dimension_numbers = #tpu.dot_dimension_numbers<[1], [0], [0], [1], [0, 0, 1, 1], [], []>} : vector<16x32xbf16>, vector<32x32xbf16>, vector<16x32xf32> -> vector<16x32xf32>
    %c1_44 = arith.constant 1 : index
    %c0_45 = arith.constant 0 : index
    %c0_46 = arith.constant 0 : index
    %57 = vector.load %arg6[%c1_44, %c0_45, %c0_46] : memref<2x1x32xf32, #tpu.memory_space<vmem>>, vector<1x1x32xf32>
    %58 = vector.shape_cast %57 : vector<1x1x32xf32> to vector<1x32xf32>
    %59 = vector.broadcast %58 : vector<1x32xf32> to vector<16x32xf32>
    %60 = arith.addf %56, %59 : vector<16x32xf32>
    %c1_47 = arith.constant 1 : index
    %c0_48 = arith.constant 0 : index
    %c0_49 = arith.constant 0 : index
    %61 = vector.load %arg7[%c1_47, %c0_48, %c0_49] : memref<2x32x32xbf16, #tpu.memory_space<vmem>>, vector<1x32x32xbf16>
    %62 = vector.shape_cast %61 : vector<1x32x32xbf16> to vector<32x32xbf16>
    %cst_50 = arith.constant dense<0.000000e+00> : vector<16x32xf32>
    %63 = tpu.matmul %2, %62, %cst_50 {dimension_numbers = #tpu.dot_dimension_numbers<[1], [0], [0], [1], [0, 0, 1, 1], [], []>} : vector<16x32xbf16>, vector<32x32xbf16>, vector<16x32xf32> -> vector<16x32xf32>
    %c1_51 = arith.constant 1 : index
    %c0_52 = arith.constant 0 : index
    %c0_53 = arith.constant 0 : index
    %64 = vector.load %arg8[%c1_51, %c0_52, %c0_53] : memref<2x1x32xf32, #tpu.memory_space<vmem>>, vector<1x1x32xf32>
    %65 = vector.shape_cast %64 : vector<1x1x32xf32> to vector<1x32xf32>
    %66 = vector.broadcast %65 : vector<1x32xf32> to vector<16x32xf32>
    %67 = arith.addf %63, %66 : vector<16x32xf32>
    %68 = arith.truncf %53 : vector<16x32xf32> to vector<16x32xbf16>
    %69 = arith.truncf %60 : vector<16x32xf32> to vector<16x32xbf16>
    %cst_54 = arith.constant dense<0.000000e+00> : vector<16x16xf32>
    %70 = tpu.matmul %68, %69, %cst_54 {dimension_numbers = #tpu.dot_dimension_numbers<[1], [1], [0], [0], [0, 0, 1, 0], [], []>} : vector<16x32xbf16>, vector<16x32xbf16>, vector<16x16xf32> -> vector<16x16xf32>
    %c0_55 = arith.constant 0 : index
    %c1_56 = arith.constant 1 : index
    %c0_57 = arith.constant 0 : index
    %c0_58 = arith.constant 0 : index
    %71 = vector.load %arg9[%c0_55, %c1_56, %c0_57, %c0_58] : memref<1x2x16x16xf32, #tpu.memory_space<vmem>>, vector<1x1x16x16xf32>
    %72 = vector.shape_cast %71 : vector<1x1x16x16xf32> to vector<16x16xf32>
    %73 = arith.addf %70, %72 : vector<16x16xf32>
    %74 = vector.broadcast %4 : vector<1x16xf32> to vector<16x16xf32>
    %75 = arith.addf %73, %74 : vector<16x16xf32>
    %cst_59 = arith.constant dense<0xFF800000> : vector<16xf32>
    %76 = vector.multi_reduction <maximumf>, %75, %cst_59 [1] : vector<16x16xf32> to vector<16xf32>
    %77 = vector.shape_cast %76 : vector<16xf32> to vector<16x1xf32>
    %78 = vector.broadcast %77 : vector<16x1xf32> to vector<16x16xf32>
    %79 = arith.subf %75, %78 : vector<16x16xf32>
    %80 = math.exp %79 : vector<16x16xf32>
    %cst_60 = arith.constant dense<0.000000e+00> : vector<16xf32>
    %81 = vector.multi_reduction <add>, %80, %cst_60 [1] : vector<16x16xf32> to vector<16xf32>
    %82 = vector.shape_cast %81 : vector<16xf32> to vector<16x1xf32>
    %83 = tpu.reciprocal %82 {approx = true} : vector<16x1xf32> -> vector<16x1xf32>
    %84 = vector.broadcast %83 : vector<16x1xf32> to vector<16x16xf32>
    %85 = arith.mulf %80, %84 : vector<16x16xf32>
    %86 = arith.truncf %85 : vector<16x16xf32> to vector<16x16xbf16>
    %87 = arith.truncf %67 : vector<16x32xf32> to vector<16x32xbf16>
    %cst_61 = arith.constant dense<0.000000e+00> : vector<16x32xf32>
    %88 = tpu.matmul %86, %87, %cst_61 {dimension_numbers = #tpu.dot_dimension_numbers<[1], [0], [0], [1], [0, 0, 1, 1], [], []>} : vector<16x16xbf16>, vector<16x32xbf16>, vector<16x32xf32> -> vector<16x32xf32>
    %89 = tpu.concatenate %46, %88 in 1 : vector<16x32xf32>, vector<16x32xf32> -> vector<16x64xf32>
    %c0_62 = arith.constant 0 : index
    %c0_63 = arith.constant 0 : index
    %c0_64 = arith.constant 0 : index
    %c0_65 = arith.constant 0 : index
    %90 = vector.load %arg11[%c0_62, %c0_63, %c0_64, %c0_65] : memref<1x8x16x64xf32, #tpu.memory_space<vmem>>, vector<1x1x16x64xf32>
    %91 = vector.shape_cast %90 : vector<1x1x16x64xf32> to vector<16x64xf32>
    %92 = vector.shape_cast %89 : vector<16x64xf32> to vector<1x1x16x64xf32>
    tpu.vector_store %arg11[%c0_62, %c0_63, %c0_64, %c0_65], %92 {strides = array<i32>} : memref<1x8x16x64xf32, #tpu.memory_space<vmem>>, vector<1x1x16x64xf32>,
    %c0_66 = arith.constant 0 : index
    %c1_67 = arith.constant 1 : index
    %c0_68 = arith.constant 0 : index
    %c0_69 = arith.constant 0 : index
    %93 = vector.load %arg2[%c0_66, %c1_67, %c0_68, %c0_69] : memref<1x8x16x32xf32, #tpu.memory_space<vmem>>, vector<1x1x16x32xf32>
    %94 = vector.shape_cast %93 : vector<1x1x16x32xf32> to vector<16x32xf32>
    %95 = arith.truncf %94 : vector<16x32xf32> to vector<16x32xbf16>
    %c0_70 = arith.constant 0 : index
    %c1_71 = arith.constant 1 : index
    %c0_72 = arith.constant 0 : index
    %96 = vector.load %arg10[%c0_70, %c1_71, %c0_72] : memref<1x8x16xf32, #tpu.memory_space<vmem>>, vector<1x1x16xf32>
    %97 = vector.shape_cast %96 : vector<1x1x16xf32> to vector<1x16xf32>
    %c0_73 = arith.constant 0 : index
    %c0_74 = arith.constant 0 : index
    %c0_75 = arith.constant 0 : index
    %98 = vector.load %arg3[%c0_73, %c0_74, %c0_75] : memref<2x32x32xbf16, #tpu.memory_space<vmem>>, vector<1x32x32xbf16>
    %99 = vector.shape_cast %98 : vector<1x32x32xbf16> to vector<32x32xbf16>
    %cst_76 = arith.constant dense<0.000000e+00> : vector<16x32xf32>
    %100 = tpu.matmul %95, %99, %cst_76 {dimension_numbers = #tpu.dot_dimension_numbers<[1], [0], [0], [1], [0, 0, 1, 1], [], []>} : vector<16x32xbf16>, vector<32x32xbf16>, vector<16x32xf32> -> vector<16x32xf32>
    %c0_77 = arith.constant 0 : index
    %c0_78 = arith.constant 0 : index
    %c0_79 = arith.constant 0 : index
    %101 = vector.load %arg4[%c0_77, %c0_78, %c0_79] : memref<2x1x32xf32, #tpu.memory_space<vmem>>, vector<1x1x32xf32>
    %102 = vector.shape_cast %101 : vector<1x1x32xf32> to vector<1x32xf32>
    %103 = vector.broadcast %102 : vector<1x32xf32> to vector<16x32xf32>
    %104 = arith.addf %100, %103 : vector<16x32xf32>
    %c0_80 = arith.constant 0 : index
    %c0_81 = arith.constant 0 : index
    %c0_82 = arith.constant 0 : index
    %105 = vector.load %arg5[%c0_80, %c0_81, %c0_82] : memref<2x32x32xbf16, #tpu.memory_space<vmem>>, vector<1x32x32xbf16>
    %106 = vector.shape_cast %105 : vector<1x32x32xbf16> to vector<32x32xbf16>
    %cst_83 = arith.constant dense<0.000000e+00> : vector<16x32xf32>
    %107 = tpu.matmul %95, %106, %cst_83 {dimension_numbers = #tpu.dot_dimension_numbers<[1], [0], [0], [1], [0, 0, 1, 1], [], []>} : vector<16x32xbf16>, vector<32x32xbf16>, vector<16x32xf32> -> vector<16x32xf32>
    %c0_84 = arith.constant 0 : index
    %c0_85 = arith.constant 0 : index
    %c0_86 = arith.constant 0 : index
    %108 = vector.load %arg6[%c0_84, %c0_85, %c0_86] : memref<2x1x32xf32, #tpu.memory_space<vmem>>, vector<1x1x32xf32>
    %109 = vector.shape_cast %108 : vector<1x1x32xf32> to vector<1x32xf32>
    %110 = vector.broadcast %109 : vector<1x32xf32> to vector<16x32xf32>
    %111 = arith.addf %107, %110 : vector<16x32xf32>
    %c0_87 = arith.constant 0 : index
    %c0_88 = arith.constant 0 : index
    %c0_89 = arith.constant 0 : index
    %112 = vector.load %arg7[%c0_87, %c0_88, %c0_89] : memref<2x32x32xbf16, #tpu.memory_space<vmem>>, vector<1x32x32xbf16>
    %113 = vector.shape_cast %112 : vector<1x32x32xbf16> to vector<32x32xbf16>
    %cst_90 = arith.constant dense<0.000000e+00> : vector<16x32xf32>
    %114 = tpu.matmul %95, %113, %cst_90 {dimension_numbers = #tpu.dot_dimension_numbers<[1], [0], [0], [1], [0, 0, 1, 1], [], []>} : vector<16x32xbf16>, vector<32x32xbf16>, vector<16x32xf32> -> vector<16x32xf32>
    %c0_91 = arith.constant 0 : index
    %c0_92 = arith.constant 0 : index
    %c0_93 = arith.constant 0 : index
    %115 = vector.load %arg8[%c0_91, %c0_92, %c0_93] : memref<2x1x32xf32, #tpu.memory_space<vmem>>, vector<1x1x32xf32>
    %116 = vector.shape_cast %115 : vector<1x1x32xf32> to vector<1x32xf32>
    %117 = vector.broadcast %116 : vector<1x32xf32> to vector<16x32xf32>
    %118 = arith.addf %114, %117 : vector<16x32xf32>
    %119 = arith.truncf %104 : vector<16x32xf32> to vector<16x32xbf16>
    %120 = arith.truncf %111 : vector<16x32xf32> to vector<16x32xbf16>
    %cst_94 = arith.constant dense<0.000000e+00> : vector<16x16xf32>
    %121 = tpu.matmul %119, %120, %cst_94 {dimension_numbers = #tpu.dot_dimension_numbers<[1], [1], [0], [0], [0, 0, 1, 0], [], []>} : vector<16x32xbf16>, vector<16x32xbf16>, vector<16x16xf32> -> vector<16x16xf32>
    %c0_95 = arith.constant 0 : index
    %c0_96 = arith.constant 0 : index
    %c0_97 = arith.constant 0 : index
    %c0_98 = arith.constant 0 : index
    %122 = vector.load %arg9[%c0_95, %c0_96, %c0_97, %c0_98] : memref<1x2x16x16xf32, #tpu.memory_space<vmem>>, vector<1x1x16x16xf32>
    %123 = vector.shape_cast %122 : vector<1x1x16x16xf32> to vector<16x16xf32>
    %124 = arith.addf %121, %123 : vector<16x16xf32>
    %125 = vector.broadcast %97 : vector<1x16xf32> to vector<16x16xf32>
    %126 = arith.addf %124, %125 : vector<16x16xf32>
    %cst_99 = arith.constant dense<0xFF800000> : vector<16xf32>
    %127 = vector.multi_reduction <maximumf>, %126, %cst_99 [1] : vector<16x16xf32> to vector<16xf32>
    %128 = vector.shape_cast %127 : vector<16xf32> to vector<16x1xf32>
    %129 = vector.broadcast %128 : vector<16x1xf32> to vector<16x16xf32>
    %130 = arith.subf %126, %129 : vector<16x16xf32>
    %131 = math.exp %130 : vector<16x16xf32>
    %cst_100 = arith.constant dense<0.000000e+00> : vector<16xf32>
    %132 = vector.multi_reduction <add>, %131, %cst_100 [1] : vector<16x16xf32> to vector<16xf32>
    %133 = vector.shape_cast %132 : vector<16xf32> to vector<16x1xf32>
    %134 = tpu.reciprocal %133 {approx = true} : vector<16x1xf32> -> vector<16x1xf32>
    %135 = vector.broadcast %134 : vector<16x1xf32> to vector<16x16xf32>
    %136 = arith.mulf %131, %135 : vector<16x16xf32>
    %137 = arith.truncf %136 : vector<16x16xf32> to vector<16x16xbf16>
    %138 = arith.truncf %118 : vector<16x32xf32> to vector<16x32xbf16>
    %cst_101 = arith.constant dense<0.000000e+00> : vector<16x32xf32>
    %139 = tpu.matmul %137, %138, %cst_101 {dimension_numbers = #tpu.dot_dimension_numbers<[1], [0], [0], [1], [0, 0, 1, 1], [], []>} : vector<16x16xbf16>, vector<16x32xbf16>, vector<16x32xf32> -> vector<16x32xf32>
    %c1_102 = arith.constant 1 : index
    %c0_103 = arith.constant 0 : index
    %c0_104 = arith.constant 0 : index
    %140 = vector.load %arg3[%c1_102, %c0_103, %c0_104] : memref<2x32x32xbf16, #tpu.memory_space<vmem>>, vector<1x32x32xbf16>
    %141 = vector.shape_cast %140 : vector<1x32x32xbf16> to vector<32x32xbf16>
    %cst_105 = arith.constant dense<0.000000e+00> : vector<16x32xf32>
    %142 = tpu.matmul %95, %141, %cst_105 {dimension_numbers = #tpu.dot_dimension_numbers<[1], [0], [0], [1], [0, 0, 1, 1], [], []>} : vector<16x32xbf16>, vector<32x32xbf16>, vector<16x32xf32> -> vector<16x32xf32>
    %c1_106 = arith.constant 1 : index
    %c0_107 = arith.constant 0 : index
    %c0_108 = arith.constant 0 : index
    %143 = vector.load %arg4[%c1_106, %c0_107, %c0_108] : memref<2x1x32xf32, #tpu.memory_space<vmem>>, vector<1x1x32xf32>
    %144 = vector.shape_cast %143 : vector<1x1x32xf32> to vector<1x32xf32>
    %145 = vector.broadcast %144 : vector<1x32xf32> to vector<16x32xf32>
    %146 = arith.addf %142, %145 : vector<16x32xf32>
    %c1_109 = arith.constant 1 : index
    %c0_110 = arith.constant 0 : index
    %c0_111 = arith.constant 0 : index
    %147 = vector.load %arg5[%c1_109, %c0_110, %c0_111] : memref<2x32x32xbf16, #tpu.memory_space<vmem>>, vector<1x32x32xbf16>
    %148 = vector.shape_cast %147 : vector<1x32x32xbf16> to vector<32x32xbf16>
    %cst_112 = arith.constant dense<0.000000e+00> : vector<16x32xf32>
    %149 = tpu.matmul %95, %148, %cst_112 {dimension_numbers = #tpu.dot_dimension_numbers<[1], [0], [0], [1], [0, 0, 1, 1], [], []>} : vector<16x32xbf16>, vector<32x32xbf16>, vector<16x32xf32> -> vector<16x32xf32>
    %c1_113 = arith.constant 1 : index
    %c0_114 = arith.constant 0 : index
    %c0_115 = arith.constant 0 : index
    %150 = vector.load %arg6[%c1_113, %c0_114, %c0_115] : memref<2x1x32xf32, #tpu.memory_space<vmem>>, vector<1x1x32xf32>
    %151 = vector.shape_cast %150 : vector<1x1x32xf32> to vector<1x32xf32>
    %152 = vector.broadcast %151 : vector<1x32xf32> to vector<16x32xf32>
    %153 = arith.addf %149, %152 : vector<16x32xf32>
    %c1_116 = arith.constant 1 : index
    %c0_117 = arith.constant 0 : index
    %c0_118 = arith.constant 0 : index
    %154 = vector.load %arg7[%c1_116, %c0_117, %c0_118] : memref<2x32x32xbf16, #tpu.memory_space<vmem>>, vector<1x32x32xbf16>
    %155 = vector.shape_cast %154 : vector<1x32x32xbf16> to vector<32x32xbf16>
    %cst_119 = arith.constant dense<0.000000e+00> : vector<16x32xf32>
    %156 = tpu.matmul %95, %155, %cst_119 {dimension_numbers = #tpu.dot_dimension_numbers<[1], [0], [0], [1], [0, 0, 1, 1], [], []>} : vector<16x32xbf16>, vector<32x32xbf16>, vector<16x32xf32> -> vector<16x32xf32>
    %c1_120 = arith.constant 1 : index
    %c0_121 = arith.constant 0 : index
    %c0_122 = arith.constant 0 : index
    %157 = vector.load %arg8[%c1_120, %c0_121, %c0_122] : memref<2x1x32xf32, #tpu.memory_space<vmem>>, vector<1x1x32xf32>
    %158 = vector.shape_cast %157 : vector<1x1x32xf32> to vector<1x32xf32>
    %159 = vector.broadcast %158 : vector<1x32xf32> to vector<16x32xf32>
    %160 = arith.addf %156, %159 : vector<16x32xf32>
    %161 = arith.truncf %146 : vector<16x32xf32> to vector<16x32xbf16>
    %162 = arith.truncf %153 : vector<16x32xf32> to vector<16x32xbf16>
    %cst_123 = arith.constant dense<0.000000e+00> : vector<16x16xf32>
    %163 = tpu.matmul %161, %162, %cst_123 {dimension_numbers = #tpu.dot_dimension_numbers<[1], [1], [0], [0], [0, 0, 1, 0], [], []>} : vector<16x32xbf16>, vector<16x32xbf16>, vector<16x16xf32> -> vector<16x16xf32>
    %c0_124 = arith.constant 0 : index
    %c1_125 = arith.constant 1 : index
    %c0_126 = arith.constant 0 : index
    %c0_127 = arith.constant 0 : index
    %164 = vector.load %arg9[%c0_124, %c1_125, %c0_126, %c0_127] : memref<1x2x16x16xf32, #tpu.memory_space<vmem>>, vector<1x1x16x16xf32>
    %165 = vector.shape_cast %164 : vector<1x1x16x16xf32> to vector<16x16xf32>
    %166 = arith.addf %163, %165 : vector<16x16xf32>
    %167 = vector.broadcast %97 : vector<1x16xf32> to vector<16x16xf32>
    %168 = arith.addf %166, %167 : vector<16x16xf32>
    %cst_128 = arith.constant dense<0xFF800000> : vector<16xf32>
    %169 = vector.multi_reduction <maximumf>, %168, %cst_128 [1] : vector<16x16xf32> to vector<16xf32>
    %170 = vector.shape_cast %169 : vector<16xf32> to vector<16x1xf32>
    %171 = vector.broadcast %170 : vector<16x1xf32> to vector<16x16xf32>
    %172 = arith.subf %168, %171 : vector<16x16xf32>
    %173 = math.exp %172 : vector<16x16xf32>
    %cst_129 = arith.constant dense<0.000000e+00> : vector<16xf32>
    %174 = vector.multi_reduction <add>, %173, %cst_129 [1] : vector<16x16xf32> to vector<16xf32>
    %175 = vector.shape_cast %174 : vector<16xf32> to vector<16x1xf32>
    %176 = tpu.reciprocal %175 {approx = true} : vector<16x1xf32> -> vector<16x1xf32>
    %177 = vector.broadcast %176 : vector<16x1xf32> to vector<16x16xf32>
    %178 = arith.mulf %173, %177 : vector<16x16xf32>
    %179 = arith.truncf %178 : vector<16x16xf32> to vector<16x16xbf16>
    %180 = arith.truncf %160 : vector<16x32xf32> to vector<16x32xbf16>
    %cst_130 = arith.constant dense<0.000000e+00> : vector<16x32xf32>
    %181 = tpu.matmul %179, %180, %cst_130 {dimension_numbers = #tpu.dot_dimension_numbers<[1], [0], [0], [1], [0, 0, 1, 1], [], []>} : vector<16x16xbf16>, vector<16x32xbf16>, vector<16x32xf32> -> vector<16x32xf32>
    %182 = tpu.concatenate %139, %181 in 1 : vector<16x32xf32>, vector<16x32xf32> -> vector<16x64xf32>
    %c0_131 = arith.constant 0 : index
    %c1_132 = arith.constant 1 : index
    %c0_133 = arith.constant 0 : index
    %c0_134 = arith.constant 0 : index
    %183 = vector.load %arg11[%c0_131, %c1_132, %c0_133, %c0_134] : memref<1x8x16x64xf32, #tpu.memory_space<vmem>>, vector<1x1x16x64xf32>
    %184 = vector.shape_cast %183 : vector<1x1x16x64xf32> to vector<16x64xf32>
    %185 = vector.shape_cast %182 : vector<16x64xf32> to vector<1x1x16x64xf32>
    tpu.vector_store %arg11[%c0_131, %c1_132, %c0_133, %c0_134], %185 {strides = array<i32>} : memref<1x8x16x64xf32, #tpu.memory_space<vmem>>, vector<1x1x16x64xf32>,
    %c0_135 = arith.constant 0 : index
    %c2 = arith.constant 2 : index
    %c0_136 = arith.constant 0 : index
    %c0_137 = arith.constant 0 : index
    %186 = vector.load %arg2[%c0_135, %c2, %c0_136, %c0_137] : memref<1x8x16x32xf32, #tpu.memory_space<vmem>>, vector<1x1x16x32xf32>
    %187 = vector.shape_cast %186 : vector<1x1x16x32xf32> to vector<16x32xf32>
    %188 = arith.truncf %187 : vector<16x32xf32> to vector<16x32xbf16>
    %c0_138 = arith.constant 0 : index
    %c2_139 = arith.constant 2 : index
    %c0_140 = arith.constant 0 : index
    %189 = vector.load %arg10[%c0_138, %c2_139, %c0_140] : memref<1x8x16xf32, #tpu.memory_space<vmem>>, vector<1x1x16xf32>
    %190 = vector.shape_cast %189 : vector<1x1x16xf32> to vector<1x16xf32>
    %c0_141 = arith.constant 0 : index
    %c0_142 = arith.constant 0 : index
    %c0_143 = arith.constant 0 : index
    %191 = vector.load %arg3[%c0_141, %c0_142, %c0_143] : memref<2x32x32xbf16, #tpu.memory_space<vmem>>, vector<1x32x32xbf16>
    %192 = vector.shape_cast %191 : vector<1x32x32xbf16> to vector<32x32xbf16>
    %cst_144 = arith.constant dense<0.000000e+00> : vector<16x32xf32>
    %193 = tpu.matmul %188, %192, %cst_144 {dimension_numbers = #tpu.dot_dimension_numbers<[1], [0], [0], [1], [0, 0, 1, 1], [], []>} : vector<16x32xbf16>, vector<32x32xbf16>, vector<16x32xf32> -> vector<16x32xf32>
    %c0_145 = arith.constant 0 : index
    %c0_146 = arith.constant 0 : index
    %c0_147 = arith.constant 0 : index
    %194 = vector.load %arg4[%c0_145, %c0_146, %c0_147] : memref<2x1x32xf32, #tpu.memory_space<vmem>>, vector<1x1x32xf32>
    %195 = vector.shape_cast %194 : vector<1x1x32xf32> to vector<1x32xf32>
    %196 = vector.broadcast %195 : vector<1x32xf32> to vector<16x32xf32>
    %197 = arith.addf %193, %196 : vector<16x32xf32>
    %c0_148 = arith.constant 0 : index
    %c0_149 = arith.constant 0 : index
    %c0_150 = arith.constant 0 : index
    %198 = vector.load %arg5[%c0_148, %c0_149, %c0_150] : memref<2x32x32xbf16, #tpu.memory_space<vmem>>, vector<1x32x32xbf16>
    %199 = vector.shape_cast %198 : vector<1x32x32xbf16> to vector<32x32xbf16>
    %cst_151 = arith.constant dense<0.000000e+00> : vector<16x32xf32>
    %200 = tpu.matmul %188, %199, %cst_151 {dimension_numbers = #tpu.dot_dimension_numbers<[1], [0], [0], [1], [0, 0, 1, 1], [], []>} : vector<16x32xbf16>, vector<32x32xbf16>, vector<16x32xf32> -> vector<16x32xf32>
    %c0_152 = arith.constant 0 : index
    %c0_153 = arith.constant 0 : index
    %c0_154 = arith.constant 0 : index
    %201 = vector.load %arg6[%c0_152, %c0_153, %c0_154] : memref<2x1x32xf32, #tpu.memory_space<vmem>>, vector<1x1x32xf32>
    %202 = vector.shape_cast %201 : vector<1x1x32xf32> to vector<1x32xf32>
    %203 = vector.broadcast %202 : vector<1x32xf32> to vector<16x32xf32>
    %204 = arith.addf %200, %203 : vector<16x32xf32>
    %c0_155 = arith.constant 0 : index
    %c0_156 = arith.constant 0 : index
    %c0_157 = arith.constant 0 : index
    %205 = vector.load %arg7[%c0_155, %c0_156, %c0_157] : memref<2x32x32xbf16, #tpu.memory_space<vmem>>, vector<1x32x32xbf16>
    %206 = vector.shape_cast %205 : vector<1x32x32xbf16> to vector<32x32xbf16>
    %cst_158 = arith.constant dense<0.000000e+00> : vector<16x32xf32>
    %207 = tpu.matmul %188, %206, %cst_158 {dimension_numbers = #tpu.dot_dimension_numbers<[1], [0], [0], [1], [0, 0, 1, 1], [], []>} : vector<16x32xbf16>, vector<32x32xbf16>, vector<16x32xf32> -> vector<16x32xf32>
    %c0_159 = arith.constant 0 : index
    %c0_160 = arith.constant 0 : index
    %c0_161 = arith.constant 0 : index
    %208 = vector.load %arg8[%c0_159, %c0_160, %c0_161] : memref<2x1x32xf32, #tpu.memory_space<vmem>>, vector<1x1x32xf32>
    %209 = vector.shape_cast %208 : vector<1x1x32xf32> to vector<1x32xf32>
    %210 = vector.broadcast %209 : vector<1x32xf32> to vector<16x32xf32>
    %211 = arith.addf %207, %210 : vector<16x32xf32>
    %212 = arith.truncf %197 : vector<16x32xf32> to vector<16x32xbf16>
    %213 = arith.truncf %204 : vector<16x32xf32> to vector<16x32xbf16>
    %cst_162 = arith.constant dense<0.000000e+00> : vector<16x16xf32>
    %214 = tpu.matmul %212, %213, %cst_162 {dimension_numbers = #tpu.dot_dimension_numbers<[1], [1], [0], [0], [0, 0, 1, 0], [], []>} : vector<16x32xbf16>, vector<16x32xbf16>, vector<16x16xf32> -> vector<16x16xf32>
    %c0_163 = arith.constant 0 : index
    %c0_164 = arith.constant 0 : index
    %c0_165 = arith.constant 0 : index
    %c0_166 = arith.constant 0 : index
    %215 = vector.load %arg9[%c0_163, %c0_164, %c0_165, %c0_166] : memref<1x2x16x16xf32, #tpu.memory_space<vmem>>, vector<1x1x16x16xf32>
    %216 = vector.shape_cast %215 : vector<1x1x16x16xf32> to vector<16x16xf32>
    %217 = arith.addf %214, %216 : vector<16x16xf32>
    %218 = vector.broadcast %190 : vector<1x16xf32> to vector<16x16xf32>
    %219 = arith.addf %217, %218 : vector<16x16xf32>
    %cst_167 = arith.constant dense<0xFF800000> : vector<16xf32>
    %220 = vector.multi_reduction <maximumf>, %219, %cst_167 [1] : vector<16x16xf32> to vector<16xf32>
    %221 = vector.shape_cast %220 : vector<16xf32> to vector<16x1xf32>
    %222 = vector.broadcast %221 : vector<16x1xf32> to vector<16x16xf32>
    %223 = arith.subf %219, %222 : vector<16x16xf32>
    %224 = math.exp %223 : vector<16x16xf32>
    %cst_168 = arith.constant dense<0.000000e+00> : vector<16xf32>
    %225 = vector.multi_reduction <add>, %224, %cst_168 [1] : vector<16x16xf32> to vector<16xf32>
    %226 = vector.shape_cast %225 : vector<16xf32> to vector<16x1xf32>
    %227 = tpu.reciprocal %226 {approx = true} : vector<16x1xf32> -> vector<16x1xf32>
    %228 = vector.broadcast %227 : vector<16x1xf32> to vector<16x16xf32>
    %229 = arith.mulf %224, %228 : vector<16x16xf32>
    %230 = arith.truncf %229 : vector<16x16xf32> to vector<16x16xbf16>
    %231 = arith.truncf %211 : vector<16x32xf32> to vector<16x32xbf16>
    %cst_169 = arith.constant dense<0.000000e+00> : vector<16x32xf32>
    %232 = tpu.matmul %230, %231, %cst_169 {dimension_numbers = #tpu.dot_dimension_numbers<[1], [0], [0], [1], [0, 0, 1, 1], [], []>} : vector<16x16xbf16>, vector<16x32xbf16>, vector<16x32xf32> -> vector<16x32xf32>
    %c1_170 = arith.constant 1 : index
    %c0_171 = arith.constant 0 : index
    %c0_172 = arith.constant 0 : index
    %233 = vector.load %arg3[%c1_170, %c0_171, %c0_172] : memref<2x32x32xbf16, #tpu.memory_space<vmem>>, vector<1x32x32xbf16>
    %234 = vector.shape_cast %233 : vector<1x32x32xbf16> to vector<32x32xbf16>
    %cst_173 = arith.constant dense<0.000000e+00> : vector<16x32xf32>
    %235 = tpu.matmul %188, %234, %cst_173 {dimension_numbers = #tpu.dot_dimension_numbers<[1], [0], [0], [1], [0, 0, 1, 1], [], []>} : vector<16x32xbf16>, vector<32x32xbf16>, vector<16x32xf32> -> vector<16x32xf32>
    %c1_174 = arith.constant 1 : index
    %c0_175 = arith.constant 0 : index
    %c0_176 = arith.constant 0 : index
    %236 = vector.load %arg4[%c1_174, %c0_175, %c0_176] : memref<2x1x32xf32, #tpu.memory_space<vmem>>, vector<1x1x32xf32>
    %237 = vector.shape_cast %236 : vector<1x1x32xf32> to vector<1x32xf32>
    %238 = vector.broadcast %237 : vector<1x32xf32> to vector<16x32xf32>
    %239 = arith.addf %235, %238 : vector<16x32xf32>
    %c1_177 = arith.constant 1 : index
    %c0_178 = arith.constant 0 : index
    %c0_179 = arith.constant 0 : index
    %240 = vector.load %arg5[%c1_177, %c0_178, %c0_179] : memref<2x32x32xbf16, #tpu.memory_space<vmem>>, vector<1x32x32xbf16>
    %241 = vector.shape_cast %240 : vector<1x32x32xbf16> to vector<32x32xbf16>
    %cst_180 = arith.constant dense<0.000000e+00> : vector<16x32xf32>
    %242 = tpu.matmul %188, %241, %cst_180 {dimension_numbers = #tpu.dot_dimension_numbers<[1], [0], [0], [1], [0, 0, 1, 1], [], []>} : vector<16x32xbf16>, vector<32x32xbf16>, vector<16x32xf32> -> vector<16x32xf32>
    %c1_181 = arith.constant 1 : index
    %c0_182 = arith.constant 0 : index
    %c0_183 = arith.constant 0 : index
    %243 = vector.load %arg6[%c1_181, %c0_182, %c0_183] : memref<2x1x32xf32, #tpu.memory_space<vmem>>, vector<1x1x32xf32>
    %244 = vector.shape_cast %243 : vector<1x1x32xf32> to vector<1x32xf32>
    %245 = vector.broadcast %244 : vector<1x32xf32> to vector<16x32xf32>
    %246 = arith.addf %242, %245 : vector<16x32xf32>
    %c1_184 = arith.constant 1 : index
    %c0_185 = arith.constant 0 : index
    %c0_186 = arith.constant 0 : index
    %247 = vector.load %arg7[%c1_184, %c0_185, %c0_186] : memref<2x32x32xbf16, #tpu.memory_space<vmem>>, vector<1x32x32xbf16>
    %248 = vector.shape_cast %247 : vector<1x32x32xbf16> to vector<32x32xbf16>
    %cst_187 = arith.constant dense<0.000000e+00> : vector<16x32xf32>
    %249 = tpu.matmul %188, %248, %cst_187 {dimension_numbers = #tpu.dot_dimension_numbers<[1], [0], [0], [1], [0, 0, 1, 1], [], []>} : vector<16x32xbf16>, vector<32x32xbf16>, vector<16x32xf32> -> vector<16x32xf32>
    %c1_188 = arith.constant 1 : index
    %c0_189 = arith.constant 0 : index
    %c0_190 = arith.constant 0 : index
    %250 = vector.load %arg8[%c1_188, %c0_189, %c0_190] : memref<2x1x32xf32, #tpu.memory_space<vmem>>, vector<1x1x32xf32>
    %251 = vector.shape_cast %250 : vector<1x1x32xf32> to vector<1x32xf32>
    %252 = vector.broadcast %251 : vector<1x32xf32> to vector<16x32xf32>
    %253 = arith.addf %249, %252 : vector<16x32xf32>
    %254 = arith.truncf %239 : vector<16x32xf32> to vector<16x32xbf16>
    %255 = arith.truncf %246 : vector<16x32xf32> to vector<16x32xbf16>
    %cst_191 = arith.constant dense<0.000000e+00> : vector<16x16xf32>
    %256 = tpu.matmul %254, %255, %cst_191 {dimension_numbers = #tpu.dot_dimension_numbers<[1], [1], [0], [0], [0, 0, 1, 0], [], []>} : vector<16x32xbf16>, vector<16x32xbf16>, vector<16x16xf32> -> vector<16x16xf32>
    %c0_192 = arith.constant 0 : index
    %c1_193 = arith.constant 1 : index
    %c0_194 = arith.constant 0 : index
    %c0_195 = arith.constant 0 : index
    %257 = vector.load %arg9[%c0_192, %c1_193, %c0_194, %c0_195] : memref<1x2x16x16xf32, #tpu.memory_space<vmem>>, vector<1x1x16x16xf32>
    %258 = vector.shape_cast %257 : vector<1x1x16x16xf32> to vector<16x16xf32>
    %259 = arith.addf %256, %258 : vector<16x16xf32>
    %260 = vector.broadcast %190 : vector<1x16xf32> to vector<16x16xf32>
    %261 = arith.addf %259, %260 : vector<16x16xf32>
    %cst_196 = arith.constant dense<0xFF800000> : vector<16xf32>
    %262 = vector.multi_reduction <maximumf>, %261, %cst_196 [1] : vector<16x16xf32> to vector<16xf32>
    %263 = vector.shape_cast %262 : vector<16xf32> to vector<16x1xf32>
    %264 = vector.broadcast %263 : vector<16x1xf32> to vector<16x16xf32>
    %265 = arith.subf %261, %264 : vector<16x16xf32>
    %266 = math.exp %265 : vector<16x16xf32>
    %cst_197 = arith.constant dense<0.000000e+00> : vector<16xf32>
    %267 = vector.multi_reduction <add>, %266, %cst_197 [1] : vector<16x16xf32> to vector<16xf32>
    %268 = vector.shape_cast %267 : vector<16xf32> to vector<16x1xf32>
    %269 = tpu.reciprocal %268 {approx = true} : vector<16x1xf32> -> vector<16x1xf32>
    %270 = vector.broadcast %269 : vector<16x1xf32> to vector<16x16xf32>
    %271 = arith.mulf %266, %270 : vector<16x16xf32>
    %272 = arith.truncf %271 : vector<16x16xf32> to vector<16x16xbf16>
    %273 = arith.truncf %253 : vector<16x32xf32> to vector<16x32xbf16>
    %cst_198 = arith.constant dense<0.000000e+00> : vector<16x32xf32>
    %274 = tpu.matmul %272, %273, %cst_198 {dimension_numbers = #tpu.dot_dimension_numbers<[1], [0], [0], [1], [0, 0, 1, 1], [], []>} : vector<16x16xbf16>, vector<16x32xbf16>, vector<16x32xf32> -> vector<16x32xf32>
    %275 = tpu.concatenate %232, %274 in 1 : vector<16x32xf32>, vector<16x32xf32> -> vector<16x64xf32>
    %c0_199 = arith.constant 0 : index
    %c2_200 = arith.constant 2 : index
    %c0_201 = arith.constant 0 : index
    %c0_202 = arith.constant 0 : index
    %276 = vector.load %arg11[%c0_199, %c2_200, %c0_201, %c0_202] : memref<1x8x16x64xf32, #tpu.memory_space<vmem>>, vector<1x1x16x64xf32>
    %277 = vector.shape_cast %276 : vector<1x1x16x64xf32> to vector<16x64xf32>
    %278 = vector.shape_cast %275 : vector<16x64xf32> to vector<1x1x16x64xf32>
    tpu.vector_store %arg11[%c0_199, %c2_200, %c0_201, %c0_202], %278 {strides = array<i32>} : memref<1x8x16x64xf32, #tpu.memory_space<vmem>>, vector<1x1x16x64xf32>,
    %c0_203 = arith.constant 0 : index
    %c3 = arith.constant 3 : index
    %c0_204 = arith.constant 0 : index
    %c0_205 = arith.constant 0 : index
    %279 = vector.load %arg2[%c0_203, %c3, %c0_204, %c0_205] : memref<1x8x16x32xf32, #tpu.memory_space<vmem>>, vector<1x1x16x32xf32>
    %280 = vector.shape_cast %279 : vector<1x1x16x32xf32> to vector<16x32xf32>
    %281 = arith.truncf %280 : vector<16x32xf32> to vector<16x32xbf16>
    %c0_206 = arith.constant 0 : index
    %c3_207 = arith.constant 3 : index
    %c0_208 = arith.constant 0 : index
    %282 = vector.load %arg10[%c0_206, %c3_207, %c0_208] : memref<1x8x16xf32, #tpu.memory_space<vmem>>, vector<1x1x16xf32>
    %283 = vector.shape_cast %282 : vector<1x1x16xf32> to vector<1x16xf32>
    %c0_209 = arith.constant 0 : index
    %c0_210 = arith.constant 0 : index
    %c0_211 = arith.constant 0 : index
    %284 = vector.load %arg3[%c0_209, %c0_210, %c0_211] : memref<2x32x32xbf16, #tpu.memory_space<vmem>>, vector<1x32x32xbf16>
    %285 = vector.shape_cast %284 : vector<1x32x32xbf16> to vector<32x32xbf16>
    %cst_212 = arith.constant dense<0.000000e+00> : vector<16x32xf32>
    %286 = tpu.matmul %281, %285, %cst_212 {dimension_numbers = #tpu.dot_dimension_numbers<[1], [0], [0], [1], [0, 0, 1, 1], [], []>} : vector<16x32xbf16>, vector<32x32xbf16>, vector<16x32xf32> -> vector<16x32xf32>
    %c0_213 = arith.constant 0 : index
    %c0_214 = arith.constant 0 : index
    %c0_215 = arith.constant 0 : index
    %287 = vector.load %arg4[%c0_213, %c0_214, %c0_215] : memref<2x1x32xf32, #tpu.memory_space<vmem>>, vector<1x1x32xf32>
    %288 = vector.shape_cast %287 : vector<1x1x32xf32> to vector<1x32xf32>
    %289 = vector.broadcast %288 : vector<1x32xf32> to vector<16x32xf32>
    %290 = arith.addf %286, %289 : vector<16x32xf32>
    %c0_216 = arith.constant 0 : index
    %c0_217 = arith.constant 0 : index
    %c0_218 = arith.constant 0 : index
    %291 = vector.load %arg5[%c0_216, %c0_217, %c0_218] : memref<2x32x32xbf16, #tpu.memory_space<vmem>>, vector<1x32x32xbf16>
    %292 = vector.shape_cast %291 : vector<1x32x32xbf16> to vector<32x32xbf16>
    %cst_219 = arith.constant dense<0.000000e+00> : vector<16x32xf32>
    %293 = tpu.matmul %281, %292, %cst_219 {dimension_numbers = #tpu.dot_dimension_numbers<[1], [0], [0], [1], [0, 0, 1, 1], [], []>} : vector<16x32xbf16>, vector<32x32xbf16>, vector<16x32xf32> -> vector<16x32xf32>
    %c0_220 = arith.constant 0 : index
    %c0_221 = arith.constant 0 : index
    %c0_222 = arith.constant 0 : index
    %294 = vector.load %arg6[%c0_220, %c0_221, %c0_222] : memref<2x1x32xf32, #tpu.memory_space<vmem>>, vector<1x1x32xf32>
    %295 = vector.shape_cast %294 : vector<1x1x32xf32> to vector<1x32xf32>
    %296 = vector.broadcast %295 : vector<1x32xf32> to vector<16x32xf32>
    %297 = arith.addf %293, %296 : vector<16x32xf32>
    %c0_223 = arith.constant 0 : index
    %c0_224 = arith.constant 0 : index
    %c0_225 = arith.constant 0 : index
    %298 = vector.load %arg7[%c0_223, %c0_224, %c0_225] : memref<2x32x32xbf16, #tpu.memory_space<vmem>>, vector<1x32x32xbf16>
    %299 = vector.shape_cast %298 : vector<1x32x32xbf16> to vector<32x32xbf16>
    %cst_226 = arith.constant dense<0.000000e+00> : vector<16x32xf32>
    %300 = tpu.matmul %281, %299, %cst_226 {dimension_numbers = #tpu.dot_dimension_numbers<[1], [0], [0], [1], [0, 0, 1, 1], [], []>} : vector<16x32xbf16>, vector<32x32xbf16>, vector<16x32xf32> -> vector<16x32xf32>
    %c0_227 = arith.constant 0 : index
    %c0_228 = arith.constant 0 : index
    %c0_229 = arith.constant 0 : index
    %301 = vector.load %arg8[%c0_227, %c0_228, %c0_229] : memref<2x1x32xf32, #tpu.memory_space<vmem>>, vector<1x1x32xf32>
    %302 = vector.shape_cast %301 : vector<1x1x32xf32> to vector<1x32xf32>
    %303 = vector.broadcast %302 : vector<1x32xf32> to vector<16x32xf32>
    %304 = arith.addf %300, %303 : vector<16x32xf32>
    %305 = arith.truncf %290 : vector<16x32xf32> to vector<16x32xbf16>
    %306 = arith.truncf %297 : vector<16x32xf32> to vector<16x32xbf16>
    %cst_230 = arith.constant dense<0.000000e+00> : vector<16x16xf32>
    %307 = tpu.matmul %305, %306, %cst_230 {dimension_numbers = #tpu.dot_dimension_numbers<[1], [1], [0], [0], [0, 0, 1, 0], [], []>} : vector<16x32xbf16>, vector<16x32xbf16>, vector<16x16xf32> -> vector<16x16xf32>
    %c0_231 = arith.constant 0 : index
    %c0_232 = arith.constant 0 : index
    %c0_233 = arith.constant 0 : index
    %c0_234 = arith.constant 0 : index
    %308 = vector.load %arg9[%c0_231, %c0_232, %c0_233, %c0_234] : memref<1x2x16x16xf32, #tpu.memory_space<vmem>>, vector<1x1x16x16xf32>
    %309 = vector.shape_cast %308 : vector<1x1x16x16xf32> to vector<16x16xf32>
    %310 = arith.addf %307, %309 : vector<16x16xf32>
    %311 = vector.broadcast %283 : vector<1x16xf32> to vector<16x16xf32>
    %312 = arith.addf %310, %311 : vector<16x16xf32>
    %cst_235 = arith.constant dense<0xFF800000> : vector<16xf32>
    %313 = vector.multi_reduction <maximumf>, %312, %cst_235 [1] : vector<16x16xf32> to vector<16xf32>
    %314 = vector.shape_cast %313 : vector<16xf32> to vector<16x1xf32>
    %315 = vector.broadcast %314 : vector<16x1xf32> to vector<16x16xf32>
    %316 = arith.subf %312, %315 : vector<16x16xf32>
    %317 = math.exp %316 : vector<16x16xf32>
    %cst_236 = arith.constant dense<0.000000e+00> : vector<16xf32>
    %318 = vector.multi_reduction <add>, %317, %cst_236 [1] : vector<16x16xf32> to vector<16xf32>
    %319 = vector.shape_cast %318 : vector<16xf32> to vector<16x1xf32>
    %320 = tpu.reciprocal %319 {approx = true} : vector<16x1xf32> -> vector<16x1xf32>
    %321 = vector.broadcast %320 : vector<16x1xf32> to vector<16x16xf32>
    %322 = arith.mulf %317, %321 : vector<16x16xf32>
    %323 = arith.truncf %322 : vector<16x16xf32> to vector<16x16xbf16>
    %324 = arith.truncf %304 : vector<16x32xf32> to vector<16x32xbf16>
    %cst_237 = arith.constant dense<0.000000e+00> : vector<16x32xf32>
    %325 = tpu.matmul %323, %324, %cst_237 {dimension_numbers = #tpu.dot_dimension_numbers<[1], [0], [0], [1], [0, 0, 1, 1], [], []>} : vector<16x16xbf16>, vector<16x32xbf16>, vector<16x32xf32> -> vector<16x32xf32>
    %c1_238 = arith.constant 1 : index
    %c0_239 = arith.constant 0 : index
    %c0_240 = arith.constant 0 : index
    %326 = vector.load %arg3[%c1_238, %c0_239, %c0_240] : memref<2x32x32xbf16, #tpu.memory_space<vmem>>, vector<1x32x32xbf16>
    %327 = vector.shape_cast %326 : vector<1x32x32xbf16> to vector<32x32xbf16>
    %cst_241 = arith.constant dense<0.000000e+00> : vector<16x32xf32>
    %328 = tpu.matmul %281, %327, %cst_241 {dimension_numbers = #tpu.dot_dimension_numbers<[1], [0], [0], [1], [0, 0, 1, 1], [], []>} : vector<16x32xbf16>, vector<32x32xbf16>, vector<16x32xf32> -> vector<16x32xf32>
    %c1_242 = arith.constant 1 : index
    %c0_243 = arith.constant 0 : index
    %c0_244 = arith.constant 0 : index
    %329 = vector.load %arg4[%c1_242, %c0_243, %c0_244] : memref<2x1x32xf32, #tpu.memory_space<vmem>>, vector<1x1x32xf32>
    %330 = vector.shape_cast %329 : vector<1x1x32xf32> to vector<1x32xf32>
    %331 = vector.broadcast %330 : vector<1x32xf32> to vector<16x32xf32>
    %332 = arith.addf %328, %331 : vector<16x32xf32>
    %c1_245 = arith.constant 1 : index
    %c0_246 = arith.constant 0 : index
    %c0_247 = arith.constant 0 : index
    %333 = vector.load %arg5[%c1_245, %c0_246, %c0_247] : memref<2x32x32xbf16, #tpu.memory_space<vmem>>, vector<1x32x32xbf16>
    %334 = vector.shape_cast %333 : vector<1x32x32xbf16> to vector<32x32xbf16>
    %cst_248 = arith.constant dense<0.000000e+00> : vector<16x32xf32>
    %335 = tpu.matmul %281, %334, %cst_248 {dimension_numbers = #tpu.dot_dimension_numbers<[1], [0], [0], [1], [0, 0, 1, 1], [], []>} : vector<16x32xbf16>, vector<32x32xbf16>, vector<16x32xf32> -> vector<16x32xf32>
    %c1_249 = arith.constant 1 : index
    %c0_250 = arith.constant 0 : index
    %c0_251 = arith.constant 0 : index
    %336 = vector.load %arg6[%c1_249, %c0_250, %c0_251] : memref<2x1x32xf32, #tpu.memory_space<vmem>>, vector<1x1x32xf32>
    %337 = vector.shape_cast %336 : vector<1x1x32xf32> to vector<1x32xf32>
    %338 = vector.broadcast %337 : vector<1x32xf32> to vector<16x32xf32>
    %339 = arith.addf %335, %338 : vector<16x32xf32>
    %c1_252 = arith.constant 1 : index
    %c0_253 = arith.constant 0 : index
    %c0_254 = arith.constant 0 : index
    %340 = vector.load %arg7[%c1_252, %c0_253, %c0_254] : memref<2x32x32xbf16, #tpu.memory_space<vmem>>, vector<1x32x32xbf16>
    %341 = vector.shape_cast %340 : vector<1x32x32xbf16> to vector<32x32xbf16>
    %cst_255 = arith.constant dense<0.000000e+00> : vector<16x32xf32>
    %342 = tpu.matmul %281, %341, %cst_255 {dimension_numbers = #tpu.dot_dimension_numbers<[1], [0], [0], [1], [0, 0, 1, 1], [], []>} : vector<16x32xbf16>, vector<32x32xbf16>, vector<16x32xf32> -> vector<16x32xf32>
    %c1_256 = arith.constant 1 : index
    %c0_257 = arith.constant 0 : index
    %c0_258 = arith.constant 0 : index
    %343 = vector.load %arg8[%c1_256, %c0_257, %c0_258] : memref<2x1x32xf32, #tpu.memory_space<vmem>>, vector<1x1x32xf32>
    %344 = vector.shape_cast %343 : vector<1x1x32xf32> to vector<1x32xf32>
    %345 = vector.broadcast %344 : vector<1x32xf32> to vector<16x32xf32>
    %346 = arith.addf %342, %345 : vector<16x32xf32>
    %347 = arith.truncf %332 : vector<16x32xf32> to vector<16x32xbf16>
    %348 = arith.truncf %339 : vector<16x32xf32> to vector<16x32xbf16>
    %cst_259 = arith.constant dense<0.000000e+00> : vector<16x16xf32>
    %349 = tpu.matmul %347, %348, %cst_259 {dimension_numbers = #tpu.dot_dimension_numbers<[1], [1], [0], [0], [0, 0, 1, 0], [], []>} : vector<16x32xbf16>, vector<16x32xbf16>, vector<16x16xf32> -> vector<16x16xf32>
    %c0_260 = arith.constant 0 : index
    %c1_261 = arith.constant 1 : index
    %c0_262 = arith.constant 0 : index
    %c0_263 = arith.constant 0 : index
    %350 = vector.load %arg9[%c0_260, %c1_261, %c0_262, %c0_263] : memref<1x2x16x16xf32, #tpu.memory_space<vmem>>, vector<1x1x16x16xf32>
    %351 = vector.shape_cast %350 : vector<1x1x16x16xf32> to vector<16x16xf32>
    %352 = arith.addf %349, %351 : vector<16x16xf32>
    %353 = vector.broadcast %283 : vector<1x16xf32> to vector<16x16xf32>
    %354 = arith.addf %352, %353 : vector<16x16xf32>
    %cst_264 = arith.constant dense<0xFF800000> : vector<16xf32>
    %355 = vector.multi_reduction <maximumf>, %354, %cst_264 [1] : vector<16x16xf32> to vector<16xf32>
    %356 = vector.shape_cast %355 : vector<16xf32> to vector<16x1xf32>
    %357 = vector.broadcast %356 : vector<16x1xf32> to vector<16x16xf32>
    %358 = arith.subf %354, %357 : vector<16x16xf32>
    %359 = math.exp %358 : vector<16x16xf32>
    %cst_265 = arith.constant dense<0.000000e+00> : vector<16xf32>
    %360 = vector.multi_reduction <add>, %359, %cst_265 [1] : vector<16x16xf32> to vector<16xf32>
    %361 = vector.shape_cast %360 : vector<16xf32> to vector<16x1xf32>
    %362 = tpu.reciprocal %361 {approx = true} : vector<16x1xf32> -> vector<16x1xf32>
    %363 = vector.broadcast %362 : vector<16x1xf32> to vector<16x16xf32>
    %364 = arith.mulf %359, %363 : vector<16x16xf32>
    %365 = arith.truncf %364 : vector<16x16xf32> to vector<16x16xbf16>
    %366 = arith.truncf %346 : vector<16x32xf32> to vector<16x32xbf16>
    %cst_266 = arith.constant dense<0.000000e+00> : vector<16x32xf32>
    %367 = tpu.matmul %365, %366, %cst_266 {dimension_numbers = #tpu.dot_dimension_numbers<[1], [0], [0], [1], [0, 0, 1, 1], [], []>} : vector<16x16xbf16>, vector<16x32xbf16>, vector<16x32xf32> -> vector<16x32xf32>
    %368 = tpu.concatenate %325, %367 in 1 : vector<16x32xf32>, vector<16x32xf32> -> vector<16x64xf32>
    %c0_267 = arith.constant 0 : index
    %c3_268 = arith.constant 3 : index
    %c0_269 = arith.constant 0 : index
    %c0_270 = arith.constant 0 : index
    %369 = vector.load %arg11[%c0_267, %c3_268, %c0_269, %c0_270] : memref<1x8x16x64xf32, #tpu.memory_space<vmem>>, vector<1x1x16x64xf32>
    %370 = vector.shape_cast %369 : vector<1x1x16x64xf32> to vector<16x64xf32>
    %371 = vector.shape_cast %368 : vector<16x64xf32> to vector<1x1x16x64xf32>
    tpu.vector_store %arg11[%c0_267, %c3_268, %c0_269, %c0_270], %371 {strides = array<i32>} : memref<1x8x16x64xf32, #tpu.memory_space<vmem>>, vector<1x1x16x64xf32>,
    %c0_271 = arith.constant 0 : index
    %c4 = arith.constant 4 : index
    %c0_272 = arith.constant 0 : index
    %c0_273 = arith.constant 0 : index
    %372 = vector.load %arg2[%c0_271, %c4, %c0_272, %c0_273] : memref<1x8x16x32xf32, #tpu.memory_space<vmem>>, vector<1x1x16x32xf32>
    %373 = vector.shape_cast %372 : vector<1x1x16x32xf32> to vector<16x32xf32>
    %374 = arith.truncf %373 : vector<16x32xf32> to vector<16x32xbf16>
    %c0_274 = arith.constant 0 : index
    %c4_275 = arith.constant 4 : index
    %c0_276 = arith.constant 0 : index
    %375 = vector.load %arg10[%c0_274, %c4_275, %c0_276] : memref<1x8x16xf32, #tpu.memory_space<vmem>>, vector<1x1x16xf32>
    %376 = vector.shape_cast %375 : vector<1x1x16xf32> to vector<1x16xf32>
    %c0_277 = arith.constant 0 : index
    %c0_278 = arith.constant 0 : index
    %c0_279 = arith.constant 0 : index
    %377 = vector.load %arg3[%c0_277, %c0_278, %c0_279] : memref<2x32x32xbf16, #tpu.memory_space<vmem>>, vector<1x32x32xbf16>
    %378 = vector.shape_cast %377 : vector<1x32x32xbf16> to vector<32x32xbf16>
    %cst_280 = arith.constant dense<0.000000e+00> : vector<16x32xf32>
    %379 = tpu.matmul %374, %378, %cst_280 {dimension_numbers = #tpu.dot_dimension_numbers<[1], [0], [0], [1], [0, 0, 1, 1], [], []>} : vector<16x32xbf16>, vector<32x32xbf16>, vector<16x32xf32> -> vector<16x32xf32>
    %c0_281 = arith.constant 0 : index
    %c0_282 = arith.constant 0 : index
    %c0_283 = arith.constant 0 : index
    %380 = vector.load %arg4[%c0_281, %c0_282, %c0_283] : memref<2x1x32xf32, #tpu.memory_space<vmem>>, vector<1x1x32xf32>
    %381 = vector.shape_cast %380 : vector<1x1x32xf32> to vector<1x32xf32>
    %382 = vector.broadcast %381 : vector<1x32xf32> to vector<16x32xf32>
    %383 = arith.addf %379, %382 : vector<16x32xf32>
    %c0_284 = arith.constant 0 : index
    %c0_285 = arith.constant 0 : index
    %c0_286 = arith.constant 0 : index
    %384 = vector.load %arg5[%c0_284, %c0_285, %c0_286] : memref<2x32x32xbf16, #tpu.memory_space<vmem>>, vector<1x32x32xbf16>
    %385 = vector.shape_cast %384 : vector<1x32x32xbf16> to vector<32x32xbf16>
    %cst_287 = arith.constant dense<0.000000e+00> : vector<16x32xf32>
    %386 = tpu.matmul %374, %385, %cst_287 {dimension_numbers = #tpu.dot_dimension_numbers<[1], [0], [0], [1], [0, 0, 1, 1], [], []>} : vector<16x32xbf16>, vector<32x32xbf16>, vector<16x32xf32> -> vector<16x32xf32>
    %c0_288 = arith.constant 0 : index
    %c0_289 = arith.constant 0 : index
    %c0_290 = arith.constant 0 : index
    %387 = vector.load %arg6[%c0_288, %c0_289, %c0_290] : memref<2x1x32xf32, #tpu.memory_space<vmem>>, vector<1x1x32xf32>
    %388 = vector.shape_cast %387 : vector<1x1x32xf32> to vector<1x32xf32>
    %389 = vector.broadcast %388 : vector<1x32xf32> to vector<16x32xf32>
    %390 = arith.addf %386, %389 : vector<16x32xf32>
    %c0_291 = arith.constant 0 : index
    %c0_292 = arith.constant 0 : index
    %c0_293 = arith.constant 0 : index
    %391 = vector.load %arg7[%c0_291, %c0_292, %c0_293] : memref<2x32x32xbf16, #tpu.memory_space<vmem>>, vector<1x32x32xbf16>
    %392 = vector.shape_cast %391 : vector<1x32x32xbf16> to vector<32x32xbf16>
    %cst_294 = arith.constant dense<0.000000e+00> : vector<16x32xf32>
    %393 = tpu.matmul %374, %392, %cst_294 {dimension_numbers = #tpu.dot_dimension_numbers<[1], [0], [0], [1], [0, 0, 1, 1], [], []>} : vector<16x32xbf16>, vector<32x32xbf16>, vector<16x32xf32> -> vector<16x32xf32>
    %c0_295 = arith.constant 0 : index
    %c0_296 = arith.constant 0 : index
    %c0_297 = arith.constant 0 : index
    %394 = vector.load %arg8[%c0_295, %c0_296, %c0_297] : memref<2x1x32xf32, #tpu.memory_space<vmem>>, vector<1x1x32xf32>
    %395 = vector.shape_cast %394 : vector<1x1x32xf32> to vector<1x32xf32>
    %396 = vector.broadcast %395 : vector<1x32xf32> to vector<16x32xf32>
    %397 = arith.addf %393, %396 : vector<16x32xf32>
    %398 = arith.truncf %383 : vector<16x32xf32> to vector<16x32xbf16>
    %399 = arith.truncf %390 : vector<16x32xf32> to vector<16x32xbf16>
    %cst_298 = arith.constant dense<0.000000e+00> : vector<16x16xf32>
    %400 = tpu.matmul %398, %399, %cst_298 {dimension_numbers = #tpu.dot_dimension_numbers<[1], [1], [0], [0], [0, 0, 1, 0], [], []>} : vector<16x32xbf16>, vector<16x32xbf16>, vector<16x16xf32> -> vector<16x16xf32>
    %c0_299 = arith.constant 0 : index
    %c0_300 = arith.constant 0 : index
    %c0_301 = arith.constant 0 : index
    %c0_302 = arith.constant 0 : index
    %401 = vector.load %arg9[%c0_299, %c0_300, %c0_301, %c0_302] : memref<1x2x16x16xf32, #tpu.memory_space<vmem>>, vector<1x1x16x16xf32>
    %402 = vector.shape_cast %401 : vector<1x1x16x16xf32> to vector<16x16xf32>
    %403 = arith.addf %400, %402 : vector<16x16xf32>
    %404 = vector.broadcast %376 : vector<1x16xf32> to vector<16x16xf32>
    %405 = arith.addf %403, %404 : vector<16x16xf32>
    %cst_303 = arith.constant dense<0xFF800000> : vector<16xf32>
    %406 = vector.multi_reduction <maximumf>, %405, %cst_303 [1] : vector<16x16xf32> to vector<16xf32>
    %407 = vector.shape_cast %406 : vector<16xf32> to vector<16x1xf32>
    %408 = vector.broadcast %407 : vector<16x1xf32> to vector<16x16xf32>
    %409 = arith.subf %405, %408 : vector<16x16xf32>
    %410 = math.exp %409 : vector<16x16xf32>
    %cst_304 = arith.constant dense<0.000000e+00> : vector<16xf32>
    %411 = vector.multi_reduction <add>, %410, %cst_304 [1] : vector<16x16xf32> to vector<16xf32>
    %412 = vector.shape_cast %411 : vector<16xf32> to vector<16x1xf32>
    %413 = tpu.reciprocal %412 {approx = true} : vector<16x1xf32> -> vector<16x1xf32>
    %414 = vector.broadcast %413 : vector<16x1xf32> to vector<16x16xf32>
    %415 = arith.mulf %410, %414 : vector<16x16xf32>
    %416 = arith.truncf %415 : vector<16x16xf32> to vector<16x16xbf16>
    %417 = arith.truncf %397 : vector<16x32xf32> to vector<16x32xbf16>
    %cst_305 = arith.constant dense<0.000000e+00> : vector<16x32xf32>
    %418 = tpu.matmul %416, %417, %cst_305 {dimension_numbers = #tpu.dot_dimension_numbers<[1], [0], [0], [1], [0, 0, 1, 1], [], []>} : vector<16x16xbf16>, vector<16x32xbf16>, vector<16x32xf32> -> vector<16x32xf32>
    %c1_306 = arith.constant 1 : index
    %c0_307 = arith.constant 0 : index
    %c0_308 = arith.constant 0 : index
    %419 = vector.load %arg3[%c1_306, %c0_307, %c0_308] : memref<2x32x32xbf16, #tpu.memory_space<vmem>>, vector<1x32x32xbf16>
    %420 = vector.shape_cast %419 : vector<1x32x32xbf16> to vector<32x32xbf16>
    %cst_309 = arith.constant dense<0.000000e+00> : vector<16x32xf32>
    %421 = tpu.matmul %374, %420, %cst_309 {dimension_numbers = #tpu.dot_dimension_numbers<[1], [0], [0], [1], [0, 0, 1, 1], [], []>} : vector<16x32xbf16>, vector<32x32xbf16>, vector<16x32xf32> -> vector<16x32xf32>
    %c1_310 = arith.constant 1 : index
    %c0_311 = arith.constant 0 : index
    %c0_312 = arith.constant 0 : index
    %422 = vector.load %arg4[%c1_310, %c0_311, %c0_312] : memref<2x1x32xf32, #tpu.memory_space<vmem>>, vector<1x1x32xf32>
    %423 = vector.shape_cast %422 : vector<1x1x32xf32> to vector<1x32xf32>
    %424 = vector.broadcast %423 : vector<1x32xf32> to vector<16x32xf32>
    %425 = arith.addf %421, %424 : vector<16x32xf32>
    %c1_313 = arith.constant 1 : index
    %c0_314 = arith.constant 0 : index
    %c0_315 = arith.constant 0 : index
    %426 = vector.load %arg5[%c1_313, %c0_314, %c0_315] : memref<2x32x32xbf16, #tpu.memory_space<vmem>>, vector<1x32x32xbf16>
    %427 = vector.shape_cast %426 : vector<1x32x32xbf16> to vector<32x32xbf16>
    %cst_316 = arith.constant dense<0.000000e+00> : vector<16x32xf32>
    %428 = tpu.matmul %374, %427, %cst_316 {dimension_numbers = #tpu.dot_dimension_numbers<[1], [0], [0], [1], [0, 0, 1, 1], [], []>} : vector<16x32xbf16>, vector<32x32xbf16>, vector<16x32xf32> -> vector<16x32xf32>
    %c1_317 = arith.constant 1 : index
    %c0_318 = arith.constant 0 : index
    %c0_319 = arith.constant 0 : index
    %429 = vector.load %arg6[%c1_317, %c0_318, %c0_319] : memref<2x1x32xf32, #tpu.memory_space<vmem>>, vector<1x1x32xf32>
    %430 = vector.shape_cast %429 : vector<1x1x32xf32> to vector<1x32xf32>
    %431 = vector.broadcast %430 : vector<1x32xf32> to vector<16x32xf32>
    %432 = arith.addf %428, %431 : vector<16x32xf32>
    %c1_320 = arith.constant 1 : index
    %c0_321 = arith.constant 0 : index
    %c0_322 = arith.constant 0 : index
    %433 = vector.load %arg7[%c1_320, %c0_321, %c0_322] : memref<2x32x32xbf16, #tpu.memory_space<vmem>>, vector<1x32x32xbf16>
    %434 = vector.shape_cast %433 : vector<1x32x32xbf16> to vector<32x32xbf16>
    %cst_323 = arith.constant dense<0.000000e+00> : vector<16x32xf32>
    %435 = tpu.matmul %374, %434, %cst_323 {dimension_numbers = #tpu.dot_dimension_numbers<[1], [0], [0], [1], [0, 0, 1, 1], [], []>} : vector<16x32xbf16>, vector<32x32xbf16>, vector<16x32xf32> -> vector<16x32xf32>
    %c1_324 = arith.constant 1 : index
    %c0_325 = arith.constant 0 : index
    %c0_326 = arith.constant 0 : index
    %436 = vector.load %arg8[%c1_324, %c0_325, %c0_326] : memref<2x1x32xf32, #tpu.memory_space<vmem>>, vector<1x1x32xf32>
    %437 = vector.shape_cast %436 : vector<1x1x32xf32> to vector<1x32xf32>
    %438 = vector.broadcast %437 : vector<1x32xf32> to vector<16x32xf32>
    %439 = arith.addf %435, %438 : vector<16x32xf32>
    %440 = arith.truncf %425 : vector<16x32xf32> to vector<16x32xbf16>
    %441 = arith.truncf %432 : vector<16x32xf32> to vector<16x32xbf16>
    %cst_327 = arith.constant dense<0.000000e+00> : vector<16x16xf32>
    %442 = tpu.matmul %440, %441, %cst_327 {dimension_numbers = #tpu.dot_dimension_numbers<[1], [1], [0], [0], [0, 0, 1, 0], [], []>} : vector<16x32xbf16>, vector<16x32xbf16>, vector<16x16xf32> -> vector<16x16xf32>
    %c0_328 = arith.constant 0 : index
    %c1_329 = arith.constant 1 : index
    %c0_330 = arith.constant 0 : index
    %c0_331 = arith.constant 0 : index
    %443 = vector.load %arg9[%c0_328, %c1_329, %c0_330, %c0_331] : memref<1x2x16x16xf32, #tpu.memory_space<vmem>>, vector<1x1x16x16xf32>
    %444 = vector.shape_cast %443 : vector<1x1x16x16xf32> to vector<16x16xf32>
    %445 = arith.addf %442, %444 : vector<16x16xf32>
    %446 = vector.broadcast %376 : vector<1x16xf32> to vector<16x16xf32>
    %447 = arith.addf %445, %446 : vector<16x16xf32>
    %cst_332 = arith.constant dense<0xFF800000> : vector<16xf32>
    %448 = vector.multi_reduction <maximumf>, %447, %cst_332 [1] : vector<16x16xf32> to vector<16xf32>
    %449 = vector.shape_cast %448 : vector<16xf32> to vector<16x1xf32>
    %450 = vector.broadcast %449 : vector<16x1xf32> to vector<16x16xf32>
    %451 = arith.subf %447, %450 : vector<16x16xf32>
    %452 = math.exp %451 : vector<16x16xf32>
    %cst_333 = arith.constant dense<0.000000e+00> : vector<16xf32>
    %453 = vector.multi_reduction <add>, %452, %cst_333 [1] : vector<16x16xf32> to vector<16xf32>
    %454 = vector.shape_cast %453 : vector<16xf32> to vector<16x1xf32>
    %455 = tpu.reciprocal %454 {approx = true} : vector<16x1xf32> -> vector<16x1xf32>
    %456 = vector.broadcast %455 : vector<16x1xf32> to vector<16x16xf32>
    %457 = arith.mulf %452, %456 : vector<16x16xf32>
    %458 = arith.truncf %457 : vector<16x16xf32> to vector<16x16xbf16>
    %459 = arith.truncf %439 : vector<16x32xf32> to vector<16x32xbf16>
    %cst_334 = arith.constant dense<0.000000e+00> : vector<16x32xf32>
    %460 = tpu.matmul %458, %459, %cst_334 {dimension_numbers = #tpu.dot_dimension_numbers<[1], [0], [0], [1], [0, 0, 1, 1], [], []>} : vector<16x16xbf16>, vector<16x32xbf16>, vector<16x32xf32> -> vector<16x32xf32>
    %461 = tpu.concatenate %418, %460 in 1 : vector<16x32xf32>, vector<16x32xf32> -> vector<16x64xf32>
    %c0_335 = arith.constant 0 : index
    %c4_336 = arith.constant 4 : index
    %c0_337 = arith.constant 0 : index
    %c0_338 = arith.constant 0 : index
    %462 = vector.load %arg11[%c0_335, %c4_336, %c0_337, %c0_338] : memref<1x8x16x64xf32, #tpu.memory_space<vmem>>, vector<1x1x16x64xf32>
    %463 = vector.shape_cast %462 : vector<1x1x16x64xf32> to vector<16x64xf32>
    %464 = vector.shape_cast %461 : vector<16x64xf32> to vector<1x1x16x64xf32>
    tpu.vector_store %arg11[%c0_335, %c4_336, %c0_337, %c0_338], %464 {strides = array<i32>} : memref<1x8x16x64xf32, #tpu.memory_space<vmem>>, vector<1x1x16x64xf32>,
    %c0_339 = arith.constant 0 : index
    %c5 = arith.constant 5 : index
    %c0_340 = arith.constant 0 : index
    %c0_341 = arith.constant 0 : index
    %465 = vector.load %arg2[%c0_339, %c5, %c0_340, %c0_341] : memref<1x8x16x32xf32, #tpu.memory_space<vmem>>, vector<1x1x16x32xf32>
    %466 = vector.shape_cast %465 : vector<1x1x16x32xf32> to vector<16x32xf32>
    %467 = arith.truncf %466 : vector<16x32xf32> to vector<16x32xbf16>
    %c0_342 = arith.constant 0 : index
    %c5_343 = arith.constant 5 : index
    %c0_344 = arith.constant 0 : index
    %468 = vector.load %arg10[%c0_342, %c5_343, %c0_344] : memref<1x8x16xf32, #tpu.memory_space<vmem>>, vector<1x1x16xf32>
    %469 = vector.shape_cast %468 : vector<1x1x16xf32> to vector<1x16xf32>
    %c0_345 = arith.constant 0 : index
    %c0_346 = arith.constant 0 : index
    %c0_347 = arith.constant 0 : index
    %470 = vector.load %arg3[%c0_345, %c0_346, %c0_347] : memref<2x32x32xbf16, #tpu.memory_space<vmem>>, vector<1x32x32xbf16>
    %471 = vector.shape_cast %470 : vector<1x32x32xbf16> to vector<32x32xbf16>
    %cst_348 = arith.constant dense<0.000000e+00> : vector<16x32xf32>
    %472 = tpu.matmul %467, %471, %cst_348 {dimension_numbers = #tpu.dot_dimension_numbers<[1], [0], [0], [1], [0, 0, 1, 1], [], []>} : vector<16x32xbf16>, vector<32x32xbf16>, vector<16x32xf32> -> vector<16x32xf32>
    %c0_349 = arith.constant 0 : index
    %c0_350 = arith.constant 0 : index
    %c0_351 = arith.constant 0 : index
    %473 = vector.load %arg4[%c0_349, %c0_350, %c0_351] : memref<2x1x32xf32, #tpu.memory_space<vmem>>, vector<1x1x32xf32>
    %474 = vector.shape_cast %473 : vector<1x1x32xf32> to vector<1x32xf32>
    %475 = vector.broadcast %474 : vector<1x32xf32> to vector<16x32xf32>
    %476 = arith.addf %472, %475 : vector<16x32xf32>
    %c0_352 = arith.constant 0 : index
    %c0_353 = arith.constant 0 : index
    %c0_354 = arith.constant 0 : index
    %477 = vector.load %arg5[%c0_352, %c0_353, %c0_354] : memref<2x32x32xbf16, #tpu.memory_space<vmem>>, vector<1x32x32xbf16>
    %478 = vector.shape_cast %477 : vector<1x32x32xbf16> to vector<32x32xbf16>
    %cst_355 = arith.constant dense<0.000000e+00> : vector<16x32xf32>
    %479 = tpu.matmul %467, %478, %cst_355 {dimension_numbers = #tpu.dot_dimension_numbers<[1], [0], [0], [1], [0, 0, 1, 1], [], []>} : vector<16x32xbf16>, vector<32x32xbf16>, vector<16x32xf32> -> vector<16x32xf32>
    %c0_356 = arith.constant 0 : index
    %c0_357 = arith.constant 0 : index
    %c0_358 = arith.constant 0 : index
    %480 = vector.load %arg6[%c0_356, %c0_357, %c0_358] : memref<2x1x32xf32, #tpu.memory_space<vmem>>, vector<1x1x32xf32>
    %481 = vector.shape_cast %480 : vector<1x1x32xf32> to vector<1x32xf32>
    %482 = vector.broadcast %481 : vector<1x32xf32> to vector<16x32xf32>
    %483 = arith.addf %479, %482 : vector<16x32xf32>
    %c0_359 = arith.constant 0 : index
    %c0_360 = arith.constant 0 : index
    %c0_361 = arith.constant 0 : index
    %484 = vector.load %arg7[%c0_359, %c0_360, %c0_361] : memref<2x32x32xbf16, #tpu.memory_space<vmem>>, vector<1x32x32xbf16>
    %485 = vector.shape_cast %484 : vector<1x32x32xbf16> to vector<32x32xbf16>
    %cst_362 = arith.constant dense<0.000000e+00> : vector<16x32xf32>
    %486 = tpu.matmul %467, %485, %cst_362 {dimension_numbers = #tpu.dot_dimension_numbers<[1], [0], [0], [1], [0, 0, 1, 1], [], []>} : vector<16x32xbf16>, vector<32x32xbf16>, vector<16x32xf32> -> vector<16x32xf32>
    %c0_363 = arith.constant 0 : index
    %c0_364 = arith.constant 0 : index
    %c0_365 = arith.constant 0 : index
    %487 = vector.load %arg8[%c0_363, %c0_364, %c0_365] : memref<2x1x32xf32, #tpu.memory_space<vmem>>, vector<1x1x32xf32>
    %488 = vector.shape_cast %487 : vector<1x1x32xf32> to vector<1x32xf32>
    %489 = vector.broadcast %488 : vector<1x32xf32> to vector<16x32xf32>
    %490 = arith.addf %486, %489 : vector<16x32xf32>
    %491 = arith.truncf %476 : vector<16x32xf32> to vector<16x32xbf16>
    %492 = arith.truncf %483 : vector<16x32xf32> to vector<16x32xbf16>
    %cst_366 = arith.constant dense<0.000000e+00> : vector<16x16xf32>
    %493 = tpu.matmul %491, %492, %cst_366 {dimension_numbers = #tpu.dot_dimension_numbers<[1], [1], [0], [0], [0, 0, 1, 0], [], []>} : vector<16x32xbf16>, vector<16x32xbf16>, vector<16x16xf32> -> vector<16x16xf32>
    %c0_367 = arith.constant 0 : index
    %c0_368 = arith.constant 0 : index
    %c0_369 = arith.constant 0 : index
    %c0_370 = arith.constant 0 : index
    %494 = vector.load %arg9[%c0_367, %c0_368, %c0_369, %c0_370] : memref<1x2x16x16xf32, #tpu.memory_space<vmem>>, vector<1x1x16x16xf32>
    %495 = vector.shape_cast %494 : vector<1x1x16x16xf32> to vector<16x16xf32>
    %496 = arith.addf %493, %495 : vector<16x16xf32>
    %497 = vector.broadcast %469 : vector<1x16xf32> to vector<16x16xf32>
    %498 = arith.addf %496, %497 : vector<16x16xf32>
    %cst_371 = arith.constant dense<0xFF800000> : vector<16xf32>
    %499 = vector.multi_reduction <maximumf>, %498, %cst_371 [1] : vector<16x16xf32> to vector<16xf32>
    %500 = vector.shape_cast %499 : vector<16xf32> to vector<16x1xf32>
    %501 = vector.broadcast %500 : vector<16x1xf32> to vector<16x16xf32>
    %502 = arith.subf %498, %501 : vector<16x16xf32>
    %503 = math.exp %502 : vector<16x16xf32>
    %cst_372 = arith.constant dense<0.000000e+00> : vector<16xf32>
    %504 = vector.multi_reduction <add>, %503, %cst_372 [1] : vector<16x16xf32> to vector<16xf32>
    %505 = vector.shape_cast %504 : vector<16xf32> to vector<16x1xf32>
    %506 = tpu.reciprocal %505 {approx = true} : vector<16x1xf32> -> vector<16x1xf32>
    %507 = vector.broadcast %506 : vector<16x1xf32> to vector<16x16xf32>
    %508 = arith.mulf %503, %507 : vector<16x16xf32>
    %509 = arith.truncf %508 : vector<16x16xf32> to vector<16x16xbf16>
    %510 = arith.truncf %490 : vector<16x32xf32> to vector<16x32xbf16>
    %cst_373 = arith.constant dense<0.000000e+00> : vector<16x32xf32>
    %511 = tpu.matmul %509, %510, %cst_373 {dimension_numbers = #tpu.dot_dimension_numbers<[1], [0], [0], [1], [0, 0, 1, 1], [], []>} : vector<16x16xbf16>, vector<16x32xbf16>, vector<16x32xf32> -> vector<16x32xf32>
    %c1_374 = arith.constant 1 : index
    %c0_375 = arith.constant 0 : index
    %c0_376 = arith.constant 0 : index
    %512 = vector.load %arg3[%c1_374, %c0_375, %c0_376] : memref<2x32x32xbf16, #tpu.memory_space<vmem>>, vector<1x32x32xbf16>
    %513 = vector.shape_cast %512 : vector<1x32x32xbf16> to vector<32x32xbf16>
    %cst_377 = arith.constant dense<0.000000e+00> : vector<16x32xf32>
    %514 = tpu.matmul %467, %513, %cst_377 {dimension_numbers = #tpu.dot_dimension_numbers<[1], [0], [0], [1], [0, 0, 1, 1], [], []>} : vector<16x32xbf16>, vector<32x32xbf16>, vector<16x32xf32> -> vector<16x32xf32>
    %c1_378 = arith.constant 1 : index
    %c0_379 = arith.constant 0 : index
    %c0_380 = arith.constant 0 : index
    %515 = vector.load %arg4[%c1_378, %c0_379, %c0_380] : memref<2x1x32xf32, #tpu.memory_space<vmem>>, vector<1x1x32xf32>
    %516 = vector.shape_cast %515 : vector<1x1x32xf32> to vector<1x32xf32>
    %517 = vector.broadcast %516 : vector<1x32xf32> to vector<16x32xf32>
    %518 = arith.addf %514, %517 : vector<16x32xf32>
    %c1_381 = arith.constant 1 : index
    %c0_382 = arith.constant 0 : index
    %c0_383 = arith.constant 0 : index
    %519 = vector.load %arg5[%c1_381, %c0_382, %c0_383] : memref<2x32x32xbf16, #tpu.memory_space<vmem>>, vector<1x32x32xbf16>
    %520 = vector.shape_cast %519 : vector<1x32x32xbf16> to vector<32x32xbf16>
    %cst_384 = arith.constant dense<0.000000e+00> : vector<16x32xf32>
    %521 = tpu.matmul %467, %520, %cst_384 {dimension_numbers = #tpu.dot_dimension_numbers<[1], [0], [0], [1], [0, 0, 1, 1], [], []>} : vector<16x32xbf16>, vector<32x32xbf16>, vector<16x32xf32> -> vector<16x32xf32>
    %c1_385 = arith.constant 1 : index
    %c0_386 = arith.constant 0 : index
    %c0_387 = arith.constant 0 : index
    %522 = vector.load %arg6[%c1_385, %c0_386, %c0_387] : memref<2x1x32xf32, #tpu.memory_space<vmem>>, vector<1x1x32xf32>
    %523 = vector.shape_cast %522 : vector<1x1x32xf32> to vector<1x32xf32>
    %524 = vector.broadcast %523 : vector<1x32xf32> to vector<16x32xf32>
    %525 = arith.addf %521, %524 : vector<16x32xf32>
    %c1_388 = arith.constant 1 : index
    %c0_389 = arith.constant 0 : index
    %c0_390 = arith.constant 0 : index
    %526 = vector.load %arg7[%c1_388, %c0_389, %c0_390] : memref<2x32x32xbf16, #tpu.memory_space<vmem>>, vector<1x32x32xbf16>
    %527 = vector.shape_cast %526 : vector<1x32x32xbf16> to vector<32x32xbf16>
    %cst_391 = arith.constant dense<0.000000e+00> : vector<16x32xf32>
    %528 = tpu.matmul %467, %527, %cst_391 {dimension_numbers = #tpu.dot_dimension_numbers<[1], [0], [0], [1], [0, 0, 1, 1], [], []>} : vector<16x32xbf16>, vector<32x32xbf16>, vector<16x32xf32> -> vector<16x32xf32>
    %c1_392 = arith.constant 1 : index
    %c0_393 = arith.constant 0 : index
    %c0_394 = arith.constant 0 : index
    %529 = vector.load %arg8[%c1_392, %c0_393, %c0_394] : memref<2x1x32xf32, #tpu.memory_space<vmem>>, vector<1x1x32xf32>
    %530 = vector.shape_cast %529 : vector<1x1x32xf32> to vector<1x32xf32>
    %531 = vector.broadcast %530 : vector<1x32xf32> to vector<16x32xf32>
    %532 = arith.addf %528, %531 : vector<16x32xf32>
    %533 = arith.truncf %518 : vector<16x32xf32> to vector<16x32xbf16>
    %534 = arith.truncf %525 : vector<16x32xf32> to vector<16x32xbf16>
    %cst_395 = arith.constant dense<0.000000e+00> : vector<16x16xf32>
    %535 = tpu.matmul %533, %534, %cst_395 {dimension_numbers = #tpu.dot_dimension_numbers<[1], [1], [0], [0], [0, 0, 1, 0], [], []>} : vector<16x32xbf16>, vector<16x32xbf16>, vector<16x16xf32> -> vector<16x16xf32>
    %c0_396 = arith.constant 0 : index
    %c1_397 = arith.constant 1 : index
    %c0_398 = arith.constant 0 : index
    %c0_399 = arith.constant 0 : index
    %536 = vector.load %arg9[%c0_396, %c1_397, %c0_398, %c0_399] : memref<1x2x16x16xf32, #tpu.memory_space<vmem>>, vector<1x1x16x16xf32>
    %537 = vector.shape_cast %536 : vector<1x1x16x16xf32> to vector<16x16xf32>
    %538 = arith.addf %535, %537 : vector<16x16xf32>
    %539 = vector.broadcast %469 : vector<1x16xf32> to vector<16x16xf32>
    %540 = arith.addf %538, %539 : vector<16x16xf32>
    %cst_400 = arith.constant dense<0xFF800000> : vector<16xf32>
    %541 = vector.multi_reduction <maximumf>, %540, %cst_400 [1] : vector<16x16xf32> to vector<16xf32>
    %542 = vector.shape_cast %541 : vector<16xf32> to vector<16x1xf32>
    %543 = vector.broadcast %542 : vector<16x1xf32> to vector<16x16xf32>
    %544 = arith.subf %540, %543 : vector<16x16xf32>
    %545 = math.exp %544 : vector<16x16xf32>
    %cst_401 = arith.constant dense<0.000000e+00> : vector<16xf32>
    %546 = vector.multi_reduction <add>, %545, %cst_401 [1] : vector<16x16xf32> to vector<16xf32>
    %547 = vector.shape_cast %546 : vector<16xf32> to vector<16x1xf32>
    %548 = tpu.reciprocal %547 {approx = true} : vector<16x1xf32> -> vector<16x1xf32>
    %549 = vector.broadcast %548 : vector<16x1xf32> to vector<16x16xf32>
    %550 = arith.mulf %545, %549 : vector<16x16xf32>
    %551 = arith.truncf %550 : vector<16x16xf32> to vector<16x16xbf16>
    %552 = arith.truncf %532 : vector<16x32xf32> to vector<16x32xbf16>
    %cst_402 = arith.constant dense<0.000000e+00> : vector<16x32xf32>
    %553 = tpu.matmul %551, %552, %cst_402 {dimension_numbers = #tpu.dot_dimension_numbers<[1], [0], [0], [1], [0, 0, 1, 1], [], []>} : vector<16x16xbf16>, vector<16x32xbf16>, vector<16x32xf32> -> vector<16x32xf32>
    %554 = tpu.concatenate %511, %553 in 1 : vector<16x32xf32>, vector<16x32xf32> -> vector<16x64xf32>
    %c0_403 = arith.constant 0 : index
    %c5_404 = arith.constant 5 : index
    %c0_405 = arith.constant 0 : index
    %c0_406 = arith.constant 0 : index
    %555 = vector.load %arg11[%c0_403, %c5_404, %c0_405, %c0_406] : memref<1x8x16x64xf32, #tpu.memory_space<vmem>>, vector<1x1x16x64xf32>
    %556 = vector.shape_cast %555 : vector<1x1x16x64xf32> to vector<16x64xf32>
    %557 = vector.shape_cast %554 : vector<16x64xf32> to vector<1x1x16x64xf32>
    tpu.vector_store %arg11[%c0_403, %c5_404, %c0_405, %c0_406], %557 {strides = array<i32>} : memref<1x8x16x64xf32, #tpu.memory_space<vmem>>, vector<1x1x16x64xf32>,
    %c0_407 = arith.constant 0 : index
    %c6 = arith.constant 6 : index
    %c0_408 = arith.constant 0 : index
    %c0_409 = arith.constant 0 : index
    %558 = vector.load %arg2[%c0_407, %c6, %c0_408, %c0_409] : memref<1x8x16x32xf32, #tpu.memory_space<vmem>>, vector<1x1x16x32xf32>
    %559 = vector.shape_cast %558 : vector<1x1x16x32xf32> to vector<16x32xf32>
    %560 = arith.truncf %559 : vector<16x32xf32> to vector<16x32xbf16>
    %c0_410 = arith.constant 0 : index
    %c6_411 = arith.constant 6 : index
    %c0_412 = arith.constant 0 : index
    %561 = vector.load %arg10[%c0_410, %c6_411, %c0_412] : memref<1x8x16xf32, #tpu.memory_space<vmem>>, vector<1x1x16xf32>
    %562 = vector.shape_cast %561 : vector<1x1x16xf32> to vector<1x16xf32>
    %c0_413 = arith.constant 0 : index
    %c0_414 = arith.constant 0 : index
    %c0_415 = arith.constant 0 : index
    %563 = vector.load %arg3[%c0_413, %c0_414, %c0_415] : memref<2x32x32xbf16, #tpu.memory_space<vmem>>, vector<1x32x32xbf16>
    %564 = vector.shape_cast %563 : vector<1x32x32xbf16> to vector<32x32xbf16>
    %cst_416 = arith.constant dense<0.000000e+00> : vector<16x32xf32>
    %565 = tpu.matmul %560, %564, %cst_416 {dimension_numbers = #tpu.dot_dimension_numbers<[1], [0], [0], [1], [0, 0, 1, 1], [], []>} : vector<16x32xbf16>, vector<32x32xbf16>, vector<16x32xf32> -> vector<16x32xf32>
    %c0_417 = arith.constant 0 : index
    %c0_418 = arith.constant 0 : index
    %c0_419 = arith.constant 0 : index
    %566 = vector.load %arg4[%c0_417, %c0_418, %c0_419] : memref<2x1x32xf32, #tpu.memory_space<vmem>>, vector<1x1x32xf32>
    %567 = vector.shape_cast %566 : vector<1x1x32xf32> to vector<1x32xf32>
    %568 = vector.broadcast %567 : vector<1x32xf32> to vector<16x32xf32>
    %569 = arith.addf %565, %568 : vector<16x32xf32>
    %c0_420 = arith.constant 0 : index
    %c0_421 = arith.constant 0 : index
    %c0_422 = arith.constant 0 : index
    %570 = vector.load %arg5[%c0_420, %c0_421, %c0_422] : memref<2x32x32xbf16, #tpu.memory_space<vmem>>, vector<1x32x32xbf16>
    %571 = vector.shape_cast %570 : vector<1x32x32xbf16> to vector<32x32xbf16>
    %cst_423 = arith.constant dense<0.000000e+00> : vector<16x32xf32>
    %572 = tpu.matmul %560, %571, %cst_423 {dimension_numbers = #tpu.dot_dimension_numbers<[1], [0], [0], [1], [0, 0, 1, 1], [], []>} : vector<16x32xbf16>, vector<32x32xbf16>, vector<16x32xf32> -> vector<16x32xf32>
    %c0_424 = arith.constant 0 : index
    %c0_425 = arith.constant 0 : index
    %c0_426 = arith.constant 0 : index
    %573 = vector.load %arg6[%c0_424, %c0_425, %c0_426] : memref<2x1x32xf32, #tpu.memory_space<vmem>>, vector<1x1x32xf32>
    %574 = vector.shape_cast %573 : vector<1x1x32xf32> to vector<1x32xf32>
    %575 = vector.broadcast %574 : vector<1x32xf32> to vector<16x32xf32>
    %576 = arith.addf %572, %575 : vector<16x32xf32>
    %c0_427 = arith.constant 0 : index
    %c0_428 = arith.constant 0 : index
    %c0_429 = arith.constant 0 : index
    %577 = vector.load %arg7[%c0_427, %c0_428, %c0_429] : memref<2x32x32xbf16, #tpu.memory_space<vmem>>, vector<1x32x32xbf16>
    %578 = vector.shape_cast %577 : vector<1x32x32xbf16> to vector<32x32xbf16>
    %cst_430 = arith.constant dense<0.000000e+00> : vector<16x32xf32>
    %579 = tpu.matmul %560, %578, %cst_430 {dimension_numbers = #tpu.dot_dimension_numbers<[1], [0], [0], [1], [0, 0, 1, 1], [], []>} : vector<16x32xbf16>, vector<32x32xbf16>, vector<16x32xf32> -> vector<16x32xf32>
    %c0_431 = arith.constant 0 : index
    %c0_432 = arith.constant 0 : index
    %c0_433 = arith.constant 0 : index
    %580 = vector.load %arg8[%c0_431, %c0_432, %c0_433] : memref<2x1x32xf32, #tpu.memory_space<vmem>>, vector<1x1x32xf32>
    %581 = vector.shape_cast %580 : vector<1x1x32xf32> to vector<1x32xf32>
    %582 = vector.broadcast %581 : vector<1x32xf32> to vector<16x32xf32>
    %583 = arith.addf %579, %582 : vector<16x32xf32>
    %584 = arith.truncf %569 : vector<16x32xf32> to vector<16x32xbf16>
    %585 = arith.truncf %576 : vector<16x32xf32> to vector<16x32xbf16>
    %cst_434 = arith.constant dense<0.000000e+00> : vector<16x16xf32>
    %586 = tpu.matmul %584, %585, %cst_434 {dimension_numbers = #tpu.dot_dimension_numbers<[1], [1], [0], [0], [0, 0, 1, 0], [], []>} : vector<16x32xbf16>, vector<16x32xbf16>, vector<16x16xf32> -> vector<16x16xf32>
    %c0_435 = arith.constant 0 : index
    %c0_436 = arith.constant 0 : index
    %c0_437 = arith.constant 0 : index
    %c0_438 = arith.constant 0 : index
    %587 = vector.load %arg9[%c0_435, %c0_436, %c0_437, %c0_438] : memref<1x2x16x16xf32, #tpu.memory_space<vmem>>, vector<1x1x16x16xf32>
    %588 = vector.shape_cast %587 : vector<1x1x16x16xf32> to vector<16x16xf32>
    %589 = arith.addf %586, %588 : vector<16x16xf32>
    %590 = vector.broadcast %562 : vector<1x16xf32> to vector<16x16xf32>
    %591 = arith.addf %589, %590 : vector<16x16xf32>
    %cst_439 = arith.constant dense<0xFF800000> : vector<16xf32>
    %592 = vector.multi_reduction <maximumf>, %591, %cst_439 [1] : vector<16x16xf32> to vector<16xf32>
    %593 = vector.shape_cast %592 : vector<16xf32> to vector<16x1xf32>
    %594 = vector.broadcast %593 : vector<16x1xf32> to vector<16x16xf32>
    %595 = arith.subf %591, %594 : vector<16x16xf32>
    %596 = math.exp %595 : vector<16x16xf32>
    %cst_440 = arith.constant dense<0.000000e+00> : vector<16xf32>
    %597 = vector.multi_reduction <add>, %596, %cst_440 [1] : vector<16x16xf32> to vector<16xf32>
    %598 = vector.shape_cast %597 : vector<16xf32> to vector<16x1xf32>
    %599 = tpu.reciprocal %598 {approx = true} : vector<16x1xf32> -> vector<16x1xf32>
    %600 = vector.broadcast %599 : vector<16x1xf32> to vector<16x16xf32>
    %601 = arith.mulf %596, %600 : vector<16x16xf32>
    %602 = arith.truncf %601 : vector<16x16xf32> to vector<16x16xbf16>
    %603 = arith.truncf %583 : vector<16x32xf32> to vector<16x32xbf16>
    %cst_441 = arith.constant dense<0.000000e+00> : vector<16x32xf32>
    %604 = tpu.matmul %602, %603, %cst_441 {dimension_numbers = #tpu.dot_dimension_numbers<[1], [0], [0], [1], [0, 0, 1, 1], [], []>} : vector<16x16xbf16>, vector<16x32xbf16>, vector<16x32xf32> -> vector<16x32xf32>
    %c1_442 = arith.constant 1 : index
    %c0_443 = arith.constant 0 : index
    %c0_444 = arith.constant 0 : index
    %605 = vector.load %arg3[%c1_442, %c0_443, %c0_444] : memref<2x32x32xbf16, #tpu.memory_space<vmem>>, vector<1x32x32xbf16>
    %606 = vector.shape_cast %605 : vector<1x32x32xbf16> to vector<32x32xbf16>
    %cst_445 = arith.constant dense<0.000000e+00> : vector<16x32xf32>
    %607 = tpu.matmul %560, %606, %cst_445 {dimension_numbers = #tpu.dot_dimension_numbers<[1], [0], [0], [1], [0, 0, 1, 1], [], []>} : vector<16x32xbf16>, vector<32x32xbf16>, vector<16x32xf32> -> vector<16x32xf32>
    %c1_446 = arith.constant 1 : index
    %c0_447 = arith.constant 0 : index
    %c0_448 = arith.constant 0 : index
    %608 = vector.load %arg4[%c1_446, %c0_447, %c0_448] : memref<2x1x32xf32, #tpu.memory_space<vmem>>, vector<1x1x32xf32>
    %609 = vector.shape_cast %608 : vector<1x1x32xf32> to vector<1x32xf32>
    %610 = vector.broadcast %609 : vector<1x32xf32> to vector<16x32xf32>
    %611 = arith.addf %607, %610 : vector<16x32xf32>
    %c1_449 = arith.constant 1 : index
    %c0_450 = arith.constant 0 : index
    %c0_451 = arith.constant 0 : index
    %612 = vector.load %arg5[%c1_449, %c0_450, %c0_451] : memref<2x32x32xbf16, #tpu.memory_space<vmem>>, vector<1x32x32xbf16>
    %613 = vector.shape_cast %612 : vector<1x32x32xbf16> to vector<32x32xbf16>
    %cst_452 = arith.constant dense<0.000000e+00> : vector<16x32xf32>
    %614 = tpu.matmul %560, %613, %cst_452 {dimension_numbers = #tpu.dot_dimension_numbers<[1], [0], [0], [1], [0, 0, 1, 1], [], []>} : vector<16x32xbf16>, vector<32x32xbf16>, vector<16x32xf32> -> vector<16x32xf32>
    %c1_453 = arith.constant 1 : index
    %c0_454 = arith.constant 0 : index
    %c0_455 = arith.constant 0 : index
    %615 = vector.load %arg6[%c1_453, %c0_454, %c0_455] : memref<2x1x32xf32, #tpu.memory_space<vmem>>, vector<1x1x32xf32>
    %616 = vector.shape_cast %615 : vector<1x1x32xf32> to vector<1x32xf32>
    %617 = vector.broadcast %616 : vector<1x32xf32> to vector<16x32xf32>
    %618 = arith.addf %614, %617 : vector<16x32xf32>
    %c1_456 = arith.constant 1 : index
    %c0_457 = arith.constant 0 : index
    %c0_458 = arith.constant 0 : index
    %619 = vector.load %arg7[%c1_456, %c0_457, %c0_458] : memref<2x32x32xbf16, #tpu.memory_space<vmem>>, vector<1x32x32xbf16>
    %620 = vector.shape_cast %619 : vector<1x32x32xbf16> to vector<32x32xbf16>
    %cst_459 = arith.constant dense<0.000000e+00> : vector<16x32xf32>
    %621 = tpu.matmul %560, %620, %cst_459 {dimension_numbers = #tpu.dot_dimension_numbers<[1], [0], [0], [1], [0, 0, 1, 1], [], []>} : vector<16x32xbf16>, vector<32x32xbf16>, vector<16x32xf32> -> vector<16x32xf32>
    %c1_460 = arith.constant 1 : index
    %c0_461 = arith.constant 0 : index
    %c0_462 = arith.constant 0 : index
    %622 = vector.load %arg8[%c1_460, %c0_461, %c0_462] : memref<2x1x32xf32, #tpu.memory_space<vmem>>, vector<1x1x32xf32>
    %623 = vector.shape_cast %622 : vector<1x1x32xf32> to vector<1x32xf32>
    %624 = vector.broadcast %623 : vector<1x32xf32> to vector<16x32xf32>
    %625 = arith.addf %621, %624 : vector<16x32xf32>
    %626 = arith.truncf %611 : vector<16x32xf32> to vector<16x32xbf16>
    %627 = arith.truncf %618 : vector<16x32xf32> to vector<16x32xbf16>
    %cst_463 = arith.constant dense<0.000000e+00> : vector<16x16xf32>
    %628 = tpu.matmul %626, %627, %cst_463 {dimension_numbers = #tpu.dot_dimension_numbers<[1], [1], [0], [0], [0, 0, 1, 0], [], []>} : vector<16x32xbf16>, vector<16x32xbf16>, vector<16x16xf32> -> vector<16x16xf32>
    %c0_464 = arith.constant 0 : index
    %c1_465 = arith.constant 1 : index
    %c0_466 = arith.constant 0 : index
    %c0_467 = arith.constant 0 : index
    %629 = vector.load %arg9[%c0_464, %c1_465, %c0_466, %c0_467] : memref<1x2x16x16xf32, #tpu.memory_space<vmem>>, vector<1x1x16x16xf32>
    %630 = vector.shape_cast %629 : vector<1x1x16x16xf32> to vector<16x16xf32>
    %631 = arith.addf %628, %630 : vector<16x16xf32>
    %632 = vector.broadcast %562 : vector<1x16xf32> to vector<16x16xf32>
    %633 = arith.addf %631, %632 : vector<16x16xf32>
    %cst_468 = arith.constant dense<0xFF800000> : vector<16xf32>
    %634 = vector.multi_reduction <maximumf>, %633, %cst_468 [1] : vector<16x16xf32> to vector<16xf32>
    %635 = vector.shape_cast %634 : vector<16xf32> to vector<16x1xf32>
    %636 = vector.broadcast %635 : vector<16x1xf32> to vector<16x16xf32>
    %637 = arith.subf %633, %636 : vector<16x16xf32>
    %638 = math.exp %637 : vector<16x16xf32>
    %cst_469 = arith.constant dense<0.000000e+00> : vector<16xf32>
    %639 = vector.multi_reduction <add>, %638, %cst_469 [1] : vector<16x16xf32> to vector<16xf32>
    %640 = vector.shape_cast %639 : vector<16xf32> to vector<16x1xf32>
    %641 = tpu.reciprocal %640 {approx = true} : vector<16x1xf32> -> vector<16x1xf32>
    %642 = vector.broadcast %641 : vector<16x1xf32> to vector<16x16xf32>
    %643 = arith.mulf %638, %642 : vector<16x16xf32>
    %644 = arith.truncf %643 : vector<16x16xf32> to vector<16x16xbf16>
    %645 = arith.truncf %625 : vector<16x32xf32> to vector<16x32xbf16>
    %cst_470 = arith.constant dense<0.000000e+00> : vector<16x32xf32>
    %646 = tpu.matmul %644, %645, %cst_470 {dimension_numbers = #tpu.dot_dimension_numbers<[1], [0], [0], [1], [0, 0, 1, 1], [], []>} : vector<16x16xbf16>, vector<16x32xbf16>, vector<16x32xf32> -> vector<16x32xf32>
    %647 = tpu.concatenate %604, %646 in 1 : vector<16x32xf32>, vector<16x32xf32> -> vector<16x64xf32>
    %c0_471 = arith.constant 0 : index
    %c6_472 = arith.constant 6 : index
    %c0_473 = arith.constant 0 : index
    %c0_474 = arith.constant 0 : index
    %648 = vector.load %arg11[%c0_471, %c6_472, %c0_473, %c0_474] : memref<1x8x16x64xf32, #tpu.memory_space<vmem>>, vector<1x1x16x64xf32>
    %649 = vector.shape_cast %648 : vector<1x1x16x64xf32> to vector<16x64xf32>
    %650 = vector.shape_cast %647 : vector<16x64xf32> to vector<1x1x16x64xf32>
    tpu.vector_store %arg11[%c0_471, %c6_472, %c0_473, %c0_474], %650 {strides = array<i32>} : memref<1x8x16x64xf32, #tpu.memory_space<vmem>>, vector<1x1x16x64xf32>,
    %c0_475 = arith.constant 0 : index
    %c7 = arith.constant 7 : index
    %c0_476 = arith.constant 0 : index
    %c0_477 = arith.constant 0 : index
    %651 = vector.load %arg2[%c0_475, %c7, %c0_476, %c0_477] : memref<1x8x16x32xf32, #tpu.memory_space<vmem>>, vector<1x1x16x32xf32>
    %652 = vector.shape_cast %651 : vector<1x1x16x32xf32> to vector<16x32xf32>
    %653 = arith.truncf %652 : vector<16x32xf32> to vector<16x32xbf16>
    %c0_478 = arith.constant 0 : index
    %c7_479 = arith.constant 7 : index
    %c0_480 = arith.constant 0 : index
    %654 = vector.load %arg10[%c0_478, %c7_479, %c0_480] : memref<1x8x16xf32, #tpu.memory_space<vmem>>, vector<1x1x16xf32>
    %655 = vector.shape_cast %654 : vector<1x1x16xf32> to vector<1x16xf32>
    %c0_481 = arith.constant 0 : index
    %c0_482 = arith.constant 0 : index
    %c0_483 = arith.constant 0 : index
    %656 = vector.load %arg3[%c0_481, %c0_482, %c0_483] : memref<2x32x32xbf16, #tpu.memory_space<vmem>>, vector<1x32x32xbf16>
    %657 = vector.shape_cast %656 : vector<1x32x32xbf16> to vector<32x32xbf16>
    %cst_484 = arith.constant dense<0.000000e+00> : vector<16x32xf32>
    %658 = tpu.matmul %653, %657, %cst_484 {dimension_numbers = #tpu.dot_dimension_numbers<[1], [0], [0], [1], [0, 0, 1, 1], [], []>} : vector<16x32xbf16>, vector<32x32xbf16>, vector<16x32xf32> -> vector<16x32xf32>
    %c0_485 = arith.constant 0 : index
    %c0_486 = arith.constant 0 : index
    %c0_487 = arith.constant 0 : index
    %659 = vector.load %arg4[%c0_485, %c0_486, %c0_487] : memref<2x1x32xf32, #tpu.memory_space<vmem>>, vector<1x1x32xf32>
    %660 = vector.shape_cast %659 : vector<1x1x32xf32> to vector<1x32xf32>
    %661 = vector.broadcast %660 : vector<1x32xf32> to vector<16x32xf32>
    %662 = arith.addf %658, %661 : vector<16x32xf32>
    %c0_488 = arith.constant 0 : index
    %c0_489 = arith.constant 0 : index
    %c0_490 = arith.constant 0 : index
    %663 = vector.load %arg5[%c0_488, %c0_489, %c0_490] : memref<2x32x32xbf16, #tpu.memory_space<vmem>>, vector<1x32x32xbf16>
    %664 = vector.shape_cast %663 : vector<1x32x32xbf16> to vector<32x32xbf16>
    %cst_491 = arith.constant dense<0.000000e+00> : vector<16x32xf32>
    %665 = tpu.matmul %653, %664, %cst_491 {dimension_numbers = #tpu.dot_dimension_numbers<[1], [0], [0], [1], [0, 0, 1, 1], [], []>} : vector<16x32xbf16>, vector<32x32xbf16>, vector<16x32xf32> -> vector<16x32xf32>
    %c0_492 = arith.constant 0 : index
    %c0_493 = arith.constant 0 : index
    %c0_494 = arith.constant 0 : index
    %666 = vector.load %arg6[%c0_492, %c0_493, %c0_494] : memref<2x1x32xf32, #tpu.memory_space<vmem>>, vector<1x1x32xf32>
    %667 = vector.shape_cast %666 : vector<1x1x32xf32> to vector<1x32xf32>
    %668 = vector.broadcast %667 : vector<1x32xf32> to vector<16x32xf32>
    %669 = arith.addf %665, %668 : vector<16x32xf32>
    %c0_495 = arith.constant 0 : index
    %c0_496 = arith.constant 0 : index
    %c0_497 = arith.constant 0 : index
    %670 = vector.load %arg7[%c0_495, %c0_496, %c0_497] : memref<2x32x32xbf16, #tpu.memory_space<vmem>>, vector<1x32x32xbf16>
    %671 = vector.shape_cast %670 : vector<1x32x32xbf16> to vector<32x32xbf16>
    %cst_498 = arith.constant dense<0.000000e+00> : vector<16x32xf32>
    %672 = tpu.matmul %653, %671, %cst_498 {dimension_numbers = #tpu.dot_dimension_numbers<[1], [0], [0], [1], [0, 0, 1, 1], [], []>} : vector<16x32xbf16>, vector<32x32xbf16>, vector<16x32xf32> -> vector<16x32xf32>
    %c0_499 = arith.constant 0 : index
    %c0_500 = arith.constant 0 : index
    %c0_501 = arith.constant 0 : index
    %673 = vector.load %arg8[%c0_499, %c0_500, %c0_501] : memref<2x1x32xf32, #tpu.memory_space<vmem>>, vector<1x1x32xf32>
    %674 = vector.shape_cast %673 : vector<1x1x32xf32> to vector<1x32xf32>
    %675 = vector.broadcast %674 : vector<1x32xf32> to vector<16x32xf32>
    %676 = arith.addf %672, %675 : vector<16x32xf32>
    %677 = arith.truncf %662 : vector<16x32xf32> to vector<16x32xbf16>
    %678 = arith.truncf %669 : vector<16x32xf32> to vector<16x32xbf16>
    %cst_502 = arith.constant dense<0.000000e+00> : vector<16x16xf32>
    %679 = tpu.matmul %677, %678, %cst_502 {dimension_numbers = #tpu.dot_dimension_numbers<[1], [1], [0], [0], [0, 0, 1, 0], [], []>} : vector<16x32xbf16>, vector<16x32xbf16>, vector<16x16xf32> -> vector<16x16xf32>
    %c0_503 = arith.constant 0 : index
    %c0_504 = arith.constant 0 : index
    %c0_505 = arith.constant 0 : index
    %c0_506 = arith.constant 0 : index
    %680 = vector.load %arg9[%c0_503, %c0_504, %c0_505, %c0_506] : memref<1x2x16x16xf32, #tpu.memory_space<vmem>>, vector<1x1x16x16xf32>
    %681 = vector.shape_cast %680 : vector<1x1x16x16xf32> to vector<16x16xf32>
    %682 = arith.addf %679, %681 : vector<16x16xf32>
    %683 = vector.broadcast %655 : vector<1x16xf32> to vector<16x16xf32>
    %684 = arith.addf %682, %683 : vector<16x16xf32>
    %cst_507 = arith.constant dense<0xFF800000> : vector<16xf32>
    %685 = vector.multi_reduction <maximumf>, %684, %cst_507 [1] : vector<16x16xf32> to vector<16xf32>
    %686 = vector.shape_cast %685 : vector<16xf32> to vector<16x1xf32>
    %687 = vector.broadcast %686 : vector<16x1xf32> to vector<16x16xf32>
    %688 = arith.subf %684, %687 : vector<16x16xf32>
    %689 = math.exp %688 : vector<16x16xf32>
    %cst_508 = arith.constant dense<0.000000e+00> : vector<16xf32>
    %690 = vector.multi_reduction <add>, %689, %cst_508 [1] : vector<16x16xf32> to vector<16xf32>
    %691 = vector.shape_cast %690 : vector<16xf32> to vector<16x1xf32>
    %692 = tpu.reciprocal %691 {approx = true} : vector<16x1xf32> -> vector<16x1xf32>
    %693 = vector.broadcast %692 : vector<16x1xf32> to vector<16x16xf32>
    %694 = arith.mulf %689, %693 : vector<16x16xf32>
    %695 = arith.truncf %694 : vector<16x16xf32> to vector<16x16xbf16>
    %696 = arith.truncf %676 : vector<16x32xf32> to vector<16x32xbf16>
    %cst_509 = arith.constant dense<0.000000e+00> : vector<16x32xf32>
    %697 = tpu.matmul %695, %696, %cst_509 {dimension_numbers = #tpu.dot_dimension_numbers<[1], [0], [0], [1], [0, 0, 1, 1], [], []>} : vector<16x16xbf16>, vector<16x32xbf16>, vector<16x32xf32> -> vector<16x32xf32>
    %c1_510 = arith.constant 1 : index
    %c0_511 = arith.constant 0 : index
    %c0_512 = arith.constant 0 : index
    %698 = vector.load %arg3[%c1_510, %c0_511, %c0_512] : memref<2x32x32xbf16, #tpu.memory_space<vmem>>, vector<1x32x32xbf16>
    %699 = vector.shape_cast %698 : vector<1x32x32xbf16> to vector<32x32xbf16>
    %cst_513 = arith.constant dense<0.000000e+00> : vector<16x32xf32>
    %700 = tpu.matmul %653, %699, %cst_513 {dimension_numbers = #tpu.dot_dimension_numbers<[1], [0], [0], [1], [0, 0, 1, 1], [], []>} : vector<16x32xbf16>, vector<32x32xbf16>, vector<16x32xf32> -> vector<16x32xf32>
    %c1_514 = arith.constant 1 : index
    %c0_515 = arith.constant 0 : index
    %c0_516 = arith.constant 0 : index
    %701 = vector.load %arg4[%c1_514, %c0_515, %c0_516] : memref<2x1x32xf32, #tpu.memory_space<vmem>>, vector<1x1x32xf32>
    %702 = vector.shape_cast %701 : vector<1x1x32xf32> to vector<1x32xf32>
    %703 = vector.broadcast %702 : vector<1x32xf32> to vector<16x32xf32>
    %704 = arith.addf %700, %703 : vector<16x32xf32>
    %c1_517 = arith.constant 1 : index
    %c0_518 = arith.constant 0 : index
    %c0_519 = arith.constant 0 : index
    %705 = vector.load %arg5[%c1_517, %c0_518, %c0_519] : memref<2x32x32xbf16, #tpu.memory_space<vmem>>, vector<1x32x32xbf16>
    %706 = vector.shape_cast %705 : vector<1x32x32xbf16> to vector<32x32xbf16>
    %cst_520 = arith.constant dense<0.000000e+00> : vector<16x32xf32>
    %707 = tpu.matmul %653, %706, %cst_520 {dimension_numbers = #tpu.dot_dimension_numbers<[1], [0], [0], [1], [0, 0, 1, 1], [], []>} : vector<16x32xbf16>, vector<32x32xbf16>, vector<16x32xf32> -> vector<16x32xf32>
    %c1_521 = arith.constant 1 : index
    %c0_522 = arith.constant 0 : index
    %c0_523 = arith.constant 0 : index
    %708 = vector.load %arg6[%c1_521, %c0_522, %c0_523] : memref<2x1x32xf32, #tpu.memory_space<vmem>>, vector<1x1x32xf32>
    %709 = vector.shape_cast %708 : vector<1x1x32xf32> to vector<1x32xf32>
    %710 = vector.broadcast %709 : vector<1x32xf32> to vector<16x32xf32>
    %711 = arith.addf %707, %710 : vector<16x32xf32>
    %c1_524 = arith.constant 1 : index
    %c0_525 = arith.constant 0 : index
    %c0_526 = arith.constant 0 : index
    %712 = vector.load %arg7[%c1_524, %c0_525, %c0_526] : memref<2x32x32xbf16, #tpu.memory_space<vmem>>, vector<1x32x32xbf16>
    %713 = vector.shape_cast %712 : vector<1x32x32xbf16> to vector<32x32xbf16>
    %cst_527 = arith.constant dense<0.000000e+00> : vector<16x32xf32>
    %714 = tpu.matmul %653, %713, %cst_527 {dimension_numbers = #tpu.dot_dimension_numbers<[1], [0], [0], [1], [0, 0, 1, 1], [], []>} : vector<16x32xbf16>, vector<32x32xbf16>, vector<16x32xf32> -> vector<16x32xf32>
    %c1_528 = arith.constant 1 : index
    %c0_529 = arith.constant 0 : index
    %c0_530 = arith.constant 0 : index
    %715 = vector.load %arg8[%c1_528, %c0_529, %c0_530] : memref<2x1x32xf32, #tpu.memory_space<vmem>>, vector<1x1x32xf32>
    %716 = vector.shape_cast %715 : vector<1x1x32xf32> to vector<1x32xf32>
    %717 = vector.broadcast %716 : vector<1x32xf32> to vector<16x32xf32>
    %718 = arith.addf %714, %717 : vector<16x32xf32>
    %719 = arith.truncf %704 : vector<16x32xf32> to vector<16x32xbf16>
    %720 = arith.truncf %711 : vector<16x32xf32> to vector<16x32xbf16>
    %cst_531 = arith.constant dense<0.000000e+00> : vector<16x16xf32>
    %721 = tpu.matmul %719, %720, %cst_531 {dimension_numbers = #tpu.dot_dimension_numbers<[1], [1], [0], [0], [0, 0, 1, 0], [], []>} : vector<16x32xbf16>, vector<16x32xbf16>, vector<16x16xf32> -> vector<16x16xf32>
    %c0_532 = arith.constant 0 : index
    %c1_533 = arith.constant 1 : index
    %c0_534 = arith.constant 0 : index
    %c0_535 = arith.constant 0 : index
    %722 = vector.load %arg9[%c0_532, %c1_533, %c0_534, %c0_535] : memref<1x2x16x16xf32, #tpu.memory_space<vmem>>, vector<1x1x16x16xf32>
    %723 = vector.shape_cast %722 : vector<1x1x16x16xf32> to vector<16x16xf32>
    %724 = arith.addf %721, %723 : vector<16x16xf32>
    %725 = vector.broadcast %655 : vector<1x16xf32> to vector<16x16xf32>
    %726 = arith.addf %724, %725 : vector<16x16xf32>
    %cst_536 = arith.constant dense<0xFF800000> : vector<16xf32>
    %727 = vector.multi_reduction <maximumf>, %726, %cst_536 [1] : vector<16x16xf32> to vector<16xf32>
    %728 = vector.shape_cast %727 : vector<16xf32> to vector<16x1xf32>
    %729 = vector.broadcast %728 : vector<16x1xf32> to vector<16x16xf32>
    %730 = arith.subf %726, %729 : vector<16x16xf32>
    %731 = math.exp %730 : vector<16x16xf32>
    %cst_537 = arith.constant dense<0.000000e+00> : vector<16xf32>
    %732 = vector.multi_reduction <add>, %731, %cst_537 [1] : vector<16x16xf32> to vector<16xf32>
    %733 = vector.shape_cast %732 : vector<16xf32> to vector<16x1xf32>
    %734 = tpu.reciprocal %733 {approx = true} : vector<16x1xf32> -> vector<16x1xf32>
    %735 = vector.broadcast %734 : vector<16x1xf32> to vector<16x16xf32>
    %736 = arith.mulf %731, %735 : vector<16x16xf32>
    %737 = arith.truncf %736 : vector<16x16xf32> to vector<16x16xbf16>
    %738 = arith.truncf %718 : vector<16x32xf32> to vector<16x32xbf16>
    %cst_538 = arith.constant dense<0.000000e+00> : vector<16x32xf32>
    %739 = tpu.matmul %737, %738, %cst_538 {dimension_numbers = #tpu.dot_dimension_numbers<[1], [0], [0], [1], [0, 0, 1, 1], [], []>} : vector<16x16xbf16>, vector<16x32xbf16>, vector<16x32xf32> -> vector<16x32xf32>
    %740 = tpu.concatenate %697, %739 in 1 : vector<16x32xf32>, vector<16x32xf32> -> vector<16x64xf32>
    %c0_539 = arith.constant 0 : index
    %c7_540 = arith.constant 7 : index
    %c0_541 = arith.constant 0 : index
    %c0_542 = arith.constant 0 : index
    %741 = vector.load %arg11[%c0_539, %c7_540, %c0_541, %c0_542] : memref<1x8x16x64xf32, #tpu.memory_space<vmem>>, vector<1x1x16x64xf32>
    %742 = vector.shape_cast %741 : vector<1x1x16x64xf32> to vector<16x64xf32>
    %743 = vector.shape_cast %740 : vector<16x64xf32> to vector<1x1x16x64xf32>
    tpu.vector_store %arg11[%c0_539, %c7_540, %c0_541, %c0_542], %743 {strides = array<i32>} : memref<1x8x16x64xf32, #tpu.memory_space<vmem>>, vector<1x1x16x64xf32>,
    return
  }
  func.func @transform_0(%arg0: i32, %arg1: i32) -> (i32, i32, i32, i32) {
    %c0_i32 = arith.constant 0 : i32
    %c0_i32_0 = arith.constant 0 : i32
    %c0_i32_1 = arith.constant 0 : i32
    return %arg0, %arg1, %c0_i32, %c0_i32_0 : i32, i32, i32, i32
  }
  func.func @transform_1(%arg0: i32, %arg1: i32) -> (i32, i32, i32) {
    %c0_i32 = arith.constant 0 : i32
    %c0_i32_0 = arith.constant 0 : i32
    %c0_i32_1 = arith.constant 0 : i32
    %c0_i32_2 = arith.constant 0 : i32
    return %c0_i32, %c0_i32_0, %c0_i32_1 : i32, i32, i32
  }
  func.func @transform_2(%arg0: i32, %arg1: i32) -> (i32, i32, i32) {
    %c0_i32 = arith.constant 0 : i32
    %c0_i32_0 = arith.constant 0 : i32
    %c0_i32_1 = arith.constant 0 : i32
    %c0_i32_2 = arith.constant 0 : i32
    return %c0_i32, %c0_i32_0, %c0_i32_1 : i32, i32, i32
  }
  func.func @transform_3(%arg0: i32, %arg1: i32) -> (i32, i32, i32) {
    %c0_i32 = arith.constant 0 : i32
    %c0_i32_0 = arith.constant 0 : i32
    %c0_i32_1 = arith.constant 0 : i32
    %c0_i32_2 = arith.constant 0 : i32
    return %c0_i32, %c0_i32_0, %c0_i32_1 : i32, i32, i32
  }
  func.func @transform_4(%arg0: i32, %arg1: i32) -> (i32, i32, i32) {
    %c0_i32 = arith.constant 0 : i32
    %c0_i32_0 = arith.constant 0 : i32
    %c0_i32_1 = arith.constant 0 : i32
    %c0_i32_2 = arith.constant 0 : i32
    return %c0_i32, %c0_i32_0, %c0_i32_1 : i32, i32, i32
  }
  func.func @transform_5(%arg0: i32, %arg1: i32) -> (i32, i32, i32) {
    %c0_i32 = arith.constant 0 : i32
    %c0_i32_0 = arith.constant 0 : i32
    %c0_i32_1 = arith.constant 0 : i32
    %c0_i32_2 = arith.constant 0 : i32
    return %c0_i32, %c0_i32_0, %c0_i32_1 : i32, i32, i32
  }
  func.func @transform_6(%arg0: i32, %arg1: i32) -> (i32, i32, i32) {
    %c0_i32 = arith.constant 0 : i32
    %c0_i32_0 = arith.constant 0 : i32
    %c0_i32_1 = arith.constant 0 : i32
    %c0_i32_2 = arith.constant 0 : i32
    return %c0_i32, %c0_i32_0, %c0_i32_1 : i32, i32, i32
  }
  func.func @transform_7(%arg0: i32, %arg1: i32) -> (i32, i32, i32, i32) {
    %c0_i32 = arith.constant 0 : i32
    %c0_i32_0 = arith.constant 0 : i32
    %c0_i32_1 = arith.constant 0 : i32
    %c0_i32_2 = arith.constant 0 : i32
    return %arg0, %c0_i32, %c0_i32_0, %c0_i32_1 : i32, i32, i32, i32
  }
  func.func @transform_8(%arg0: i32, %arg1: i32) -> (i32, i32, i32) {
    %c0_i32 = arith.constant 0 : i32
    %c0_i32_0 = arith.constant 0 : i32
    return %arg0, %arg1, %c0_i32 : i32, i32, i32
  }
  func.func @transform_9(%arg0: i32, %arg1: i32) -> (i32, i32, i32, i32) {
    %c0_i32 = arith.constant 0 : i32
    %c0_i32_0 = arith.constant 0 : i32
    %c0_i32_1 = arith.constant 0 : i32
    return %arg0, %arg1, %c0_i32, %c0_i32_0 : i32, i32, i32, i32
  }
}

</mosaic_0001>

<bundles_post_ra>
// kernel: tpu_custom_call.1
= control target key start
LH: loop header
LB: loop body
LE: loop exit
PB: predicated region body
PF: predicated region fallthrough
CT: control target
= control target key end

     0   :  { %s5941_s0 = inlined_call_operand.hbm [shape: f32[2,16,16,32], index: 0, kind: input, shape index: {}]   ;;  %s5942_s1 = inlined_call_operand.hbm [shape: bf16[2,32,32], index: 1, kind: input, shape index: {}]   ;;  %s5943_s2 = inlined_call_operand.hbm [shape: f32[2,1,32], index: 2, kind: input, shape index: {}]   ;;  %s5944_s3 = inlined_call_operand.hbm [shape: bf16[2,32,32], index: 3, kind: input, shape index: {}]   ;;  %s5945_s4 = inlined_call_operand.vmem [shape: f32[2,1,32], index: 4, kind: input, shape index: {}]   ;;  %s5946_s5 = inlined_call_operand.hbm [shape: bf16[2,32,32], index: 5, kind: input, shape index: {}]   ;;  %s5947_s6 = inlined_call_operand.vmem [shape: f32[2,1,32], index: 6, kind: input, shape index: {}]   ;;  %s5948_s7 = inlined_call_operand.hbm [shape: f32[2,2,16,16], index: 7, kind: input, shape index: {}]   ;;  %s5949_s8 = inlined_call_operand.hbm [shape: f32[2,16,16], index: 8, kind: input, shape index: {}]   ;;  %s5950_s9 = inlined_call_operand.hbm [shape: f32[2,16,16,64], index: 9, kind: output, shape index: {}]  }
   0x1   :  { %5968 = sst [smem:[#allocation30_spill]] %s5941_s0 }
   0x2   :  { %5969 = sst [smem:[#allocation31_spill]] %s5942_s1 }
   0x3   :  { %5970 = sst [smem:[#allocation32_spill]] %s5943_s2 }
   0x4   :  { %5971 = sst [smem:[#allocation33_spill]] %s5944_s3 }
   0x5   :  { %5972 = sst [smem:[#allocation34_spill]] %s5945_s4 }
   0x6   :  { %5973 = sst [smem:[#allocation35_spill]] %s5946_s5 }
   0x7   :  { %5974 = sst [smem:[#allocation36_spill]] %s5947_s6 }
   0x8   :  { %5975 = sst [smem:[#allocation37_spill]] %s5948_s7 }
   0x9   :  { %5976 = sst [smem:[#allocation38_spill]] %s5950_s9 }
   0xa   :  { %14 = vsyncpa [#allocation3], 0 }
   0xb   :  { %16 = vsyncpa [#allocation3 + $0x1], 0 }
   0xc   :  { %17 = vsyncpa [#allocation6], 0 }
   0xd   :  { %18 = vsyncpa [#allocation9], 0 }
   0xe   :  { %19 = vsyncpa [#allocation12], 0 }
   0xf   :  { %21 = vsyncpa [#allocation12 + $0x1], 0 }
  0x10   :  { %22 = vsyncpa [#allocation4], 0 }
  0x11   :  { %24 = vsyncpa [#allocation4 + $0x1], 0  ;;  %s5020_s30 = smov 0   ;;  %s5022_s10 = smov 0  }
  0x12   :  { %s5024_s11 = smov 0   ;;  %s5026_s12 = smov 0  }
  0x13   :  { %s5028_s13 = smov 0   ;;  %s5030_s14 = smov 0  }
  0x14   :  { %s5032_s15 = smov 0   ;;  %s5034_s16 = smov 0  }
  0x15   :  { %s5036_s17 = smov 0   ;;  %s5038_s18 = smov 0  }
  0x16   :  { %s5040_s19 = smov 0  }
  0x17 LB: > { %5977 = sst [smem:[#allocation21_spill]] %s4927_s12  ;;  %s5076_s20 = sadd.s32 4294967295, %s4955_s19   ;;  %s4955_s19 = sphi %s5040_s19, %s30_s19   ;;  %s4951_s18 = sphi %s5038_s18, %s6033_s18   ;;  %s4947_s17 = sphi %s5036_s17, %s6032_s17   ;;  %s4943_s16 = sphi %s5034_s16, %s6031_s16   ;;  %s4939_s15 = sphi %s5032_s15, %s6030_s15   ;;  %s4935_s14 = sphi %s5030_s14, %s6029_s14   ;;  %s4931_s13 = sphi %s5028_s13, %s6028_s13   ;;  %s4927_s12 = sphi %s5026_s12, %s6027_s12   ;;  %s4923_s11 = sphi %s5024_s11, %s6026_s11   ;;  %s4919_s10 = sphi %s5022_s10, %s6025_s10   ;;  %s4915_s30 = sphi %s5020_s30, %s6024_s30  }
  0x18   : > { %5978 = sst [smem:[#allocation22_spill]] %s4939_s15  ;;  %p3605_p0 = scmp.ge.s32.totalorder %s4955_s19, 1 }
  0x19   : > { %5979 = sst [smem:[#allocation23_spill]] %s4943_s16  ;;  %p5958_p1 = scmp.eq.s32.totalorder %s5076_s20, 0 }
  0x1a   : > { %p270_p2 = scmp.eq.s32.totalorder %s5076_s20, 3  ;;  %p283_p3 = scmp.lt.s32.totalorder %s4955_s19, 5 }
  0x1b   : > { %s5980_s1 = sld [smem:[#allocation31_spill]]  ;;  %s4957_s25 = smov [#allocation5]  }
  0x1c   : > { %p5085_p4 = pnand %p3605_p0, %p283_p3  ;;  %s296_s26 = sshll.u32 %s4957_s25, 4  ;;  %s297_s26 = int_to_ptr.vmem [resolvable:$true] %s296_s26 }
  0x1d   : > { %s5983_s3 = sld [smem:[#allocation33_spill]]  ;;  %s4958_s22 = smov [#allocation8]  }
  0x1e   : > { %p4285_p5 = pneg %p5085_p4  ;;  %s324_s25 = sshll.u32 %s4958_s22, 4  ;;  %s325_s25 = int_to_ptr.vmem [resolvable:$true] %s324_s25 }
  0x1f   : > { %s5953_s9 = smov 4   ;;  %p59_p7 = scmp.eq.s32.totalorder %s4955_s19, 0 }
  0x20   : > { %p5093_p6 = pnand %p4285_p5, %p5958_p1  ;;  %p210_p8 = scmp.ne.s32.totalorder %s4923_s11, %s4919_s10 }
  0x21   : > { %s294_s23 = sshll.u32 %s5980_s1, 4  ;;  %s5952_s1 = smov 64   ;;  %s295_s23 = int_to_ptr.hbm [resolvable:$true] %s294_s23 }
  0x22   : > { %4288 = dma.hbm_to_vmem [thread:$0]  (!%p5093_p6), %s295_s23, 512, %s297_s26, [#allocation6], %s5952_s1, %s5952_s1, %s5953_s9  }
  0x23   : > { %s322_s21 = sshll.u32 %s5983_s3, 4  ;;  %p216_p9 = scmp.ne.s32.totalorder %s4919_s10, %s4915_s30  ;;  %s323_s21 = int_to_ptr.hbm [resolvable:$true] %s322_s21 }
  0x24   : > { %4294 = dma.hbm_to_vmem [thread:$0]  (!%p5093_p6), %s323_s21, 512, %s325_s25, [#allocation9], %s5952_s1, %s5952_s1, %s5953_s9  }
  0x25   : > { %p4316_p10 = scmp.lt.s32.totalorder %s4955_s19, 4  ;;  %s5959_s22 = sshll.u32 %s4951_s18, 5 }
  0x26   : > { %p212_p11 = por %p210_p8, %p59_p7  ;;  %p5123_p12 = por %p216_p9, %p5958_p1 }
  0x27   : > { %s383_s23 = sand.u32 1, %s4955_s19   ;;  %s385_s26 = sand.u32 1, %s4923_s11  }
  0x28   : > { %s5984_s3 = scalar_select %p5123_p12, 1, 0 }
  0x29   : > { %s3616_s16 = sshll.u32 %s385_s26, 5  ;;  %s5986_s7 = sld [smem:[#allocation37_spill]] }
  0x2a   : > { %5985 = sst [smem:[#allocation24_spill]] %s5984_s3  ;;  %s387_s1 = scalar_lea.vmem [#allocation11], %s3616_s16 }
  0x2b   : > { %s395_s30 = sshll.u32 %s387_s1, 4  ;;  %p4302_p13 = pnand %p4316_p10, %p212_p11  ;;  %s396_s30 = int_to_ptr.vmem [resolvable:$true] %s395_s30 }
  0x2c   : > { %s5987_s2 = sld [smem:[#allocation32_spill]]  ;;  %s4961_s26 = smov [#allocation7]  }
  0x2d   : > { %s310_s4 = sshll.u32 %s4961_s26, 4  ;;  %s5139_s21 = scalar_lea.sflag [#allocation12], %s383_s23  ;;  %s311_s4 = int_to_ptr.vmem [resolvable:$true] %s310_s4 }
  0x2e   : > { %s5956_s16 = smov 128   ;;  %s5957_s1 = smov 8  }
  0x2f   : > { %s392_s29 = scalar_lea.hbm %s5986_s7, %s5959_s22  ;;  %s5988_s5 = sld [smem:[#allocation35_spill]] }
  0x30   : > { %s393_s28 = sshll.u32 %s392_s29, 4  ;;  %s4964_s23 = smov 16   ;;  %s394_s28 = int_to_ptr.hbm [resolvable:$true] %s393_s28 }
  0x31   : > { %4304 = dma.hbm_to_vmem [thread:$0]  (!%p4302_p13), %s394_s28, 512, %s396_s30, %s5139_s21, %s5956_s16, %s5956_s16, %s5957_s1  }
  0x32   : > { %s308_s6 = sshll.u32 %s5987_s2, 4  ;;  %s4965_s25 = smov 1   ;;  %s309_s6 = int_to_ptr.hbm [resolvable:$true] %s308_s6 }
  0x33   : > { %4291 = dma.hbm_to_vmem [thread:$0]  (!%p5093_p6), %s309_s6, 32, %s311_s4, [#allocation6], %s4964_s23, %s4964_s23, %s4965_s25  }
  0x34   : > { %s4966_s26 = smov [#allocation10]   ;;  %s5989_s30 = smov 4  }
  0x35   : > { %s339_s29 = sshll.u32 %s5988_s5, 4  ;;  %s341_s28 = sshll.u32 %s4966_s26, 4  ;;  %s340_s29 = int_to_ptr.hbm [resolvable:$true] %s339_s29  ;;  %s342_s28 = int_to_ptr.vmem [resolvable:$true] %s341_s28 }
  0x36   : > { %s5990_s16 = smov 64   ;;  %s3604_s9 = sadd.s32 4294967294, %s4955_s19  }
  0x37   : > { %4297 = dma.hbm_to_vmem [thread:$0]  (!%p5093_p6), %s340_s29, 512, %s342_s28, [#allocation9], %s5990_s16, %s5990_s16, %s5989_s30  }
  0x38   : > { %s39_s15 = sadd.s32 1, %s4947_s17  ;;  %s51_s1 = sadd.s32 1, %s4935_s14 }
  0x39   : > { %p40_p0 = scmp.ge.s32.totalorder %s39_s15, 2  ;;  %p58_p3 = scmp.ne.s32.totalorder %s4935_s14, %s4931_s13 }
  0x3a   : > { %p64_p5 = scmp.ne.s32.totalorder %s4931_s13, %s4927_s12  ;;  %s5992_s4 = sadd.s32 1, %s4951_s18 }
  0x3b   : > { %s6035_s15 = smov (%p40_p0, %s39_s15), 0  ;;  %s6037_s4 = smov (!%p40_p0, %s5992_s4), %s4951_s18 }
  0x3c   : > { %5991 = sst [smem:[#allocation25_spill]] %s6035_s15  ;;  %s47_s6 = ssub.s32 %s4947_s17, %s6035_s15 }
  0x3d   : > { %p5171_p6 = por %p59_p7, %p58_p3  ;;  %p44_p8 = scmp.ge.s32.totalorder %s6037_s4, 2 }
  0x3e   : > { %p5177_p9 = por %p5958_p1, %p64_p5  ;;  %p5183_p11 = por %p270_p2, %p58_p3 }
  0x3f   : > { %p276_p13 = scmp.eq.s32.totalorder %s3604_s9, 3  ;;  %s6039_s4 = smov (%p44_p8, %s6037_s4), 0 }
  0x40   : > { %s5995_s29 = scalar_select %p5183_p11, 1, 0 }
  0x41   : > { %5997 = sst [smem:[#allocation27_spill]] %s6039_s4  ;;  %p5189_p7 = por %p276_p13, %p64_p5 }
  0x42   : > { %5996 = sst [smem:[#allocation26_spill]] %s5995_s29  ;;  %s358_s25 = sand.u32 1, %s4935_s14  }
  0x43   : > { %s5998_s23 = scalar_select %p5189_p7, 1, 0 }
  0x44   : > { %s46_s26 = ssub.s32 %s4951_s18, %s6039_s4  ;;  %s3611_s30 = sshll.u32 %s358_s25, 7 }
  0x45   : > { %5999 = sst [smem:[#allocation28_spill]] %s5998_s23  ;;  %s48_s28 = sor.u32 %s47_s6, %s46_s26 }
  0x46   : > { %p201_p0 = scmp.eq.s32.totalorder %s46_s26, 0  ;;  %p49_p1 = scmp.eq.s32.totalorder %s48_s28, 0 }
  0x47   : > { %s6000_s22 = sadd.s32 1, %s4923_s11  ;;  %s4162_s5 = sshll.u32 %s4947_s17, 4 }
  0x48   : > { %s5199_s2 = scalar_select %p201_p0, %s4923_s11, %s6000_s22  }
  0x49   : > { %s5202_s9 = scalar_select %p49_p1, %s4935_s14, %s51_s1  }
  0x4a   : > { %s6002_s7 = sshll.u32 %s4951_s18, 5  ;;  %s362_s12 = scalar_lea.vmem [#allocation2], %s3611_s30 }
  0x4b   : > { %6001 = sst [smem:[#allocation29_spill]] %s5202_s9  ;;  %s368_s15 = sadd.s32 %s4162_s5, %s6002_s7 }
  0x4c   : > { %s373_s23 = sshll.u32 %s362_s12, 4  ;;  %s3615_s29 = sshll.u32 %s368_s15, 3  ;;  %s374_s23 = int_to_ptr.vmem [resolvable:$true] %s373_s23 }
  0x4d   : > { %s6003_s0 = sld [smem:[#allocation30_spill]]  ;;  %p5214_p2 = pnand %p4316_p10, %p5171_p6 }
  0x4e   : > { %s3619_s26 = sshll.u32 %s358_s25, 3  ;;  %s359_s5 = scalar_lea.sflag [#allocation3], %s358_s25 }
  0x4f   : > { %s6005_s7 = smov 8   ;;  %s6006_s12 = smov 128  }
  0x50   : > { %s3620_s3 = sshll.u32 %s4951_s18, 1  ;;  %s409_s4 = scalar_lea.vmem [#allocation13], %s3619_s26 }
  0x51   : > { %s413_s15 = sadd.s32 %s4947_s17, %s3620_s3  ;;  %s419_s27 = sshll.u32 %s409_s4, 4  ;;  %s420_s27 = int_to_ptr.vmem [resolvable:$true] %s419_s27 }
  0x53   : > { %s370_s6 = scalar_lea.hbm %s6003_s0, %s3615_s29  ;;  %s3621_s29 = sshll.u32 %s413_s15, 3 }
  0x54   : > { %s371_s1 = sshll.u32 %s370_s6, 4  ;;  %s415_s0 = scalar_lea.hbm %s5949_s8, %s3621_s29  ;;  %s372_s1 = int_to_ptr.hbm [resolvable:$true] %s371_s1 }
  0x55   : > { %4301 = dma.hbm_to_vmem [thread:$0]  (!%p5214_p2), %s372_s1, 2048, %s374_s23, %s359_s5, %s6006_s12, %s6006_s12, %s6005_s7  }
  0x56   : > { %s417_s9 = sshll.u32 %s415_s0, 4  ;;  %428 = sbr.rel (%p5085_p4) target bundleno = 7104 (0x1bc0), region = 56  ;;  %s418_s9 = int_to_ptr.hbm [resolvable:$true] %s417_s9 }
  0x57   : > { %4307 = dma.hbm_to_vmem [thread:$0]  (!%p5214_p2), %s418_s9, 128, %s420_s27, %s5139_s21  }
  0x58   : > { %s5234_s23 = sand.u32 (!%p5085_p4), 1, %s4931_s13  }
  0x59   : > { %s3623_s25 = sshll.u32 (!%p5085_p4), %s5234_s23, 7  ;;  %s431_s6 = scalar_lea.sflag (!%p5085_p4), [#allocation3], %s5234_s23 }
  0x5a   : > { %s5240_s1 = scalar_lea.vmem (!%p5085_p4), [#allocation2], %s3623_s25 }
  0x5b   : > { %4890 = dma.done.wait (%p5177_p9), %s431_s6, 2048  }
  0x5c   : > { %4892 = vsyncadd (%p5177_p9), %s431_s6, 4294965248  ;;  %p6007_p1 = scmp.eq.s32.totalorder %s5076_s20, 0 }
  0x5e   : > { %4894 = dma.done.wait (%p6007_p1), [#allocation6], 544   ;;  %p6008_p4 = pmov %p6007_p1 }
  0x5f   : > { %p6009_p10 = pmov %p6007_p1 }
  0x60   : > { %4896 = vsyncadd (%p6008_p4), [#allocation6], 4294966752 }
  0x61   : > { %4898 = dma.done.wait (%p6009_p10), [#allocation9], 1024   ;;  %p6010_p3 = pmov %p6007_p1 }
  0x62   : > { %s460_s24 = sand.u32 1, %s5076_s20   ;;  %s462_s21 = sand.u32 1, %s4919_s10  }
  0x63   : > { %4900 = vsyncadd (%p6010_p3), [#allocation9], 4294966272  ;;  %s3628_s9 = sshll.u32 %s462_s21, 5  ;;  %s461_s22 = scalar_lea.sflag [#allocation12], %s460_s24 }
  0x64   : > { %s5256_s26 = scalar_lea.vmem [#allocation11], %s3628_s9 }
  0x65   : > { %4902 = dma.done.wait (%p5123_p12), %s461_s22, 512  }
  0x66   : > { %4904 = vsyncadd (%p5123_p12), %s461_s22, 4294966784  ;;  %s3629_s5 = sshll.u32 %s5234_s23, 3 }
  0x67   : > { %s5263_s7 = scalar_lea.vmem [#allocation13], %s3629_s5 }
  0x68   : > { %4906 = dma.done.wait (%p5177_p9), %s461_s22, 128  }
  0x69   : > { %4908 = vsyncadd (%p5177_p9), %s461_s22, 4294967168  ;;  %v4165_v0 = vld [vmem:[#allocation5 + $0x8] sm:$0xff]  ;;  %v4164_v2 = vld [vmem:[#allocation5] sm:$0xff]  ;;  %vm547_vm0 = vcmask 261120   ;;  %s6012_s12 = sld [smem:[#allocation34_spill]]  ;;  %vm660_vm1 = vcmask 130048  }
  0x6a   : > { %v4167_v1 = vld [vmem:[#allocation8 + $0x8] sm:$0xff]  ;;  %v4166_v3 = vld [vmem:[#allocation8] sm:$0xff]  ;;  %557 = vmatpush.bf16.msra.mxu0 %v4165_v0  ;;  %v4423_v13 = vld [vmem:[#allocation7] ss:$0 sm:$0xff]  ;;  %s6014_s27 = sld [smem:[#allocation36_spill]]  ;;  %s4967_s20 = smov 32  }
  0x6b   : > { %v523_v4 = vld [vmem:[%s5240_s1] sm:$0xff]  ;;  %591 = vmatpush.bf16.msra.mxu1 %v4167_v1  ;;  %v524_v5 = vld [vmem:[%s5240_s1 + $0x8] sm:$0xff]  ;;  %v4172_v23 = vld [vmem:[#allocation8 + $0x10] sm:$0xff]  ;;  %vm888_vm2 = vcmask 523264   ;;  %s5799_s16 = scalar_lea.vmem [#allocation14], %s3623_s25  ;;  %s6015_s15 = sld [smem:[#allocation22_spill]] }
  0x6c   : > { %v5271_v6 = vpack.c.bf16 %v524_v5, %v523_v4  ;;  %v4169_v20 = vld [vmem:[#allocation10 + $0x8] sm:$0xff]  ;;  %v4168_v21 = vld [vmem:[#allocation10] sm:$0xff]  ;;  %v4173_v22 = vld [vmem:[#allocation8 + $0x18] sm:$0xff]  ;;  %s6016_s4 = sld [smem:[#allocation23_spill]]  ;;  %s3412_s22 = scalar_lea.sflag [#allocation4], %s5234_s23 }
  0x6d   : > { %625 = vmatpush.bf16.msra.mxu2 %v4169_v20  ;;  %v5285_v24 = vld [vmem:[%s5256_s26] sm:$0xff]  ;;  %v5294_v30 = vld [vmem:[%s5256_s26 + $0x8] sm:$0xff]  ;;  %v4171_v35 = vld [vmem:[#allocation5 + $0x18] sm:$0xff]  ;;  %s6018_s24 = sld [smem:[#allocation38_spill]] }
  0x6e   : > { %558 = vmatpush.bf16.msra.mxu0 %v4164_v2  ;;  %v5288_v25 = vld [vmem:[%s5263_s7] ss:$0 sm:$0xff]  ;;  %v4170_v36 = vld [vmem:[#allocation5 + $0x10] sm:$0xff]  ;;  %v4428_v4 = vld [vmem:[#allocation7 + $0x1] ss:$0 sm:$0xff] }
  0x6f   : > { %592 = vmatpush.bf16.msra.mxu1 %v4166_v3  ;;  %s6013_s3 = smov %s6012_s12  ;;  %v4424_v9 = vld [vmem:[%s6012_s12] ss:$0 sm:$0xff] }
  0x70   : > { %v4426_v41 = vld [vmem:[%s6014_s27] ss:$0 sm:$0xff]  ;;  %v4427_v54 = vld [vmem:[%s6013_s3 + $0x1] ss:$0 sm:$0xff] }
  0x71   : > { %3639 = vmatmul.msk.bf16.vlgmr.msra.gmra.mxu0 %vm547_vm0, %v5271_v6  ;;  %626 = vmatpush.bf16.msra.mxu2 %v4168_v21  ;;  %s4260_s29 = sshll.u32 %s6015_s15, 4 }
  0x72   : > { %3648 = vmatmul.msk.bf16.vlgmr.msra.gmra.mxu1 %vm547_vm0, %v5271_v6  ;;  %s4158_s28 = sshll.u32 %s6016_s4, 5 }
  0x73   : > { %730 = vmatpush.bf16.msrb.mxu1 %v4171_v35  ;;  %s3424_s6 = sadd.s32 %s4260_s29, %s4158_s28  ;;  %s4837_s15 = scalar_lea.hbm %s6018_s24, 512 }
  0x74   : > { %3657 = vmatmul.msk.bf16.vlgmr.msra.gmra.mxu2 %vm547_vm0, %v5271_v6  ;;  %s4159_s0 = sshll.u32 %s3424_s6, 3 }
  0x75   : > { %766 = vmatpush.bf16.msrb.mxu2 %v4173_v22  ;;  %s3426_s21 = scalar_lea.hbm %s6018_s24, %s4159_s0 }
  0x76   : > { %s3429_s9 = sshll.u32 %s3426_s21, 4  ;;  %s3430_s9 = int_to_ptr.hbm [resolvable:$true] %s3429_s9 }
  0x77   : > { %731 = vmatpush.bf16.msrb.mxu1 %v4170_v36  ;;  %s4831_s5 = sshra.s32 %s3430_s9, 4  ;;  %s4832_s5 = int_to_ptr.hbm [resolvable:$true] %s4831_s5 }
  0x78   : > { %p4838_p8 = scmp.lt.s32.totalorder %s4832_s5, %s6018_s24 }
  0x79   : > { %767 = vmatpush.bf16.msrb.mxu2 %v4172_v23 }
  0x82   : > { %3668 = vmatmul.msk.bf16.vlgmr.msrb.gmra.mxu1 %vm547_vm0, %v5271_v6 }
  0x84   : > { %3678 = vmatmul.msk.bf16.vlgmr.msrb.gmra.mxu2 %vm547_vm0, %v5271_v6 }
  0xee   : > { %v560_v8 = vpop.f32.mrf.mxu0 }
  0xef   : > { %v594_v7 = vpop.f32.mrf.mxu1  ;;  %v561_v17 = vadd.f32 %v4423_v13, %v560_v8 }
  0xf0   : > { %v595_v11 = vadd.f32 %v4424_v9, %v594_v7 }
  0xf6   : > { %v562_v15 = vpop.f32.mrf.mxu0 }
  0xf7   : > { %v596_v10 = vpop.f32.mrf.mxu1  ;;  %v563_v18 = vadd.f32 %v4423_v13, %v562_v15  ;;  %v628_v39 = vpop.f32.mrf.mxu2  ;;  %v4179_v13 = vld [vmem:[#allocation8 + $0x8] sm:$0xff] }
  0xf8   : > { %v597_v12 = vadd.f32 %v4424_v9, %v596_v10  ;;  %v629_v43 = vadd.f32 %v4426_v41, %v628_v39  ;;  %v4175_v10 = vld [vmem:[#allocation10 + $0x18] sm:$0xff] }
  0xf9   : > { %v633_v19 = vpack.c.bf16 %v563_v18, %v561_v17  ;;  %v3693_v18 = vld [vmem:[%s5240_s1 + $0x10] sm:$0xff] }
  0xfa   : > { %v634_v14 = vpack.c.bf16 %v597_v12, %v595_v11  ;;  %v4174_v12 = vld [vmem:[#allocation10 + $0x10] sm:$0xff] }
  0xfc   : > { %v641_v16 = vsel %vm547_vm0, %v634_v14, 0  ;;  %v4178_v14 = vld [vmem:[#allocation8] sm:$0xff] }
  0xfd   : > { %650 = vmatpush.bf16.xpose.msra.mxu3 %v641_v16  ;;  %v5321_v16 = vld [vmem:[%s5256_s26 + $0x10] sm:$0xff] }
  0xff   : > { %v630_v45 = vpop.f32.mrf.mxu2  ;;  %v733_v2 = vpop.f32.mrf.mxu1 }
 0x100   : > { %v631_v46 = vadd.f32 %v4426_v41, %v630_v45  ;;  %v734_v7 = vadd.f32 %v4428_v4, %v733_v2 }
 0x102   : > { %v684_v50 = vpack.c.bf16 %v631_v46, %v629_v43 }
 0x104   : > { %3658 = vmatmul.msk.bf16.vlgmr.msra.gmra.mxu3 %vm547_vm0, %v633_v19  ;;  %695 = vmatpush.bf16.msrb.mxu0 %v684_v50  ;;  %v3694_v19 = vld [vmem:[%s5240_s1 + $0x18] sm:$0xff] }
 0x105   : > { %802 = vmatpush.bf16.msrb.mxu3 %v4175_v10  ;;  %v5327_v22 = vpack.c.bf16 %v3694_v19, %v3693_v18 }
 0x107   : > { %v769_v53 = vpop.f32.mrf.mxu2  ;;  %v735_v5 = vpop.f32.mrf.mxu1 }
 0x108   : > { %v770_v55 = vadd.f32 %v4427_v54, %v769_v53  ;;  %v736_v8 = vadd.f32 %v4428_v4, %v735_v5  ;;  %v4181_v4 = vld [vmem:[#allocation10 + $0x8] sm:$0xff] }
 0x109   : > { %803 = vmatpush.bf16.msrb.mxu3 %v4174_v12  ;;  %v5358_v12 = vld [vmem:[%s5263_s7 + $0x1] ss:$0 sm:$0xff] }
 0x10a   : > { %v810_v9 = vpack.c.bf16 %v736_v8, %v734_v7  ;;  %v4180_v7 = vld [vmem:[#allocation10] sm:$0xff]  ;;  %v4185_v8 = vld [vmem:[#allocation8 + $0x18] sm:$0xff] }
 0x10d   : > { %959 = vmatpush.bf16.msra.mxu3 %v4179_v13 }
 0x10f   : > { %v771_v56 = vpop.f32.mrf.mxu2 }
 0x110   : > { %v772_v57 = vadd.f32 %v4427_v54, %v771_v56 }
 0x111   : > { %960 = vmatpush.bf16.msra.mxu3 %v4178_v14 }
 0x112   : > { %v811_v58 = vpack.c.bf16 %v772_v57, %v770_v55 }
 0x114   : > { %v819_v59 = vsel %vm547_vm0, %v811_v58, 0  ;;  %3688 = vmatmul.msk.bf16.vlgmr.msrb.gmra.mxu3 %vm547_vm0, %v5271_v6 }
 0x115   : > { %828 = vmatpush.bf16.xpose.msra.mxu0 %v819_v59 }
 0x124   : > { %3712 = vmatmul.msk.bf16.vlgmr.msra.gmra.mxu3 %vm547_vm0, %v5327_v22 }
 0x187   : > { %v652_v26 = vpop.f32.mrf.mxu3 }
 0x188   : > { %v653_v27 = vadd.f32 %v652_v26, %v5285_v24  ;;  %v5331_v26 = vld [vmem:[%s5256_s26 + $0x18] sm:$0xff] }
 0x18a   : > { %v658_v28 = vadd.f32 %v5288_v25, %v653_v27 }
 0x18c   : > { %v661_v29 = vsel %vm660_vm1, %v658_v28, -inf }
 0x18d   : > { %662 = vmax.xlane.f32.xlu0 %v661_v29 }
 0x18f   : > { %v654_v31 = vpop.f32.mrf.mxu3 }
 0x190   : > { %v655_v32 = vadd.f32 %v654_v31, %v5294_v30  ;;  %v4177_v31 = vld [vmem:[#allocation5 + $0x8] sm:$0xff] }
 0x191   : > { %925 = vmatpush.bf16.msra.mxu2 %v4177_v31 }
 0x192   : > { %v659_v33 = vadd.f32 %v5288_v25, %v655_v32  ;;  %v4176_v32 = vld [vmem:[#allocation5] sm:$0xff] }
 0x194   : > { %v664_v34 = vsel %vm660_vm1, %v659_v33, -inf }
 0x195   : > { %665 = vmax.xlane.f32.xlu0 %v664_v34  ;;  %926 = vmatpush.bf16.msra.mxu2 %v4176_v32 }
 0x197   : > { %v805_v35 = vpop.f32.mrf.mxu3 }
 0x198   : > { %3703 = vmatmul.msk.bf16.vlgmr.msra.gmra.mxu2 %vm547_vm0, %v5327_v22 }
 0x200   : > { %v663_v37 = vpop.xlane.xlu0 %662 }
 0x201   : > { %v667_v38 = vsub.f32 %v658_v28, %v663_v37  ;;  %v4429_v37 = vld [vmem:[%s6014_s27 + $0x1] ss:$0 sm:$0xff] }
 0x203   : > { %v669_v40 = vmul.f32 1.442695, %v667_v38  ;;  %v806_v38 = vadd.f32 %v4429_v37, %v805_v35 }
 0x205   : > { %4479 = vpow2.f32 %v669_v40  ;;  %v807_v40 = vpop.f32.mrf.mxu3 }
 0x206   : > { %v808_v41 = vadd.f32 %v4429_v37, %v807_v40 }
 0x208   : > { %v666_v42 = vpop.xlane.xlu0 %665  ;;  %v860_v45 = vpack.c.bf16 %v808_v41, %v806_v38 }
 0x209   : > { %v668_v44 = vsub.f32 %v659_v33, %v666_v42 }
 0x20a   : > { %871 = vmatpush.bf16.msra.mxu1 %v860_v45  ;;  %v4434_v45 = vld [vmem:[%s6013_s3 + $0x1] ss:$0 sm:$0xff] }
 0x20b   : > { %v4480_v47 = vpop.eup %4479  ;;  %v671_v48 = vmul.f32 1.442695, %v668_v44 }
 0x20c   : > { %v673_v49 = vsel %vm660_vm1, %v4480_v47, 0.0 }
 0x20d   : > { %4481 = vpow2.f32 %v671_v48  ;;  %674 = vadd.xlane.f32.xlu1 %v673_v49  ;;  %v962_v48 = vpop.f32.mrf.mxu3  ;;  %v4430_v49 = vld [vmem:[%s6013_s3] ss:$0 sm:$0xff] }
 0x213   : > { %v4482_v51 = vpop.eup %4481 }
 0x214   : > { %v676_v52 = vsel %vm660_vm1, %v4482_v51, 0.0 }
 0x215   : > { %677 = vadd.xlane.f32.xlu1 %v676_v52  ;;  %v964_v50 = vpop.f32.mrf.mxu3 }
 0x216   : > { %v965_v52 = vadd.f32 %v4430_v49, %v964_v50 }
 0x280   : > { %v675_v60 = vpop.xlane.xlu1 %674 }
 0x281   : > { %4483 = vrcp.f32 %v675_v60 }
 0x287   : > { %v4484_v62 = vpop.eup %4483 }
 0x288   : > { %v678_v61 = vpop.xlane.xlu1 %677  ;;  %v681_v0 = vmul.f32 %v4484_v62, %v4480_v47 }
 0x289   : > { %4485 = vrcp.f32 %v678_v61  ;;  %v928_v61 = vpop.f32.mrf.mxu2 }
 0x28f   : > { %v4486_v63 = vpop.eup %4485 }
 0x290   : > { %v682_v1 = vmul.f32 %v4486_v63, %v4482_v51  ;;  %v963_v51 = vadd.f32 %v4430_v49, %v962_v48  ;;  %v4431_v63 = vld [vmem:[#allocation7] ss:$0 sm:$0xff] }
 0x292   : > { %v683_v3 = vpack.c.bf16 %v682_v1, %v681_v0  ;;  %v1002_v53 = vpack.c.bf16 %v965_v52, %v963_v51  ;;  %v930_v0 = vpop.f32.mrf.mxu2  ;;  %v929_v1 = vadd.f32 %v4431_v63, %v928_v61 }
 0x293   : > { %v931_v2 = vadd.f32 %v4431_v63, %v930_v0  ;;  %v4187_v0 = vld [vmem:[#allocation10 + $0x18] sm:$0xff] }
 0x294   : > { %3659 = vmatmul.msk.bf16.vlgmr.msrb.gmra.mxu0 %vm660_vm1, %v683_v3  ;;  %v1009_v54 = vsel %vm547_vm0, %v1002_v53, 0 }
 0x295   : > { %1018 = vmatpush.bf16.xpose.msrb.mxu1 %v1009_v54  ;;  %v1001_v3 = vpack.c.bf16 %v931_v2, %v929_v1  ;;  %993 = vmatpush.bf16.msrb.mxu0 %v4181_v4  ;;  %v4186_v2 = vld [vmem:[#allocation10 + $0x10] sm:$0xff]  ;;  %v4190_v4 = vld [vmem:[#allocation8] sm:$0xff] }
 0x299   : > { %994 = vmatpush.bf16.msrb.mxu0 %v4180_v7 }
 0x2a4   : > { %3691 = vmatmul.msk.bf16.vlgmr.msra.gmra.mxu0 %vm547_vm0, %v810_v9  ;;  %v4184_v9 = vld [vmem:[#allocation8 + $0x10] sm:$0xff] }
 0x2a5   : > { %1129 = vmatpush.bf16.msra.mxu0 %v4185_v8 }
 0x2a9   : > { %1130 = vmatpush.bf16.msra.mxu0 %v4184_v9 }
 0x2b4   : > { %3721 = vmatmul.msk.bf16.vlgmr.msrb.gmra.mxu0 %vm547_vm0, %v5327_v22 }
 0x2c4   : > { %3742 = vmatmul.msk.bf16.vlgmr.msra.gmra.mxu0 %vm547_vm0, %v5327_v22 }
 0x311   : > { %v5314_v11 = vpop.f32.mrf.mxu0 }
 0x319   : > { %v5318_v15 = vpop.f32.mrf.mxu0 }
 0x321   : > { %v830_v17 = vpop.f32.mrf.mxu0 }
 0x322   : > { %v831_v20 = vadd.f32 %v5321_v16, %v830_v17 }
 0x324   : > { %v835_v21 = vadd.f32 %v5288_v25, %v831_v20 }
 0x326   : > { %v837_v23 = vsel %vm660_vm1, %v835_v21, -inf }
 0x327   : > { %838 = vmax.xlane.f32.xlu2 %v837_v23 }
 0x329   : > { %v832_v6 = vpop.f32.mrf.mxu0 }
 0x32a   : > { %v833_v27 = vadd.f32 %v5331_v26, %v832_v6  ;;  %v4183_v6 = vld [vmem:[#allocation5 + $0x18] sm:$0xff] }
 0x32b   : > { %1095 = vmatpush.bf16.msrb.mxu3 %v4183_v6  ;;  %v4189_v6 = vld [vmem:[#allocation5 + $0x8] sm:$0xff] }
 0x32c   : > { %v836_v28 = vadd.f32 %v5288_v25, %v833_v27  ;;  %v4182_v27 = vld [vmem:[#allocation5 + $0x10] sm:$0xff]  ;;  %1285 = vmatpush.bf16.msrb.mxu0 %v4189_v6  ;;  %v4195_v6 = vld [vmem:[#allocation5 + $0x18] sm:$0xff] }
 0x32e   : > { %v840_v29 = vsel %vm660_vm1, %v836_v28, -inf }
 0x32f   : > { %841 = vmax.xlane.f32.xlu2 %v840_v29  ;;  %1096 = vmatpush.bf16.msrb.mxu3 %v4182_v27  ;;  %v4433_v29 = vld [vmem:[%s6014_s27] ss:$0 sm:$0xff] }
 0x330   : > { %v4188_v27 = vld [vmem:[#allocation5] sm:$0xff] }
 0x331   : > { %1286 = vmatpush.bf16.msrb.mxu0 %v4188_v27  ;;  %v4194_v27 = vld [vmem:[#allocation5 + $0x10] sm:$0xff] }
 0x332   : > { %3732 = vmatmul.msk.bf16.vlgmr.msrb.gmra.mxu3 %vm547_vm0, %v5327_v22 }
 0x39a   : > { %v839_v33 = vpop.xlane.xlu2 %838 }
 0x39b   : > { %v843_v34 = vsub.f32 %v835_v21, %v839_v33 }
 0x39d   : > { %v845_v36 = vmul.f32 1.442695, %v843_v34 }
 0x39f   : > { %4487 = vpow2.f32 %v845_v36 }
 0x3a2   : > { %v842_v25 = vpop.xlane.xlu2 %841 }
 0x3a3   : > { %v844_v39 = vsub.f32 %v836_v28, %v842_v25  ;;  %v996_v28 = vpop.f32.mrf.mxu0 }
 0x3a4   : > { %v997_v33 = vadd.f32 %v4433_v29, %v996_v28 }
 0x3a5   : > { %v4488_v42 = vpop.eup %4487  ;;  %v847_v43 = vmul.f32 1.442695, %v844_v39 }
 0x3a6   : > { %v849_v44 = vsel %vm660_vm1, %v4488_v42, 0.0 }
 0x3a7   : > { %4489 = vpow2.f32 %v847_v43  ;;  %850 = vadd.xlane.f32.xlu0 %v849_v44 }
 0x3ab   : > { %v998_v35 = vpop.f32.mrf.mxu0 }
 0x3ac   : > { %v999_v36 = vadd.f32 %v4433_v29, %v998_v35 }
 0x3ad   : > { %v4490_v46 = vpop.eup %4489 }
 0x3ae   : > { %v852_v47 = vsel %vm660_vm1, %v4490_v46, 0.0  ;;  %v1051_v37 = vpack.c.bf16 %v999_v36, %v997_v33 }
 0x3af   : > { %853 = vadd.xlane.f32.xlu1 %v852_v47 }
 0x3b0   : > { %1062 = vmatpush.bf16.msrb.mxu2 %v1051_v37 }
 0x3b3   : > { %v1132_v44 = vpop.f32.mrf.mxu0 }
 0x3b4   : > { %v1133_v47 = vadd.f32 %v4434_v45, %v1132_v44  ;;  %v4437_v44 = vld [vmem:[%s6013_s3] ss:$0 sm:$0xff] }
 0x41a   : > { %v851_v55 = vpop.xlane.xlu0 %850 }
 0x41b   : > { %4491 = vrcp.f32 %v851_v55 }
 0x421   : > { %v4492_v57 = vpop.eup %4491 }
 0x422   : > { %v854_v56 = vpop.xlane.xlu1 %853  ;;  %v857_v59 = vmul.f32 %v4492_v57, %v4488_v42  ;;  %v1098_v57 = vpop.f32.mrf.mxu3 }
 0x423   : > { %4493 = vrcp.f32 %v854_v56 }
 0x429   : > { %v4494_v58 = vpop.eup %4493 }
 0x42a   : > { %v858_v60 = vmul.f32 %v4494_v58, %v4490_v46  ;;  %v1134_v46 = vpop.f32.mrf.mxu0 }
 0x42b   : > { %v1135_v48 = vadd.f32 %v4434_v45, %v1134_v46 }
 0x42c   : > { %v859_v62 = vpack.c.bf16 %v858_v60, %v857_v59  ;;  %v4435_v59 = vld [vmem:[#allocation7 + $0x1] ss:$0 sm:$0xff]  ;;  %v1100_v60 = vpop.f32.mrf.mxu3 }
 0x42d   : > { %v1172_v49 = vpack.c.bf16 %v1135_v48, %v1133_v47  ;;  %v1099_v61 = vadd.f32 %v4435_v59, %v1098_v57 }
 0x42e   : > { %3692 = vmatmul.msk.bf16.vlgmr.msra.gmra.mxu1 %vm660_vm1, %v859_v62  ;;  %v1101_v62 = vadd.f32 %v4435_v59, %v1100_v60 }
 0x42f   : > { %v1179_v50 = vsel %vm547_vm0, %v1172_v49, 0  ;;  %1163 = vmatpush.bf16.msra.mxu1 %v4187_v0 }
 0x430   : > { %1188 = vmatpush.bf16.xpose.msra.mxu2 %v1179_v50  ;;  %v1171_v63 = vpack.c.bf16 %v1101_v62, %v1099_v61 }
 0x433   : > { %1164 = vmatpush.bf16.msra.mxu1 %v4186_v2  ;;  %v4192_v2 = vld [vmem:[#allocation10] sm:$0xff] }
 0x43e   : > { %3722 = vmatmul.msk.bf16.vlgmr.msrb.gmra.mxu1 %vm547_vm0, %v1001_v3  ;;  %v4191_v3 = vld [vmem:[#allocation8 + $0x8] sm:$0xff] }
 0x43f   : > { %1319 = vmatpush.bf16.msrb.mxu1 %v4191_v3  ;;  %v4197_v3 = vld [vmem:[#allocation8 + $0x18] sm:$0xff] }
 0x443   : > { %1320 = vmatpush.bf16.msrb.mxu1 %v4190_v4  ;;  %v4196_v4 = vld [vmem:[#allocation8 + $0x10] sm:$0xff] }
 0x44e   : > { %3752 = vmatmul.msk.bf16.vlgmr.msra.gmra.mxu1 %vm547_vm0, %v5327_v22  ;;  %v3759_v22 = vld [vmem:[%s5240_s1 + $0x20] sm:$0xff] }
 0x44f   : > { %1455 = vmatpush.bf16.msra.mxu1 %v4195_v6 }
 0x453   : > { %1456 = vmatpush.bf16.msra.mxu1 %v4194_v27 }
 0x4ab   : > { %v5351_v5 = vpop.f32.mrf.mxu1 }
 0x4b3   : > { %v5355_v10 = vpop.f32.mrf.mxu1 }
 0x4bb   : > { %v1020_v13 = vpop.f32.mrf.mxu1 }
 0x4bc   : > { %v1021_v14 = vadd.f32 %v1020_v13, %v5285_v24 }
 0x4be   : > { %v1026_v17 = vadd.f32 %v5358_v12, %v1021_v14 }
 0x4c0   : > { %v1028_v18 = vsel %vm660_vm1, %v1026_v17, -inf }
 0x4c1   : > { %1029 = vmax.xlane.f32.xlu2 %v1028_v18 }
 0x4c3   : > { %v1022_v19 = vpop.f32.mrf.mxu1 }
 0x4c4   : > { %v1023_v20 = vadd.f32 %v1022_v19, %v5294_v30 }
 0x4c6   : > { %v1027_v21 = vadd.f32 %v5358_v12, %v1023_v20 }
 0x4c8   : > { %v1031_v23 = vsel %vm660_vm1, %v1027_v21, -inf }
 0x4c9   : > { %1032 = vmax.xlane.f32.xlu0 %v1031_v23 }
 0x4cb   : > { %v1166_v28 = vpop.f32.mrf.mxu1 }
 0x534   : > { %v1030_v31 = vpop.xlane.xlu2 %1029 }
 0x535   : > { %v1034_v32 = vsub.f32 %v1026_v17, %v1030_v31 }
 0x537   : > { %v1036_v34 = vmul.f32 1.442695, %v1034_v32 }
 0x539   : > { %4495 = vpow2.f32 %v1036_v34  ;;  %v1168_v34 = vpop.f32.mrf.mxu1 }
 0x53c   : > { %v1033_v25 = vpop.xlane.xlu0 %1032 }
 0x53d   : > { %v1035_v38 = vsub.f32 %v1027_v21, %v1033_v25  ;;  %v3760_v21 = vld [vmem:[%s5240_s1 + $0x28] sm:$0xff] }
 0x53e   : > { %v5395_v23 = vpack.c.bf16 %v3760_v21, %v3759_v22 }
 0x53f   : > { %v4496_v39 = vpop.eup %4495  ;;  %v1038_v40 = vmul.f32 1.442695, %v1035_v38 }
 0x540   : > { %v1040_v41 = vsel %vm660_vm1, %v4496_v39, 0.0  ;;  %3778 = vmatmul.msk.bf16.vlgmr.msrb.gmra.mxu1 %vm547_vm0, %v5395_v23  ;;  %3769 = vmatmul.msk.bf16.vlgmr.msrb.gmra.mxu0 %vm547_vm0, %v5395_v23 }
 0x541   : > { %4497 = vpow2.f32 %v1038_v40  ;;  %1041 = vadd.xlane.f32.xlu1 %v1040_v41 }
 0x547   : > { %v4498_v42 = vpop.eup %4497 }
 0x548   : > { %v1043_v43 = vsel %vm660_vm1, %v4498_v42, 0.0 }
 0x549   : > { %1044 = vadd.xlane.f32.xlu2 %v1043_v43 }
 0x550   : > { %3798 = vmatmul.msk.bf16.vlgmr.msra.gmra.mxu1 %vm547_vm0, %v5395_v23 }
 0x5b4   : > { %v1042_v51 = vpop.xlane.xlu1 %1041 }
 0x5b5   : > { %4499 = vrcp.f32 %v1042_v51 }
 0x5bb   : > { %v4500_v53 = vpop.eup %4499 }
 0x5bc   : > { %v1045_v52 = vpop.xlane.xlu2 %1044  ;;  %v1048_v55 = vmul.f32 %v4500_v53, %v4496_v39 }
 0x5bd   : > { %4501 = vrcp.f32 %v1045_v52  ;;  %v1322_v43 = vpop.f32.mrf.mxu1 }
 0x5be   : > { %v1323_v45 = vadd.f32 %v4437_v44, %v1322_v43 }
 0x5c3   : > { %v4502_v54 = vpop.eup %4501 }
 0x5c4   : > { %v1049_v56 = vmul.f32 %v4502_v54, %v4498_v42 }
 0x5c5   : > { %v1324_v46 = vpop.f32.mrf.mxu1 }
 0x5c6   : > { %v1050_v58 = vpack.c.bf16 %v1049_v56, %v1048_v55  ;;  %v1325_v47 = vadd.f32 %v4437_v44, %v1324_v46  ;;  %v1288_v56 = vpop.f32.mrf.mxu0 }
 0x5c8   : > { %3723 = vmatmul.msk.bf16.vlgmr.msrb.gmra.mxu2 %vm660_vm1, %v1050_v58  ;;  %v1362_v48 = vpack.c.bf16 %v1325_v47, %v1323_v45  ;;  %v4438_v58 = vld [vmem:[#allocation7] ss:$0 sm:$0xff] }
 0x5c9   : > { %v1289_v60 = vadd.f32 %v4438_v58, %v1288_v56  ;;  %v4442_v56 = vld [vmem:[#allocation7 + $0x1] ss:$0 sm:$0xff] }
 0x5ca   : > { %v1369_v49 = vsel %vm547_vm0, %v1362_v48, 0 }
 0x5ce   : > { %v1290_v59 = vpop.f32.mrf.mxu0 }
 0x5cf   : > { %v1291_v61 = vadd.f32 %v4438_v58, %v1290_v59 }
 0x5d1   : > { %v1361_v62 = vpack.c.bf16 %v1291_v61, %v1289_v60  ;;  %v4199_v61 = vld [vmem:[#allocation10 + $0x18] sm:$0xff] }
 0x5d8   : > { %3755 = vmatmul.msk.bf16.vlgmr.msra.gmra.mxu2 %vm547_vm0, %v1171_v63  ;;  %v4193_v63 = vld [vmem:[#allocation10 + $0x8] sm:$0xff] }
 0x5d9   : > { %1353 = vmatpush.bf16.msrb.mxu2 %v4193_v63  ;;  %v4198_v63 = vld [vmem:[#allocation10 + $0x10] sm:$0xff] }
 0x5dd   : > { %1354 = vmatpush.bf16.msrb.mxu2 %v4192_v2  ;;  %v4203_v2 = vld [vmem:[#allocation8 + $0x8] sm:$0xff] }
 0x5e1   : > { %1489 = vmatpush.bf16.msra.mxu2 %v4197_v3  ;;  %v4202_v3 = vld [vmem:[#allocation8] sm:$0xff] }
 0x5e5   : > { %1490 = vmatpush.bf16.msra.mxu2 %v4196_v4 }
 0x5e8   : > { %3787 = vmatmul.msk.bf16.vlgmr.msrb.gmra.mxu2 %vm547_vm0, %v5395_v23 }
 0x5f8   : > { %3808 = vmatmul.msk.bf16.vlgmr.msra.gmra.mxu2 %vm547_vm0, %v5395_v23 }
 0x64b   : > { %v5381_v1 = vpop.f32.mrf.mxu2 }
 0x653   : > { %v5385_v7 = vpop.f32.mrf.mxu2 }
 0x65b   : > { %v1190_v8 = vpop.f32.mrf.mxu2 }
 0x65c   : > { %v1191_v9 = vadd.f32 %v5321_v16, %v1190_v8 }
 0x65e   : > { %v1195_v13 = vadd.f32 %v5358_v12, %v1191_v9  ;;  %v5419_v9 = vld [vmem:[%s5263_s7 + $0x2] ss:$0 sm:$0xff] }
 0x660   : > { %v1197_v14 = vsel %vm660_vm1, %v1195_v13, -inf }
 0x661   : > { %1198 = vmax.xlane.f32.xlu0 %v1197_v14 }
 0x663   : > { %v1192_v17 = vpop.f32.mrf.mxu2 }
 0x664   : > { %v1193_v18 = vadd.f32 %v5331_v26, %v1192_v17 }
 0x666   : > { %v1196_v19 = vadd.f32 %v5358_v12, %v1193_v18  ;;  %v4436_v12 = vld [vmem:[%s6014_s27 + $0x1] ss:$0 sm:$0xff] }
 0x667   : > { %v1167_v32 = vadd.f32 %v4436_v12, %v1166_v28  ;;  %v1169_v35 = vadd.f32 %v4436_v12, %v1168_v34 }
 0x668   : > { %v1200_v20 = vsel %vm660_vm1, %v1196_v19, -inf }
 0x669   : > { %1201 = vmax.xlane.f32.xlu1 %v1200_v20  ;;  %v1220_v36 = vpack.c.bf16 %v1169_v35, %v1167_v32 }
 0x66b   : > { %1231 = vmatpush.bf16.msra.mxu3 %v1220_v36  ;;  %v1356_v12 = vpop.f32.mrf.mxu2 }
 0x66f   : > { %1378 = vmatpush.bf16.xpose.msrb.mxu3 %v1369_v49 }
 0x673   : > { %v1358_v34 = vpop.f32.mrf.mxu2 }
 0x6d4   : > { %v1199_v29 = vpop.xlane.xlu0 %1198 }
 0x6d5   : > { %v1203_v31 = vsub.f32 %v1195_v13, %v1199_v29 }
 0x6d7   : > { %v1205_v33 = vmul.f32 1.442695, %v1203_v31 }
 0x6d9   : > { %4503 = vpow2.f32 %v1205_v33 }
 0x6dc   : > { %v1202_v37 = vpop.xlane.xlu1 %1201 }
 0x6dd   : > { %v1204_v25 = vsub.f32 %v1196_v19, %v1202_v37 }
 0x6df   : > { %v4504_v38 = vpop.eup %4503  ;;  %v1207_v39 = vmul.f32 1.442695, %v1204_v25 }
 0x6e0   : > { %v1209_v40 = vsel %vm660_vm1, %v4504_v38, 0.0 }
 0x6e1   : > { %4505 = vpow2.f32 %v1207_v39  ;;  %1210 = vadd.xlane.f32.xlu2 %v1209_v40 }
 0x6e7   : > { %v4506_v41 = vpop.eup %4505 }
 0x6e8   : > { %v1212_v42 = vsel %vm660_vm1, %v4506_v41, 0.0 }
 0x6e9   : > { %1213 = vadd.xlane.f32.xlu0 %v1212_v42  ;;  %v4441_v42 = vld [vmem:[%s6013_s3 + $0x1] ss:$0 sm:$0xff] }
 0x754   : > { %v1211_v50 = vpop.xlane.xlu2 %1210 }
 0x755   : > { %4507 = vrcp.f32 %v1211_v50 }
 0x75b   : > { %v4508_v52 = vpop.eup %4507 }
 0x75c   : > { %v1214_v51 = vpop.xlane.xlu0 %1213  ;;  %v1217_v54 = vmul.f32 %v4508_v52, %v4504_v38 }
 0x75d   : > { %4509 = vrcp.f32 %v1214_v51 }
 0x763   : > { %v4510_v53 = vpop.eup %4509 }
 0x764   : > { %v1218_v55 = vmul.f32 %v4510_v53, %v4506_v41  ;;  %v1492_v41 = vpop.f32.mrf.mxu2 }
 0x765   : > { %v1493_v44 = vadd.f32 %v4441_v42, %v1492_v41  ;;  %v4444_v41 = vld [vmem:[%s6013_s3] ss:$0 sm:$0xff] }
 0x766   : > { %v1219_v57 = vpack.c.bf16 %v1218_v55, %v1217_v54  ;;  %v1458_v54 = vpop.f32.mrf.mxu1 }
 0x767   : > { %v1459_v58 = vadd.f32 %v4442_v56, %v1458_v54 }
 0x768   : > { %3756 = vmatmul.msk.bf16.vlgmr.msra.gmra.mxu3 %vm660_vm1, %v1219_v57 }
 0x769   : > { %1523 = vmatpush.bf16.msra.mxu3 %v4199_v61 }
 0x76c   : > { %v1494_v43 = vpop.f32.mrf.mxu2 }
 0x76d   : > { %v1495_v45 = vadd.f32 %v4441_v42, %v1494_v43  ;;  %1524 = vmatpush.bf16.msra.mxu3 %v4198_v63  ;;  %v4204_v63 = vld [vmem:[#allocation10] sm:$0xff] }
 0x76e   : > { %v1460_v57 = vpop.f32.mrf.mxu1 }
 0x76f   : > { %v1532_v46 = vpack.c.bf16 %v1495_v45, %v1493_v44  ;;  %v1461_v59 = vadd.f32 %v4442_v56, %v1460_v57 }
 0x771   : > { %v1539_v47 = vsel %vm547_vm0, %v1532_v46, 0  ;;  %v1531_v60 = vpack.c.bf16 %v1461_v59, %v1459_v58 }
 0x778   : > { %3788 = vmatmul.msk.bf16.vlgmr.msrb.gmra.mxu3 %vm547_vm0, %v1361_v62 }
 0x779   : > { %1679 = vmatpush.bf16.msrb.mxu3 %v4203_v2  ;;  %v4209_v2 = vld [vmem:[#allocation8 + $0x18] sm:$0xff] }
 0x77d   : > { %1680 = vmatpush.bf16.msrb.mxu3 %v4202_v3  ;;  %v4208_v3 = vld [vmem:[#allocation8 + $0x10] sm:$0xff] }
 0x788   : > { %3818 = vmatmul.msk.bf16.vlgmr.msra.gmra.mxu3 %vm547_vm0, %v5395_v23 }
 0x7eb   : > { %v5412_v0 = vpop.f32.mrf.mxu3 }
 0x7f3   : > { %v5416_v8 = vpop.f32.mrf.mxu3 }
 0x7fb   : > { %v1380_v13 = vpop.f32.mrf.mxu3 }
 0x7fc   : > { %v1381_v14 = vadd.f32 %v1380_v13, %v5285_v24 }
 0x7fe   : > { %v1386_v17 = vadd.f32 %v5419_v9, %v1381_v14  ;;  %v3825_v14 = vld [vmem:[%s5240_s1 + $0x30] sm:$0xff] }
 0x800   : > { %v1388_v18 = vsel %vm660_vm1, %v1386_v17, -inf }
 0x801   : > { %1389 = vmax.xlane.f32.xlu1 %v1388_v18 }
 0x803   : > { %v1382_v19 = vpop.f32.mrf.mxu3 }
 0x804   : > { %v1383_v20 = vadd.f32 %v1382_v19, %v5294_v30  ;;  %v4440_v30 = vld [vmem:[%s6014_s27] ss:$0 sm:$0xff] }
 0x805   : > { %v1357_v32 = vadd.f32 %v4440_v30, %v1356_v12  ;;  %v1359_v35 = vadd.f32 %v4440_v30, %v1358_v34 }
 0x806   : > { %v1387_v22 = vadd.f32 %v5419_v9, %v1383_v20 }
 0x807   : > { %v1411_v38 = vpack.c.bf16 %v1359_v35, %v1357_v32 }
 0x808   : > { %v1391_v21 = vsel %vm660_vm1, %v1387_v22, -inf }
 0x809   : > { %1392 = vmax.xlane.f32.xlu2 %v1391_v21  ;;  %1422 = vmatpush.bf16.msra.mxu0 %v1411_v38 }
 0x80d   : > { %1548 = vmatpush.bf16.xpose.msrb.mxu0 %v1539_v47 }
 0x874   : > { %v1390_v24 = vpop.xlane.xlu1 %1389 }
 0x875   : > { %v1394_v28 = vsub.f32 %v1386_v17, %v1390_v24  ;;  %v3826_v17 = vld [vmem:[%s5240_s1 + $0x38] sm:$0xff]  ;;  %v4201_v24 = vld [vmem:[#allocation5 + $0x8] sm:$0xff] }
 0x876   : > { %v5452_v20 = vpack.c.bf16 %v3826_v17, %v3825_v14  ;;  %1645 = vmatpush.bf16.msrb.mxu2 %v4201_v24  ;;  %v5480_v14 = vld [vmem:[%s5256_s26] sm:$0xff] }
 0x877   : > { %v1396_v29 = vmul.f32 1.442695, %v1394_v28  ;;  %v5483_v17 = vld [vmem:[%s5263_s7 + $0x3] ss:$0 sm:$0xff] }
 0x878   : > { %3844 = vmatmul.msk.bf16.vlgmr.msrb.gmra.mxu3 %vm547_vm0, %v5452_v20 }
 0x879   : > { %4511 = vpow2.f32 %v1396_v29  ;;  %v1526_v29 = vpop.f32.mrf.mxu3 }
 0x87c   : > { %v1393_v31 = vpop.xlane.xlu2 %1392 }
 0x87d   : > { %v1395_v33 = vsub.f32 %v1387_v22, %v1393_v31 }
 0x87f   : > { %v4512_v36 = vpop.eup %4511  ;;  %v1398_v37 = vmul.f32 1.442695, %v1395_v33 }
 0x880   : > { %v1400_v25 = vsel %vm660_vm1, %v4512_v36, 0.0 }
 0x881   : > { %4513 = vpow2.f32 %v1398_v37  ;;  %1401 = vadd.xlane.f32.xlu0 %v1400_v25  ;;  %v1528_v33 = vpop.f32.mrf.mxu3 }
 0x887   : > { %v4514_v39 = vpop.eup %4513 }
 0x888   : > { %v1403_v40 = vsel %vm660_vm1, %v4514_v39, 0.0 }
 0x889   : > { %1404 = vadd.xlane.f32.xlu1 %v1403_v40 }
 0x8f4   : > { %v1402_v48 = vpop.xlane.xlu0 %1401 }
 0x8f5   : > { %4515 = vrcp.f32 %v1402_v48 }
 0x8fb   : > { %v4516_v50 = vpop.eup %4515  ;;  %v1682_v40 = vpop.f32.mrf.mxu3 }
 0x8fc   : > { %v1405_v49 = vpop.xlane.xlu1 %1404  ;;  %v1408_v52 = vmul.f32 %v4516_v50, %v4512_v36  ;;  %v1683_v43 = vadd.f32 %v4444_v41, %v1682_v40 }
 0x8fd   : > { %4517 = vrcp.f32 %v1405_v49 }
 0x903   : > { %v4518_v51 = vpop.eup %4517  ;;  %v1684_v42 = vpop.f32.mrf.mxu3 }
 0x904   : > { %v1409_v53 = vmul.f32 %v4518_v51, %v4514_v39  ;;  %v1685_v44 = vadd.f32 %v4444_v41, %v1684_v42 }
 0x906   : > { %v1410_v55 = vpack.c.bf16 %v1409_v53, %v1408_v52  ;;  %v1722_v45 = vpack.c.bf16 %v1685_v44, %v1683_v43  ;;  %v4448_v43 = vld [vmem:[%s6013_s3 + $0x1] ss:$0 sm:$0xff] }
 0x908   : > { %3789 = vmatmul.msk.bf16.vlgmr.msra.gmra.mxu0 %vm660_vm1, %v1410_v55  ;;  %v1729_v46 = vsel %vm547_vm0, %v1722_v45, 0  ;;  %v4445_v55 = vld [vmem:[#allocation7] ss:$0 sm:$0xff] }
 0x918   : > { %3821 = vmatmul.msk.bf16.vlgmr.msrb.gmra.mxu0 %vm547_vm0, %v1531_v60  ;;  %v4205_v60 = vld [vmem:[#allocation10 + $0x8] sm:$0xff] }
 0x919   : > { %1713 = vmatpush.bf16.msra.mxu0 %v4205_v60 }
 0x91d   : > { %1714 = vmatpush.bf16.msra.mxu0 %v4204_v63 }
 0x921   : > { %1849 = vmatpush.bf16.msrb.mxu0 %v4209_v2  ;;  %v4211_v2 = vld [vmem:[#allocation10 + $0x18] sm:$0xff] }
 0x925   : > { %1850 = vmatpush.bf16.msrb.mxu0 %v4208_v3 }
 0x928   : > { %3853 = vmatmul.msk.bf16.vlgmr.msra.gmra.mxu0 %vm547_vm0, %v5452_v20 }
 0x938   : > { %3874 = vmatmul.msk.bf16.vlgmr.msrb.gmra.mxu0 %vm547_vm0, %v5452_v20 }
 0x985   : > { %v5442_v62 = vpop.f32.mrf.mxu0 }
 0x98d   : > { %v5446_v4 = vpop.f32.mrf.mxu0 }
 0x995   : > { %v1550_v13 = vpop.f32.mrf.mxu0 }
 0x996   : > { %v1551_v18 = vadd.f32 %v5321_v16, %v1550_v13  ;;  %v4200_v16 = vld [vmem:[#allocation5] sm:$0xff] }
 0x997   : > { %1646 = vmatpush.bf16.msrb.mxu2 %v4200_v16 }
 0x998   : > { %v1555_v19 = vadd.f32 %v5419_v9, %v1551_v18 }
 0x99a   : > { %v1557_v22 = vsel %vm660_vm1, %v1555_v19, -inf  ;;  %3835 = vmatmul.msk.bf16.vlgmr.msrb.gmra.mxu2 %vm547_vm0, %v5452_v20 }
 0x99b   : > { %1558 = vmax.xlane.f32.xlu2 %v1557_v22 }
 0x99d   : > { %v1552_v21 = vpop.f32.mrf.mxu0 }
 0x99e   : > { %v1553_v23 = vadd.f32 %v5331_v26, %v1552_v21  ;;  %v4443_v26 = vld [vmem:[%s6014_s27 + $0x1] ss:$0 sm:$0xff] }
 0x99f   : > { %v1527_v31 = vadd.f32 %v4443_v26, %v1526_v29  ;;  %v1529_v34 = vadd.f32 %v4443_v26, %v1528_v33 }
 0x9a0   : > { %v1556_v6 = vadd.f32 %v5419_v9, %v1553_v23  ;;  %v5489_v23 = vld [vmem:[%s5256_s26 + $0x8] sm:$0xff] }
 0x9a1   : > { %v1580_v25 = vpack.c.bf16 %v1529_v34, %v1527_v31 }
 0x9a2   : > { %v1560_v27 = vsel %vm660_vm1, %v1556_v6, -inf }
 0x9a3   : > { %1561 = vmax.xlane.f32.xlu0 %v1560_v27  ;;  %1591 = vmatpush.bf16.msrb.mxu1 %v1580_v25 }
 0x9a5   : > { %v1716_v29 = vpop.f32.mrf.mxu0 }
 0x9a7   : > { %1738 = vmatpush.bf16.xpose.msra.mxu1 %v1729_v46 }
 0x9ad   : > { %v1718_v33 = vpop.f32.mrf.mxu0 }
 0x9b5   : > { %v1852_v42 = vpop.f32.mrf.mxu0 }
 0x9b6   : > { %v1853_v45 = vadd.f32 %v4448_v43, %v1852_v42 }
 0x9bd   : > { %v1854_v44 = vpop.f32.mrf.mxu0 }
 0x9be   : > { %v1855_v46 = vadd.f32 %v4448_v43, %v1854_v44 }
 0xa0e   : > { %v1559_v28 = vpop.xlane.xlu2 %1558 }
 0xa0f   : > { %v1563_v12 = vsub.f32 %v1555_v19, %v1559_v28  ;;  %v4207_v28 = vld [vmem:[#allocation5 + $0x18] sm:$0xff] }
 0xa10   : > { %1815 = vmatpush.bf16.msra.mxu3 %v4207_v28 }
 0xa11   : > { %v1565_v30 = vmul.f32 1.442695, %v1563_v12  ;;  %v4206_v12 = vld [vmem:[#allocation5 + $0x10] sm:$0xff] }
 0xa13   : > { %4519 = vpow2.f32 %v1565_v30  ;;  %v4447_v30 = vld [vmem:[%s6014_s27] ss:$0 sm:$0xff] }
 0xa14   : > { %1816 = vmatpush.bf16.msra.mxu3 %v4206_v12  ;;  %v1717_v31 = vadd.f32 %v4447_v30, %v1716_v29  ;;  %v1719_v34 = vadd.f32 %v4447_v30, %v1718_v33  ;;  %v5522_v12 = vld [vmem:[%s5256_s26 + $0x18] sm:$0xff]  ;;  %v4213_v33 = vld [vmem:[#allocation5 + $0x8] sm:$0xff] }
 0xa15   : > { %2005 = vmatpush.bf16.msra.mxu0 %v4213_v33 }
 0xa16   : > { %v1562_v9 = vpop.xlane.xlu0 %1561 }
 0xa17   : > { %v1564_v32 = vsub.f32 %v1556_v6, %v1562_v9  ;;  %3864 = vmatmul.msk.bf16.vlgmr.msra.gmra.mxu3 %vm547_vm0, %v5452_v20 }
 0xa19   : > { %v4520_v35 = vpop.eup %4519  ;;  %v1567_v36 = vmul.f32 1.442695, %v1564_v32 }
 0xa1a   : > { %v1569_v37 = vsel %vm660_vm1, %v4520_v35, 0.0 }
 0xa1b   : > { %4521 = vpow2.f32 %v1567_v36  ;;  %1570 = vadd.xlane.f32.xlu1 %v1569_v37 }
 0xa1d   : > { %v1648_v53 = vpop.f32.mrf.mxu2 }
 0xa1e   : > { %v1649_v57 = vadd.f32 %v4445_v55, %v1648_v53 }
 0xa21   : > { %v4522_v38 = vpop.eup %4521 }
 0xa22   : > { %v1572_v39 = vsel %vm660_vm1, %v4522_v38, 0.0 }
 0xa23   : > { %1573 = vadd.xlane.f32.xlu2 %v1572_v39 }
 0xa25   : > { %v1650_v56 = vpop.f32.mrf.mxu2 }
 0xa26   : > { %v1651_v58 = vadd.f32 %v4445_v55, %v1650_v56 }
 0xa28   : > { %v1721_v59 = vpack.c.bf16 %v1651_v58, %v1649_v57  ;;  %v4449_v57 = vld [vmem:[#allocation7 + $0x1] ss:$0 sm:$0xff] }
 0xa8e   : > { %v1571_v47 = vpop.xlane.xlu1 %1570 }
 0xa8f   : > { %4523 = vrcp.f32 %v1571_v47  ;;  %v1892_v47 = vpack.c.bf16 %v1855_v46, %v1853_v45 }
 0xa95   : > { %v4524_v49 = vpop.eup %4523 }
 0xa96   : > { %v1574_v48 = vpop.xlane.xlu2 %1573  ;;  %v1577_v51 = vmul.f32 %v4524_v49, %v4520_v35  ;;  %v1771_v35 = vpack.c.bf16 %v1719_v34, %v1717_v31  ;;  %v3892_v31 = vld [vmem:[%s5240_s1 + $0x48] sm:$0xff]  ;;  %v4212_v34 = vld [vmem:[#allocation5] sm:$0xff] }
 0xa97   : > { %4525 = vrcp.f32 %v1574_v48  ;;  %v1899_v48 = vsel %vm547_vm0, %v1892_v47, 0  ;;  %2006 = vmatpush.bf16.msra.mxu0 %v4212_v34 }
 0xa98   : > { %1782 = vmatpush.bf16.msra.mxu2 %v1771_v35 }
 0xa9a   : > { %v1818_v55 = vpop.f32.mrf.mxu3 }
 0xa9c   : > { %1908 = vmatpush.bf16.xpose.msrb.mxu2 %v1899_v48 }
 0xa9d   : > { %v4526_v50 = vpop.eup %4525 }
 0xa9e   : > { %v1578_v52 = vmul.f32 %v4526_v50, %v4522_v38 }
 0xaa0   : > { %v1579_v54 = vpack.c.bf16 %v1578_v52, %v1577_v51 }
 0xaa2   : > { %3822 = vmatmul.msk.bf16.vlgmr.msrb.gmra.mxu1 %vm660_vm1, %v1579_v54  ;;  %v1820_v58 = vpop.f32.mrf.mxu3 }
 0xaa3   : > { %v1821_v60 = vadd.f32 %v4449_v57, %v1820_v58  ;;  %1883 = vmatpush.bf16.msrb.mxu1 %v4211_v2 }
 0xab2   : > { %3854 = vmatmul.msk.bf16.vlgmr.msra.gmra.mxu1 %vm547_vm0, %v1721_v59  ;;  %v1819_v59 = vadd.f32 %v4449_v57, %v1818_v55 }
 0xab4   : > { %v1891_v63 = vpack.c.bf16 %v1821_v60, %v1819_v59 }
 0xb1f   : > { %v5473_v61 = vpop.f32.mrf.mxu1 }
 0xb27   : > { %v5477_v13 = vpop.f32.mrf.mxu1 }
 0xb2f   : > { %v1740_v18 = vpop.f32.mrf.mxu1 }
 0xb30   : > { %v1741_v19 = vadd.f32 %v1740_v18, %v5480_v14  ;;  %v4210_v18 = vld [vmem:[#allocation10 + $0x10] sm:$0xff] }
 0xb31   : > { %1884 = vmatpush.bf16.msrb.mxu1 %v4210_v18 }
 0xb32   : > { %v1746_v22 = vadd.f32 %v5483_v17, %v1741_v19  ;;  %v4215_v19 = vld [vmem:[#allocation8 + $0x8] sm:$0xff] }
 0xb34   : > { %v1748_v21 = vsel %vm660_vm1, %v1746_v22, -inf  ;;  %3884 = vmatmul.msk.bf16.vlgmr.msrb.gmra.mxu1 %vm547_vm0, %v5452_v20 }
 0xb35   : > { %1749 = vmax.xlane.f32.xlu0 %v1748_v21  ;;  %2039 = vmatpush.bf16.msra.mxu1 %v4215_v19  ;;  %v4452_v19 = vld [vmem:[#allocation7] ss:$0 sm:$0xff] }
 0xb37   : > { %v1742_v6 = vpop.f32.mrf.mxu1 }
 0xb38   : > { %v1743_v27 = vadd.f32 %v1742_v6, %v5489_v23  ;;  %v5516_v6 = vld [vmem:[%s5256_s26 + $0x10] sm:$0xff] }
 0xb3a   : > { %v1747_v24 = vadd.f32 %v5483_v17, %v1743_v27 }
 0xb3c   : > { %v1751_v16 = vsel %vm660_vm1, %v1747_v24, -inf }
 0xb3d   : > { %1752 = vmax.xlane.f32.xlu1 %v1751_v16 }
 0xba8   : > { %v1750_v26 = vpop.xlane.xlu0 %1749 }
 0xba9   : > { %v1754_v9 = vsub.f32 %v1746_v22, %v1750_v26  ;;  %v4214_v22 = vld [vmem:[#allocation8] sm:$0xff] }
 0xbaa   : > { %2040 = vmatpush.bf16.msra.mxu1 %v4214_v22 }
 0xbab   : > { %v1756_v32 = vmul.f32 1.442695, %v1754_v9  ;;  %v3891_v9 = vld [vmem:[%s5240_s1 + $0x40] sm:$0xff] }
 0xbad   : > { %4527 = vpow2.f32 %v1756_v32  ;;  %v5529_v32 = vpack.c.bf16 %v3892_v31, %v3891_v9  ;;  %v5553_v31 = vld [vmem:[%s5263_s7 + $0x4] ss:$0 sm:$0xff] }
 0xbaf   : > { %3910 = vmatmul.msk.bf16.vlgmr.msra.gmra.mxu1 %vm547_vm0, %v5529_v32  ;;  %3901 = vmatmul.msk.bf16.vlgmr.msra.gmra.mxu0 %vm547_vm0, %v5529_v32 }
 0xbb0   : > { %v1753_v36 = vpop.xlane.xlu1 %1752 }
 0xbb1   : > { %v1755_v37 = vsub.f32 %v1747_v24, %v1753_v36  ;;  %v1886_v35 = vpop.f32.mrf.mxu1 }
 0xbb3   : > { %v4528_v25 = vpop.eup %4527  ;;  %v1758_v38 = vmul.f32 1.442695, %v1755_v37 }
 0xbb4   : > { %v1760_v39 = vsel %vm660_vm1, %v4528_v25, 0.0 }
 0xbb5   : > { %4529 = vpow2.f32 %v1758_v38  ;;  %1761 = vadd.xlane.f32.xlu2 %v1760_v39 }
 0xbb9   : > { %v1888_v39 = vpop.f32.mrf.mxu1 }
 0xbbb   : > { %v4530_v40 = vpop.eup %4529 }
 0xbbc   : > { %v1763_v41 = vsel %vm660_vm1, %v4530_v40, 0.0 }
 0xbbd   : > { %1764 = vadd.xlane.f32.xlu0 %v1763_v41 }
 0xc28   : > { %v1762_v49 = vpop.xlane.xlu2 %1761 }
 0xc29   : > { %4531 = vrcp.f32 %v1762_v49 }
 0xc2c   : > { %v2042_v49 = vpop.f32.mrf.mxu1  ;;  %v2008_v2 = vpop.f32.mrf.mxu0 }
 0xc2f   : > { %v4532_v51 = vpop.eup %4531 }
 0xc30   : > { %v1765_v50 = vpop.xlane.xlu0 %1764  ;;  %v1768_v53 = vmul.f32 %v4532_v51, %v4528_v25 }
 0xc31   : > { %4533 = vrcp.f32 %v1765_v50  ;;  %v4451_v50 = vld [vmem:[%s6013_s3] ss:$0 sm:$0xff] }
 0xc32   : > { %v2043_v51 = vadd.f32 %v4451_v50, %v2042_v49 }
 0xc34   : > { %v2010_v22 = vpop.f32.mrf.mxu0 }
 0xc37   : > { %v4534_v52 = vpop.eup %4533 }
 0xc38   : > { %v1769_v54 = vmul.f32 %v4534_v52, %v4530_v40  ;;  %v2044_v52 = vpop.f32.mrf.mxu1 }
 0xc3a   : > { %v1770_v56 = vpack.c.bf16 %v1769_v54, %v1768_v53  ;;  %v2045_v53 = vadd.f32 %v4451_v50, %v2044_v52 }
 0xc3c   : > { %3855 = vmatmul.msk.bf16.vlgmr.msra.gmra.mxu2 %vm660_vm1, %v1770_v56  ;;  %v2082_v54 = vpack.c.bf16 %v2045_v53, %v2043_v51 }
 0xc3e   : > { %v2089_v55 = vsel %vm547_vm0, %v2082_v54, 0 }
 0xc4c   : > { %3887 = vmatmul.msk.bf16.vlgmr.msrb.gmra.mxu2 %vm547_vm0, %v1891_v63 }
 0xcbf   : > { %v5509_v3 = vpop.f32.mrf.mxu2 }
 0xcc7   : > { %v5513_v21 = vpop.f32.mrf.mxu2 }
 0xccf   : > { %v1910_v27 = vpop.f32.mrf.mxu2 }
 0xcd0   : > { %v1911_v24 = vadd.f32 %v5516_v6, %v1910_v27  ;;  %v2009_v27 = vadd.f32 %v4452_v19, %v2008_v2 }
 0xcd2   : > { %v1915_v16 = vadd.f32 %v5483_v17, %v1911_v24  ;;  %v2011_v24 = vadd.f32 %v4452_v19, %v2010_v22 }
 0xcd4   : > { %v1917_v28 = vsel %vm660_vm1, %v1915_v16, -inf }
 0xcd5   : > { %1918 = vmax.xlane.f32.xlu1 %v1917_v28  ;;  %v4217_v28 = vld [vmem:[#allocation10 + $0x8] sm:$0xff] }
 0xcd6   : > { %2073 = vmatpush.bf16.msra.mxu2 %v4217_v28 }
 0xcd7   : > { %v1912_v29 = vpop.f32.mrf.mxu2 }
 0xcd8   : > { %v1913_v30 = vadd.f32 %v5522_v12, %v1912_v29 }
 0xcda   : > { %v1916_v20 = vadd.f32 %v5483_v17, %v1913_v30  ;;  %v4450_v17 = vld [vmem:[%s6014_s27 + $0x1] ss:$0 sm:$0xff]  ;;  %v4216_v30 = vld [vmem:[#allocation10] sm:$0xff] }
 0xcdb   : > { %v1887_v25 = vadd.f32 %v4450_v17, %v1886_v35  ;;  %v1889_v40 = vadd.f32 %v4450_v17, %v1888_v39  ;;  %2074 = vmatpush.bf16.msra.mxu2 %v4216_v30  ;;  %v4219_v39 = vld [vmem:[#allocation5 + $0x18] sm:$0xff] }
 0xcdc   : > { %v1920_v26 = vsel %vm660_vm1, %v1916_v20, -inf  ;;  %2175 = vmatpush.bf16.msrb.mxu1 %v4219_v39  ;;  %v4226_v39 = vld [vmem:[#allocation8] sm:$0xff] }
 0xcdd   : > { %1921 = vmax.xlane.f32.xlu2 %v1920_v26  ;;  %v1940_v41 = vpack.c.bf16 %v1889_v40, %v1887_v25  ;;  %v4220_v26 = vld [vmem:[#allocation8 + $0x10] sm:$0xff] }
 0xcde   : > { %3919 = vmatmul.msk.bf16.vlgmr.msra.gmra.mxu2 %vm547_vm0, %v5529_v32  ;;  %v4218_v40 = vld [vmem:[#allocation5 + $0x10] sm:$0xff] }
 0xcdf   : > { %1951 = vmatpush.bf16.msrb.mxu3 %v1940_v41 }
 0xce0   : > { %2176 = vmatpush.bf16.msrb.mxu1 %v4218_v40 }
 0xce3   : > { %2098 = vmatpush.bf16.xpose.msra.mxu3 %v2089_v55  ;;  %3930 = vmatmul.msk.bf16.vlgmr.msrb.gmra.mxu1 %vm547_vm0, %v5529_v32 }
 0xd48   : > { %v1919_v36 = vpop.xlane.xlu1 %1918 }
 0xd49   : > { %v1923_v37 = vsub.f32 %v1915_v16, %v1919_v36  ;;  %v2081_v16 = vpack.c.bf16 %v2011_v24, %v2009_v27 }
 0xd4b   : > { %v1925_v38 = vmul.f32 1.442695, %v1923_v37 }
 0xd4d   : > { %4535 = vpow2.f32 %v1925_v38 }
 0xd50   : > { %v1922_v42 = vpop.xlane.xlu2 %1921 }
 0xd51   : > { %v1924_v43 = vsub.f32 %v1916_v20, %v1922_v42  ;;  %v4221_v20 = vld [vmem:[#allocation8 + $0x18] sm:$0xff] }
 0xd52   : > { %2209 = vmatpush.bf16.msrb.mxu2 %v4221_v20 }
 0xd53   : > { %v4536_v44 = vpop.eup %4535  ;;  %v1927_v45 = vmul.f32 1.442695, %v1924_v43 }
 0xd54   : > { %v1929_v46 = vsel %vm660_vm1, %v4536_v44, 0.0 }
 0xd55   : > { %4537 = vpow2.f32 %v1927_v45  ;;  %1930 = vadd.xlane.f32.xlu0 %v1929_v46  ;;  %v4454_v45 = vld [vmem:[%s6014_s27] ss:$0 sm:$0xff] }
 0xd56   : > { %2210 = vmatpush.bf16.msrb.mxu2 %v4220_v26  ;;  %v4456_v26 = vld [vmem:[#allocation7 + $0x1] ss:$0 sm:$0xff] }
 0xd59   : > { %3940 = vmatmul.msk.bf16.vlgmr.msrb.gmra.mxu2 %vm547_vm0, %v5529_v32 }
 0xd5b   : > { %v4538_v47 = vpop.eup %4537 }
 0xd5c   : > { %v1932_v48 = vsel %vm660_vm1, %v4538_v47, 0.0 }
 0xd5d   : > { %1933 = vadd.xlane.f32.xlu1 %v1932_v48 }
 0xd60   : > { %v2178_v30 = vpop.f32.mrf.mxu1 }
 0xd61   : > { %v2076_v43 = vpop.f32.mrf.mxu2 }
 0xd69   : > { %v2078_v49 = vpop.f32.mrf.mxu2 }
 0xd6a   : > { %v2079_v50 = vadd.f32 %v4454_v45, %v2078_v49 }
 0xdc8   : > { %v1931_v56 = vpop.xlane.xlu0 %1930 }
 0xdc9   : > { %4539 = vrcp.f32 %v1931_v56 }
 0xdcf   : > { %v4540_v58 = vpop.eup %4539 }
 0xdd0   : > { %v1934_v57 = vpop.xlane.xlu1 %1933  ;;  %v1937_v60 = vmul.f32 %v4540_v58, %v4536_v44  ;;  %v4455_v58 = vld [vmem:[%s6013_s3 + $0x1] ss:$0 sm:$0xff] }
 0xdd1   : > { %4541 = vrcp.f32 %v1934_v57 }
 0xdd7   : > { %v4542_v59 = vpop.eup %4541 }
 0xdd8   : > { %v1938_v63 = vmul.f32 %v4542_v59, %v4538_v47  ;;  %v2077_v47 = vadd.f32 %v4454_v45, %v2076_v43  ;;  %v3958_v43 = vld [vmem:[%s5240_s1 + $0x58] sm:$0xff] }
 0xdda   : > { %v1939_v18 = vpack.c.bf16 %v1938_v63, %v1937_v60  ;;  %v2131_v54 = vpack.c.bf16 %v2079_v50, %v2077_v47 }
 0xddc   : > { %3888 = vmatmul.msk.bf16.vlgmr.msrb.gmra.mxu3 %vm660_vm1, %v1939_v18  ;;  %2142 = vmatpush.bf16.msrb.mxu0 %v2131_v54  ;;  %v2212_v57 = vpop.f32.mrf.mxu2 }
 0xddd   : > { %v2213_v60 = vadd.f32 %v4455_v58, %v2212_v57  ;;  %v4457_v57 = vld [vmem:[%s6014_s27 + $0x1] ss:$0 sm:$0xff] }
 0xde4   : > { %v2214_v59 = vpop.f32.mrf.mxu2 }
 0xde5   : > { %v2215_v63 = vadd.f32 %v4455_v58, %v2214_v59 }
 0xde7   : > { %v2252_v2 = vpack.c.bf16 %v2215_v63, %v2213_v60 }
 0xde9   : > { %v2259_v18 = vsel %vm547_vm0, %v2252_v2, 0 }
 0xdea   : > { %2268 = vmatpush.bf16.xpose.msra.mxu0 %v2259_v18 }
 0xdec   : > { %3920 = vmatmul.msk.bf16.vlgmr.msra.gmra.mxu3 %vm547_vm0, %v2081_v16 }
 0xe5f   : > { %v5546_v29 = vpop.f32.mrf.mxu3 }
 0xe67   : > { %v5550_v9 = vpop.f32.mrf.mxu3 }
 0xe6f   : > { %v2100_v33 = vpop.f32.mrf.mxu3 }
 0xe70   : > { %v2101_v34 = vadd.f32 %v2100_v33, %v5480_v14  ;;  %v2180_v33 = vpop.f32.mrf.mxu1 }
 0xe72   : > { %v2106_v35 = vadd.f32 %v5553_v31, %v2101_v34  ;;  %v2179_v34 = vadd.f32 %v4456_v26, %v2178_v30 }
 0xe74   : > { %v2108_v17 = vsel %vm660_vm1, %v2106_v35, -inf }
 0xe75   : > { %2109 = vmax.xlane.f32.xlu2 %v2108_v17 }
 0xe77   : > { %v2102_v36 = vpop.f32.mrf.mxu3 }
 0xe78   : > { %v2103_v37 = vadd.f32 %v2102_v36, %v5489_v23  ;;  %v4223_v36 = vld [vmem:[#allocation10 + $0x18] sm:$0xff] }
 0xe79   : > { %2243 = vmatpush.bf16.msrb.mxu3 %v4223_v36 }
 0xe7a   : > { %v2107_v25 = vadd.f32 %v5553_v31, %v2103_v37 }
 0xe7c   : > { %v2111_v38 = vsel %vm660_vm1, %v2107_v25, -inf }
 0xe7d   : > { %2112 = vmax.xlane.f32.xlu0 %v2111_v38  ;;  %v4227_v38 = vld [vmem:[#allocation8 + $0x8] sm:$0xff] }
 0xee8   : > { %v2110_v41 = vpop.xlane.xlu2 %2109 }
 0xee9   : > { %v2114_v42 = vsub.f32 %v2106_v35, %v2110_v41  ;;  %v2181_v35 = vadd.f32 %v4456_v26, %v2180_v33 }
 0xeeb   : > { %v2116_v44 = vmul.f32 1.442695, %v2114_v42  ;;  %v2251_v17 = vpack.c.bf16 %v2181_v35, %v2179_v34  ;;  %v3957_v42 = vld [vmem:[%s5240_s1 + $0x50] sm:$0xff] }
 0xeed   : > { %4543 = vpow2.f32 %v2116_v44 }
 0xef0   : > { %v2113_v46 = vpop.xlane.xlu0 %2112 }
 0xef1   : > { %v2115_v48 = vsub.f32 %v2107_v25, %v2113_v46  ;;  %v4222_v25 = vld [vmem:[#allocation10 + $0x10] sm:$0xff]  ;;  %v5586_v46 = vpack.c.bf16 %v3958_v43, %v3957_v42  ;;  %v4459_v43 = vld [vmem:[#allocation7] ss:$0 sm:$0xff] }
 0xef2   : > { %2244 = vmatpush.bf16.msrb.mxu3 %v4222_v25 }
 0xef3   : > { %v4544_v51 = vpop.eup %4543  ;;  %v2118_v52 = vmul.f32 1.442695, %v2115_v48 }
 0xef4   : > { %v2120_v53 = vsel %vm660_vm1, %v4544_v51, 0.0 }
 0xef5   : > { %4545 = vpow2.f32 %v2118_v52  ;;  %2121 = vadd.xlane.f32.xlu1 %v2120_v53  ;;  %3950 = vmatmul.msk.bf16.vlgmr.msrb.gmra.mxu3 %vm547_vm0, %v5529_v32  ;;  %v4224_v52 = vld [vmem:[#allocation5] sm:$0xff] }
 0xef6   : > { %2399 = vmatpush.bf16.msra.mxu3 %v4227_v38 }
 0xefa   : > { %2400 = vmatpush.bf16.msra.mxu3 %v4226_v39 }
 0xefb   : > { %v4546_v55 = vpop.eup %4545 }
 0xefc   : > { %v2123_v56 = vsel %vm660_vm1, %v4546_v55, 0.0 }
 0xefd   : > { %2124 = vadd.xlane.f32.xlu2 %v2123_v56 }
 0xf05   : > { %3976 = vmatmul.msk.bf16.vlgmr.msra.gmra.mxu3 %vm547_vm0, %v5586_v46 }
 0xf68   : > { %v2122_v19 = vpop.xlane.xlu1 %2121 }
 0xf69   : > { %4547 = vrcp.f32 %v2122_v19 }
 0xf6f   : > { %v4548_v27 = vpop.eup %4547 }
 0xf70   : > { %v2125_v22 = vpop.xlane.xlu2 %2124  ;;  %v2128_v16 = vmul.f32 %v4548_v27, %v4544_v51  ;;  %v4225_v51 = vld [vmem:[#allocation5 + $0x8] sm:$0xff] }
 0xf71   : > { %4549 = vrcp.f32 %v2125_v22  ;;  %2365 = vmatpush.bf16.msra.mxu2 %v4225_v51  ;;  %v4233_v51 = vld [vmem:[#allocation8 + $0x18] sm:$0xff] }
 0xf75   : > { %2366 = vmatpush.bf16.msra.mxu2 %v4224_v52  ;;  %v4232_v52 = vld [vmem:[#allocation8 + $0x10] sm:$0xff] }
 0xf77   : > { %v4550_v24 = vpop.eup %4549 }
 0xf78   : > { %v2129_v28 = vmul.f32 %v4550_v24, %v4546_v55  ;;  %3967 = vmatmul.msk.bf16.vlgmr.msra.gmra.mxu2 %vm547_vm0, %v5586_v46  ;;  %v2246_v55 = vpop.f32.mrf.mxu3 }
 0xf79   : > { %v2247_v58 = vadd.f32 %v4457_v57, %v2246_v55 }
 0xf7a   : > { %v2130_v20 = vpack.c.bf16 %v2129_v28, %v2128_v16  ;;  %v4458_v28 = vld [vmem:[%s6013_s3] ss:$0 sm:$0xff] }
 0xf7c   : > { %3921 = vmatmul.msk.bf16.vlgmr.msrb.gmra.mxu0 %vm660_vm1, %v2130_v20 }
 0xf80   : > { %v2248_v60 = vpop.f32.mrf.mxu3 }
 0xf81   : > { %v2249_v63 = vadd.f32 %v4457_v57, %v2248_v60 }
 0xf83   : > { %v2300_v22 = vpack.c.bf16 %v2249_v63, %v2247_v58 }
 0xf85   : > { %2311 = vmatpush.bf16.msra.mxu1 %v2300_v22 }
 0xf88   : > { %v2402_v16 = vpop.f32.mrf.mxu3 }
 0xf89   : > { %v2403_v20 = vadd.f32 %v4458_v28, %v2402_v16 }
 0xf8c   : > { %3953 = vmatmul.msk.bf16.vlgmr.msra.gmra.mxu0 %vm547_vm0, %v2251_v17 }
 0xf90   : > { %v2404_v30 = vpop.f32.mrf.mxu3 }
 0xf91   : > { %v2405_v26 = vadd.f32 %v4458_v28, %v2404_v30 }
 0xf93   : > { %v2442_v33 = vpack.c.bf16 %v2405_v26, %v2403_v20 }
 0xf95   : > { %v2449_v34 = vsel %vm547_vm0, %v2442_v33, 0 }
 0xf96   : > { %2458 = vmatpush.bf16.xpose.msrb.mxu1 %v2449_v34 }
 0xff9   : > { %v5576_v37 = vpop.f32.mrf.mxu0 }
0x1001   : > { %v5580_v40 = vpop.f32.mrf.mxu0 }
0x1009   : > { %v2270_v41 = vpop.f32.mrf.mxu0 }
0x100a   : > { %v2271_v44 = vadd.f32 %v5516_v6, %v2270_v41  ;;  %v2368_v41 = vpop.f32.mrf.mxu2 }
0x100c   : > { %v2275_v45 = vadd.f32 %v5553_v31, %v2271_v44 }
0x100e   : > { %v2277_v47 = vsel %vm660_vm1, %v2275_v45, -inf }
0x100f   : > { %2278 = vmax.xlane.f32.xlu0 %v2277_v47 }
0x1011   : > { %v2272_v48 = vpop.f32.mrf.mxu0 }
0x1012   : > { %v2273_v32 = vadd.f32 %v5522_v12, %v2272_v48  ;;  %v2370_v44 = vpop.f32.mrf.mxu2 }
0x1013   : > { %v2371_v47 = vadd.f32 %v4459_v43, %v2370_v44 }
0x1014   : > { %v2276_v49 = vadd.f32 %v5553_v31, %v2273_v32  ;;  %v4229_v32 = vld [vmem:[#allocation10 + $0x8] sm:$0xff] }
0x1015   : > { %2433 = vmatpush.bf16.msrb.mxu0 %v4229_v32 }
0x1016   : > { %v2280_v50 = vsel %vm660_vm1, %v2276_v49, -inf }
0x1017   : > { %2281 = vmax.xlane.f32.xlu1 %v2280_v50  ;;  %v4228_v50 = vld [vmem:[#allocation10] sm:$0xff] }
0x1019   : > { %2434 = vmatpush.bf16.msrb.mxu0 %v4228_v50 }
0x101c   : > { %3985 = vmatmul.msk.bf16.vlgmr.msrb.gmra.mxu0 %vm547_vm0, %v5586_v46 }
0x101d   : > { %2569 = vmatpush.bf16.msra.mxu0 %v4233_v51 }
0x1021   : > { %2570 = vmatpush.bf16.msra.mxu0 %v4232_v52 }
0x102c   : > { %4006 = vmatmul.msk.bf16.vlgmr.msra.gmra.mxu0 %vm547_vm0, %v5586_v46 }
0x1082   : > { %v2279_v53 = vpop.xlane.xlu0 %2278 }
0x1083   : > { %v2283_v54 = vsub.f32 %v2275_v45, %v2279_v53  ;;  %v2369_v45 = vadd.f32 %v4459_v43, %v2368_v41 }
0x1085   : > { %v2285_v56 = vmul.f32 1.442695, %v2283_v54  ;;  %v2441_v48 = vpack.c.bf16 %v2371_v47, %v2369_v45  ;;  %v5614_v54 = vld [vmem:[%s5263_s7 + $0x5] ss:$0 sm:$0xff] }
0x1087   : > { %4551 = vpow2.f32 %v2285_v56 }
0x108a   : > { %v2282_v31 = vpop.xlane.xlu1 %2281 }
0x108b   : > { %v2284_v59 = vsub.f32 %v2276_v49, %v2282_v31 }
0x108d   : > { %v4552_v2 = vpop.eup %4551  ;;  %v2287_v18 = vmul.f32 1.442695, %v2284_v59 }
0x108e   : > { %v2289_v19 = vsel %vm660_vm1, %v4552_v2, 0.0 }
0x108f   : > { %4553 = vpow2.f32 %v2287_v18  ;;  %2290 = vadd.xlane.f32.xlu2 %v2289_v19  ;;  %v4230_v18 = vld [vmem:[#allocation5 + $0x10] sm:$0xff]  ;;  %v4461_v19 = vld [vmem:[%s6014_s27] ss:$0 sm:$0xff] }
0x1095   : > { %v4554_v27 = vpop.eup %4553 }
0x1096   : > { %v2292_v24 = vsel %vm660_vm1, %v4554_v27, 0.0 }
0x1097   : > { %2293 = vadd.xlane.f32.xlu0 %v2292_v24 }
0x1102   : > { %v2291_v35 = vpop.xlane.xlu2 %2290 }
0x1103   : > { %4555 = vrcp.f32 %v2291_v35 }
0x1109   : > { %v4556_v36 = vpop.eup %4555 }
0x110a   : > { %v2294_v17 = vpop.xlane.xlu0 %2293  ;;  %v2297_v38 = vmul.f32 %v4556_v36, %v4552_v2  ;;  %v4231_v2 = vld [vmem:[#allocation5 + $0x18] sm:$0xff] }
0x110b   : > { %4557 = vrcp.f32 %v2294_v17  ;;  %2535 = vmatpush.bf16.msrb.mxu3 %v4231_v2  ;;  %v4234_v2 = vld [vmem:[#allocation10 + $0x10] sm:$0xff] }
0x110f   : > { %2536 = vmatpush.bf16.msrb.mxu3 %v4230_v18  ;;  %v4239_v18 = vld [vmem:[#allocation8 + $0x8] sm:$0xff] }
0x1111   : > { %v4558_v25 = vpop.eup %4557 }
0x1112   : > { %v2298_v39 = vmul.f32 %v4558_v25, %v4554_v27  ;;  %3996 = vmatmul.msk.bf16.vlgmr.msrb.gmra.mxu3 %vm547_vm0, %v5586_v46 }
0x1114   : > { %v2299_v42 = vpack.c.bf16 %v2298_v39, %v2297_v38  ;;  %v4462_v38 = vld [vmem:[%s6013_s3 + $0x1] ss:$0 sm:$0xff] }
0x1116   : > { %3954 = vmatmul.msk.bf16.vlgmr.msra.gmra.mxu1 %vm660_vm1, %v2299_v42 }
0x1126   : > { %3986 = vmatmul.msk.bf16.vlgmr.msrb.gmra.mxu1 %vm547_vm0, %v2441_v48 }
0x1193   : > { %v5607_v49 = vpop.f32.mrf.mxu1 }
0x1195   : > { %v2538_v52 = vpop.f32.mrf.mxu3 }
0x119b   : > { %v5611_v53 = vpop.f32.mrf.mxu1 }
0x11a3   : > { %v2460_v55 = vpop.f32.mrf.mxu1 }
0x11a4   : > { %v2461_v56 = vadd.f32 %v2460_v55, %v5480_v14  ;;  %v2436_v14 = vpop.f32.mrf.mxu0 }
0x11a6   : > { %v2466_v57 = vadd.f32 %v5614_v54, %v2461_v56  ;;  %v4463_v56 = vld [vmem:[#allocation7 + $0x1] ss:$0 sm:$0xff] }
0x11a8   : > { %v2468_v31 = vsel %vm660_vm1, %v2466_v57, -inf }
0x11a9   : > { %2469 = vmax.xlane.f32.xlu1 %v2468_v31  ;;  %v2539_v31 = vadd.f32 %v4463_v56, %v2538_v52 }
0x11ab   : > { %v2462_v58 = vpop.f32.mrf.mxu1 }
0x11ac   : > { %v2463_v59 = vadd.f32 %v2462_v58, %v5489_v23  ;;  %v2437_v23 = vadd.f32 %v4461_v19, %v2436_v14  ;;  %v2438_v16 = vpop.f32.mrf.mxu0  ;;  %v4238_v14 = vld [vmem:[#allocation8] sm:$0xff] }
0x11ad   : > { %v2439_v28 = vadd.f32 %v4461_v19, %v2438_v16 }
0x11ae   : > { %v2467_v60 = vadd.f32 %v5614_v54, %v2463_v59 }
0x11af   : > { %v2491_v30 = vpack.c.bf16 %v2439_v28, %v2437_v23 }
0x11b0   : > { %v2471_v63 = vsel %vm660_vm1, %v2467_v60, -inf }
0x11b1   : > { %2472 = vmax.xlane.f32.xlu2 %v2471_v63  ;;  %2502 = vmatpush.bf16.msrb.mxu2 %v2491_v30 }
0x11b4   : > { %v2572_v25 = vpop.f32.mrf.mxu0 }
0x11b5   : > { %v2573_v41 = vadd.f32 %v4462_v38, %v2572_v25 }
0x11bc   : > { %v2574_v39 = vpop.f32.mrf.mxu0 }
0x11bd   : > { %v2575_v42 = vadd.f32 %v4462_v38, %v2574_v39 }
0x11bf   : > { %v2612_v43 = vpack.c.bf16 %v2575_v42, %v2573_v41 }
0x11c1   : > { %v2619_v44 = vsel %vm547_vm0, %v2612_v43, 0 }
0x11c2   : > { %2628 = vmatpush.bf16.xpose.msra.mxu2 %v2619_v44 }
0x121c   : > { %v2470_v22 = vpop.xlane.xlu1 %2469 }
0x121d   : > { %v2474_v27 = vsub.f32 %v2466_v57, %v2470_v22  ;;  %v2540_v57 = vpop.f32.mrf.mxu3 }
0x121e   : > { %v2541_v58 = vadd.f32 %v4463_v56, %v2540_v57 }
0x121f   : > { %v2476_v24 = vmul.f32 1.442695, %v2474_v27 }
0x1220   : > { %v2611_v59 = vpack.c.bf16 %v2541_v58, %v2539_v31 }
0x1221   : > { %4559 = vpow2.f32 %v2476_v24 }
0x1224   : > { %v2473_v20 = vpop.xlane.xlu2 %2472 }
0x1225   : > { %v2475_v26 = vsub.f32 %v2467_v60, %v2473_v20  ;;  %v4235_v60 = vld [vmem:[#allocation10 + $0x18] sm:$0xff] }
0x1226   : > { %2603 = vmatpush.bf16.msra.mxu1 %v4235_v60 }
0x1227   : > { %v4560_v33 = vpop.eup %4559  ;;  %v2478_v34 = vmul.f32 1.442695, %v2475_v26  ;;  %v4024_v26 = vld [vmem:[%s5240_s1 + $0x68] sm:$0xff] }
0x1228   : > { %v2480_v35 = vsel %vm660_vm1, %v4560_v33, 0.0 }
0x1229   : > { %4561 = vpow2.f32 %v2478_v34  ;;  %2481 = vadd.xlane.f32.xlu0 %v2480_v35  ;;  %v4236_v34 = vld [vmem:[#allocation5] sm:$0xff] }
0x122a   : > { %2604 = vmatpush.bf16.msra.mxu1 %v4234_v2 }
0x122d   : > { %4016 = vmatmul.msk.bf16.vlgmr.msra.gmra.mxu1 %vm547_vm0, %v5586_v46  ;;  %v4023_v46 = vld [vmem:[%s5240_s1 + $0x60] sm:$0xff] }
0x122e   : > { %2759 = vmatpush.bf16.msrb.mxu1 %v4239_v18 }
0x122f   : > { %v4562_v17 = vpop.eup %4561 }
0x1230   : > { %v2483_v36 = vsel %vm660_vm1, %v4562_v17, 0.0 }
0x1231   : > { %2484 = vadd.xlane.f32.xlu1 %v2483_v36 }
0x1232   : > { %2760 = vmatpush.bf16.msrb.mxu1 %v4238_v14 }
0x129c   : > { %v2482_v45 = vpop.xlane.xlu0 %2481 }
0x129d   : > { %4563 = vrcp.f32 %v2482_v45 }
0x12a3   : > { %v4564_v48 = vpop.eup %4563 }
0x12a4   : > { %v2485_v47 = vpop.xlane.xlu1 %2484  ;;  %v2488_v50 = vmul.f32 %v4564_v48, %v4560_v33  ;;  %v5651_v33 = vpack.c.bf16 %v4024_v26, %v4023_v46  ;;  %v4240_v26 = vld [vmem:[#allocation10] sm:$0xff] }
0x12a5   : > { %4565 = vrcp.f32 %v2485_v47 }
0x12a6   : > { %4042 = vmatmul.msk.bf16.vlgmr.msrb.gmra.mxu1 %vm547_vm0, %v5651_v33 }
0x12ab   : > { %v4566_v32 = vpop.eup %4565 }
0x12ac   : > { %v2489_v51 = vmul.f32 %v4566_v32, %v4562_v17 }
0x12ae   : > { %v2490_v55 = vpack.c.bf16 %v2489_v51, %v2488_v50  ;;  %v4465_v51 = vld [vmem:[%s6013_s3] ss:$0 sm:$0xff] }
0x12b0   : > { %3987 = vmatmul.msk.bf16.vlgmr.msrb.gmra.mxu2 %vm660_vm1, %v2490_v55 }
0x12c0   : > { %4019 = vmatmul.msk.bf16.vlgmr.msra.gmra.mxu2 %vm547_vm0, %v2611_v59 }
0x1333   : > { %v5637_v63 = vpop.f32.mrf.mxu2 }
0x133b   : > { %v5641_v19 = vpop.f32.mrf.mxu2 }
0x1343   : > { %v2630_v22 = vpop.f32.mrf.mxu2 }
0x1344   : > { %v2631_v27 = vadd.f32 %v5516_v6, %v2630_v22  ;;  %v4237_v6 = vld [vmem:[#allocation5 + $0x8] sm:$0xff] }
0x1345   : > { %2725 = vmatpush.bf16.msrb.mxu0 %v4237_v6  ;;  %v4245_v6 = vld [vmem:[#allocation8 + $0x18] sm:$0xff] }
0x1346   : > { %v2635_v23 = vadd.f32 %v5614_v54, %v2631_v27 }
0x1348   : > { %v2637_v24 = vsel %vm660_vm1, %v2635_v23, -inf }
0x1349   : > { %2638 = vmax.xlane.f32.xlu2 %v2637_v24  ;;  %2726 = vmatpush.bf16.msrb.mxu0 %v4236_v34  ;;  %v4244_v34 = vld [vmem:[#allocation8 + $0x10] sm:$0xff] }
0x134b   : > { %v2632_v16 = vpop.f32.mrf.mxu2 }
0x134c   : > { %v2633_v28 = vadd.f32 %v5522_v12, %v2632_v16  ;;  %4033 = vmatmul.msk.bf16.vlgmr.msrb.gmra.mxu0 %vm547_vm0, %v5651_v33  ;;  %v2606_v12 = vpop.f32.mrf.mxu1 }
0x134e   : > { %v2636_v30 = vadd.f32 %v5614_v54, %v2633_v28  ;;  %v4464_v54 = vld [vmem:[%s6014_s27 + $0x1] ss:$0 sm:$0xff] }
0x134f   : > { %v2607_v36 = vadd.f32 %v4464_v54, %v2606_v12 }
0x1350   : > { %v2640_v20 = vsel %vm660_vm1, %v2636_v30, -inf }
0x1351   : > { %2641 = vmax.xlane.f32.xlu0 %v2640_v20  ;;  %v4241_v20 = vld [vmem:[#allocation10 + $0x8] sm:$0xff] }
0x1352   : > { %2793 = vmatpush.bf16.msrb.mxu2 %v4241_v20 }
0x1354   : > { %v2608_v38 = vpop.f32.mrf.mxu1 }
0x1355   : > { %v2609_v39 = vadd.f32 %v4464_v54, %v2608_v38  ;;  %v5675_v54 = vld [vmem:[%s5256_s26] sm:$0xff] }
0x1356   : > { %2794 = vmatpush.bf16.msrb.mxu2 %v4240_v26 }
0x1357   : > { %v2660_v41 = vpack.c.bf16 %v2609_v39, %v2607_v36  ;;  %v5684_v39 = vld [vmem:[%s5256_s26 + $0x8] sm:$0xff] }
0x1359   : > { %2671 = vmatpush.bf16.msra.mxu3 %v2660_v41  ;;  %4051 = vmatmul.msk.bf16.vlgmr.msrb.gmra.mxu2 %vm547_vm0, %v5651_v33 }
0x135a   : > { %2929 = vmatpush.bf16.msra.mxu2 %v4245_v6 }
0x135c   : > { %v2762_v50 = vpop.f32.mrf.mxu1 }
0x135d   : > { %v2763_v52 = vadd.f32 %v4465_v51, %v2762_v50 }
0x135e   : > { %2930 = vmatpush.bf16.msra.mxu2 %v4244_v34 }
0x1364   : > { %v2764_v55 = vpop.f32.mrf.mxu1 }
0x1365   : > { %v2765_v56 = vadd.f32 %v4465_v51, %v2764_v55 }
0x1367   : > { %v2802_v57 = vpack.c.bf16 %v2765_v56, %v2763_v52  ;;  %v4468_v52 = vld [vmem:[%s6014_s27] ss:$0 sm:$0xff] }
0x1369   : > { %v2809_v31 = vsel %vm547_vm0, %v2802_v57, 0  ;;  %4072 = vmatmul.msk.bf16.vlgmr.msra.gmra.mxu2 %vm547_vm0, %v5651_v33 }
0x136a   : > { %2818 = vmatpush.bf16.xpose.msrb.mxu3 %v2809_v31 }
0x13bc   : > { %v2639_v35 = vpop.xlane.xlu2 %2638 }
0x13bd   : > { %v2643_v17 = vsub.f32 %v2635_v23, %v2639_v35  ;;  %v4466_v23 = vld [vmem:[#allocation7] ss:$0 sm:$0xff]  ;;  %v5678_v35 = vld [vmem:[%s5263_s7 + $0x6] ss:$0 sm:$0xff] }
0x13bf   : > { %v2645_v25 = vmul.f32 1.442695, %v2643_v17 }
0x13c1   : > { %4567 = vpow2.f32 %v2645_v25 }
0x13c4   : > { %v2642_v42 = vpop.xlane.xlu0 %2641 }
0x13c5   : > { %v2644_v43 = vsub.f32 %v2636_v30, %v2642_v42 }
0x13c7   : > { %v4568_v44 = vpop.eup %4567  ;;  %v2647_v45 = vmul.f32 1.442695, %v2644_v43 }
0x13c8   : > { %v2649_v47 = vsel %vm660_vm1, %v4568_v44, 0.0 }
0x13c9   : > { %4569 = vpow2.f32 %v2647_v45  ;;  %2650 = vadd.xlane.f32.xlu1 %v2649_v47  ;;  %v2728_v22 = vpop.f32.mrf.mxu0  ;;  %v4243_v45 = vld [vmem:[#allocation5 + $0x18] sm:$0xff]  ;;  %v4242_v47 = vld [vmem:[#allocation5 + $0x10] sm:$0xff] }
0x13ca   : > { %v2729_v16 = vadd.f32 %v4466_v23, %v2728_v22  ;;  %2895 = vmatpush.bf16.msra.mxu1 %v4243_v45 }
0x13ce   : > { %2896 = vmatpush.bf16.msra.mxu1 %v4242_v47 }
0x13cf   : > { %v4570_v48 = vpop.eup %4569 }
0x13d0   : > { %v2652_v32 = vsel %vm660_vm1, %v4570_v48, 0.0 }
0x13d1   : > { %2653 = vadd.xlane.f32.xlu2 %v2652_v32  ;;  %v2730_v24 = vpop.f32.mrf.mxu0  ;;  %4062 = vmatmul.msk.bf16.vlgmr.msra.gmra.mxu1 %vm547_vm0, %v5651_v33 }
0x13d2   : > { %v2731_v28 = vadd.f32 %v4466_v23, %v2730_v24  ;;  %v4469_v23 = vld [vmem:[%s6013_s3 + $0x1] ss:$0 sm:$0xff] }
0x13d4   : > { %v2801_v30 = vpack.c.bf16 %v2731_v28, %v2729_v16 }
0x13dc   : > { %v2796_v50 = vpop.f32.mrf.mxu2 }
0x13dd   : > { %v2797_v56 = vadd.f32 %v4468_v52, %v2796_v50  ;;  %v4246_v50 = vld [vmem:[#allocation10 + $0x10] sm:$0xff] }
0x13e4   : > { %v2798_v31 = vpop.f32.mrf.mxu2 }
0x143c   : > { %v2651_v58 = vpop.xlane.xlu1 %2650 }
0x143d   : > { %4571 = vrcp.f32 %v2651_v58  ;;  %v2799_v58 = vadd.f32 %v4468_v52, %v2798_v31  ;;  %v4250_v52 = vld [vmem:[#allocation8] sm:$0xff]  ;;  %v4089_v31 = vld [vmem:[%s5240_s1 + $0x70] sm:$0xff] }
0x1443   : > { %v4572_v60 = vpop.eup %4571 }
0x1444   : > { %v2654_v59 = vpop.xlane.xlu2 %2653  ;;  %v2657_v18 = vmul.f32 %v4572_v60, %v4568_v44 }
0x1445   : > { %4573 = vrcp.f32 %v2654_v59 }
0x144b   : > { %v4574_v2 = vpop.eup %4573 }
0x144c   : > { %v2658_v14 = vmul.f32 %v4574_v2, %v4570_v48 }
0x144e   : > { %v2659_v27 = vpack.c.bf16 %v2658_v14, %v2657_v18  ;;  %v2851_v18 = vpack.c.bf16 %v2799_v58, %v2797_v56  ;;  %v5711_v56 = vld [vmem:[%s5256_s26 + $0x10] sm:$0xff] }
0x144f   : > { %v4090_v58 = vld [vmem:[%s5240_s1 + $0x78] sm:$0xff] }
0x1450   : > { %4020 = vmatmul.msk.bf16.vlgmr.msra.gmra.mxu3 %vm660_vm1, %v2659_v27  ;;  %2862 = vmatpush.bf16.msra.mxu0 %v2851_v18  ;;  %v2932_v27 = vpop.f32.mrf.mxu2 }
0x1451   : > { %v2933_v16 = vadd.f32 %v4469_v23, %v2932_v27 }
0x1458   : > { %v2934_v24 = vpop.f32.mrf.mxu2 }
0x1459   : > { %v2935_v28 = vadd.f32 %v4469_v23, %v2934_v24  ;;  %v4249_v24 = vld [vmem:[#allocation5 + $0x8] sm:$0xff] }
0x145a   : > { %3085 = vmatpush.bf16.msrb.mxu2 %v4249_v24  ;;  %v4473_v24 = vld [vmem:[#allocation7] ss:$0 sm:$0xff] }
0x1460   : > { %4052 = vmatmul.msk.bf16.vlgmr.msrb.gmra.mxu3 %vm547_vm0, %v2801_v30  ;;  %v2972_v30 = vpack.c.bf16 %v2935_v28, %v2933_v16  ;;  %v4248_v16 = vld [vmem:[#allocation5] sm:$0xff] }
0x1461   : > { %3086 = vmatpush.bf16.msrb.mxu2 %v4248_v16 }
0x1462   : > { %v2979_v20 = vsel %vm547_vm0, %v2972_v30, 0 }
0x1463   : > { %2988 = vmatpush.bf16.xpose.msrb.mxu0 %v2979_v20 }
0x14d3   : > { %v5668_v46 = vpop.f32.mrf.mxu3 }
0x14db   : > { %v5672_v12 = vpop.f32.mrf.mxu3 }
0x14e3   : > { %v2820_v17 = vpop.f32.mrf.mxu3 }
0x14e4   : > { %v2821_v36 = vadd.f32 %v2820_v17, %v5675_v54 }
0x14e6   : > { %v2826_v25 = vadd.f32 %v5678_v35, %v2821_v36 }
0x14e8   : > { %v2828_v38 = vsel %vm660_vm1, %v2826_v25, -inf }
0x14e9   : > { %2829 = vmax.xlane.f32.xlu0 %v2828_v38  ;;  %v2898_v38 = vpop.f32.mrf.mxu1 }
0x14eb   : > { %v2822_v41 = vpop.f32.mrf.mxu3 }
0x14ec   : > { %v2823_v42 = vadd.f32 %v2822_v41, %v5684_v39 }
0x14ee   : > { %v2827_v43 = vadd.f32 %v5678_v35, %v2823_v42  ;;  %v4470_v42 = vld [vmem:[#allocation7 + $0x1] ss:$0 sm:$0xff] }
0x14f0   : > { %v2831_v44 = vsel %vm660_vm1, %v2827_v43, -inf }
0x14f1   : > { %2832 = vmax.xlane.f32.xlu1 %v2831_v44  ;;  %v2899_v44 = vadd.f32 %v4470_v42, %v2898_v38 }
0x155c   : > { %v2830_v48 = vpop.xlane.xlu0 %2829 }
0x155d   : > { %v2834_v32 = vsub.f32 %v2826_v25, %v2830_v48  ;;  %v4247_v48 = vld [vmem:[#allocation10 + $0x18] sm:$0xff] }
0x155e   : > { %2963 = vmatpush.bf16.msra.mxu3 %v4247_v48  ;;  %v4472_v48 = vld [vmem:[%s6013_s3] ss:$0 sm:$0xff] }
0x155f   : > { %v2836_v51 = vmul.f32 1.442695, %v2834_v32 }
0x1561   : > { %4575 = vpow2.f32 %v2836_v51  ;;  %v4251_v51 = vld [vmem:[#allocation8 + $0x8] sm:$0xff] }
0x1562   : > { %2964 = vmatpush.bf16.msra.mxu3 %v4246_v50 }
0x1564   : > { %v2833_v55 = vpop.xlane.xlu1 %2832 }
0x1565   : > { %v2835_v57 = vsub.f32 %v2827_v43, %v2833_v55  ;;  %v2900_v43 = vpop.f32.mrf.mxu1  ;;  %4082 = vmatmul.msk.bf16.vlgmr.msra.gmra.mxu3 %vm547_vm0, %v5651_v33 }
0x1566   : > { %v2901_v45 = vadd.f32 %v4470_v42, %v2900_v43  ;;  %3119 = vmatpush.bf16.msrb.mxu3 %v4251_v51 }
0x1567   : > { %v4576_v59 = vpop.eup %4575  ;;  %v2838_v60 = vmul.f32 1.442695, %v2835_v57 }
0x1568   : > { %v2840_v2 = vsel %vm660_vm1, %v4576_v59, 0.0  ;;  %v2971_v47 = vpack.c.bf16 %v2901_v45, %v2899_v44 }
0x1569   : > { %4577 = vpow2.f32 %v2838_v60  ;;  %2841 = vadd.xlane.f32.xlu2 %v2840_v2  ;;  %v5717_v2 = vpack.c.bf16 %v4090_v58, %v4089_v31 }
0x156a   : > { %3120 = vmatpush.bf16.msrb.mxu3 %v4250_v52 }
0x156b   : > { %4099 = vmatmul.msk.bf16.vlgmr.msrb.gmra.mxu2 %vm547_vm0, %v5717_v2 }
0x156f   : > { %v4578_v14 = vpop.eup %4577 }
0x1570   : > { %v2843_v22 = vsel %vm660_vm1, %v4578_v14, 0.0 }
0x1571   : > { %2844 = vadd.xlane.f32.xlu0 %v2843_v22 }
0x1575   : > { %4108 = vmatmul.msk.bf16.vlgmr.msrb.gmra.mxu3 %vm547_vm0, %v5717_v2 }
0x15dc   : > { %v2842_v26 = vpop.xlane.xlu2 %2841 }
0x15dd   : > { %4579 = vrcp.f32 %v2842_v26 }
0x15e3   : > { %v4580_v34 = vpop.eup %4579 }
0x15e4   : > { %v2845_v6 = vpop.xlane.xlu0 %2844  ;;  %v2848_v36 = vmul.f32 %v4580_v34, %v4576_v59 }
0x15e5   : > { %4581 = vrcp.f32 %v2845_v6  ;;  %v4471_v6 = vld [vmem:[%s6014_s27 + $0x1] ss:$0 sm:$0xff] }
0x15e8   : > { %v2966_v20 = vpop.f32.mrf.mxu3 }
0x15e9   : > { %v2967_v34 = vadd.f32 %v4471_v6, %v2966_v20 }
0x15eb   : > { %v4582_v17 = vpop.eup %4581 }
0x15ec   : > { %v2849_v25 = vmul.f32 %v4582_v17, %v4578_v14  ;;  %v5721_v14 = vld [vmem:[%s5256_s26 + $0x18] sm:$0xff] }
0x15ee   : > { %v2850_v41 = vpack.c.bf16 %v2849_v25, %v2848_v36 }
0x15f0   : > { %4053 = vmatmul.msk.bf16.vlgmr.msra.gmra.mxu0 %vm660_vm1, %v2850_v41  ;;  %v2968_v36 = vpop.f32.mrf.mxu3 }
0x15f1   : > { %v2969_v25 = vadd.f32 %v4471_v6, %v2968_v36 }
0x15f3   : > { %v3020_v43 = vpack.c.bf16 %v2969_v25, %v2967_v34  ;;  %v4257_v34 = vld [vmem:[#allocation8 + $0x18] sm:$0xff]  ;;  %v5748_v25 = vld [vmem:[%s5263_s7 + $0x7] ss:$0 sm:$0xff]  ;;  %s3427_s7 = sshll.u32 %s5799_s16, 4  ;;  %s3428_s7 = int_to_ptr.vmem [resolvable:$true] %s3427_s7 }
0x15f5   : > { %3031 = vmatpush.bf16.msrb.mxu1 %v3020_v43 }
0x1600   : > { %4085 = vmatmul.msk.bf16.vlgmr.msrb.gmra.mxu0 %vm547_vm0, %v2971_v47  ;;  %v3122_v47 = vpop.f32.mrf.mxu3 }
0x1601   : > { %v3123_v51 = vadd.f32 %v4472_v48, %v3122_v47 }
0x1608   : > { %v3124_v50 = vpop.f32.mrf.mxu3 }
0x1609   : > { %v3125_v52 = vadd.f32 %v4472_v48, %v3124_v50  ;;  %v4255_v50 = vld [vmem:[#allocation5 + $0x18] sm:$0xff] }
0x160a   : > { %3255 = vmatpush.bf16.msra.mxu3 %v4255_v50 }
0x166d   : > { %v5704_v32 = vpop.f32.mrf.mxu0 }
0x1675   : > { %v5708_v55 = vpop.f32.mrf.mxu0 }
0x167d   : > { %v2990_v57 = vpop.f32.mrf.mxu0 }
0x167e   : > { %v2991_v59 = vadd.f32 %v5711_v56, %v2990_v57  ;;  %v3162_v57 = vpack.c.bf16 %v3125_v52, %v3123_v51  ;;  %v4254_v51 = vld [vmem:[#allocation5 + $0x10] sm:$0xff]  ;;  %v4475_v52 = vld [vmem:[%s6014_s27] ss:$0 sm:$0xff] }
0x167f   : > { %3256 = vmatpush.bf16.msra.mxu3 %v4254_v51  ;;  %v4477_v51 = vld [vmem:[#allocation7 + $0x1] ss:$0 sm:$0xff] }
0x1680   : > { %v2995_v60 = vadd.f32 %v5678_v35, %v2991_v59  ;;  %v3169_v31 = vsel %vm547_vm0, %v3162_v57, 0 }
0x1681   : > { %3178 = vmatpush.bf16.xpose.msra.mxu1 %v3169_v31 }
0x1682   : > { %v2997_v18 = vsel %vm660_vm1, %v2995_v60, -inf  ;;  %4128 = vmatmul.msk.bf16.vlgmr.msra.gmra.mxu3 %vm547_vm0, %v5717_v2 }
0x1683   : > { %2998 = vmax.xlane.f32.xlu1 %v2997_v18 }
0x1685   : > { %v2992_v33 = vpop.f32.mrf.mxu0 }
0x1686   : > { %v2993_v22 = vadd.f32 %v5721_v14, %v2992_v33 }
0x1688   : > { %v2996_v27 = vadd.f32 %v5678_v35, %v2993_v22 }
0x168a   : > { %v3000_v23 = vsel %vm660_vm1, %v2996_v27, -inf }
0x168b   : > { %3001 = vmax.xlane.f32.xlu2 %v3000_v23 }
0x16f6   : > { %v2999_v28 = vpop.xlane.xlu1 %2998 }
0x16f7   : > { %v3003_v30 = vsub.f32 %v2995_v60, %v2999_v28 }
0x16f9   : > { %v3005_v26 = vmul.f32 1.442695, %v3003_v30 }
0x16fb   : > { %4583 = vpow2.f32 %v3005_v26  ;;  %v4253_v26 = vld [vmem:[#allocation10 + $0x8] sm:$0xff] }
0x16fc   : > { %3153 = vmatpush.bf16.msra.mxu0 %v4253_v26 }
0x16fe   : > { %v3002_v35 = vpop.xlane.xlu2 %3001 }
0x16ff   : > { %v3004_v17 = vsub.f32 %v2996_v27, %v3002_v35  ;;  %v3088_v27 = vpop.f32.mrf.mxu2  ;;  %v4252_v35 = vld [vmem:[#allocation10] sm:$0xff] }
0x1700   : > { %v3089_v28 = vadd.f32 %v4473_v24, %v3088_v27  ;;  %3154 = vmatpush.bf16.msra.mxu0 %v4252_v35 }
0x1701   : > { %v4584_v38 = vpop.eup %4583  ;;  %v3007_v41 = vmul.f32 1.442695, %v3004_v17  ;;  %v4256_v17 = vld [vmem:[#allocation8 + $0x10] sm:$0xff] }
0x1702   : > { %v3009_v42 = vsel %vm660_vm1, %v4584_v38, 0.0 }
0x1703   : > { %4585 = vpow2.f32 %v3007_v41  ;;  %3010 = vadd.xlane.f32.xlu0 %v3009_v42  ;;  %4117 = vmatmul.msk.bf16.vlgmr.msra.gmra.mxu0 %vm547_vm0, %v5717_v2 }
0x1704   : > { %3289 = vmatpush.bf16.msrb.mxu0 %v4257_v34 }
0x1707   : > { %v3090_v16 = vpop.f32.mrf.mxu2 }
0x1708   : > { %v3091_v30 = vadd.f32 %v4473_v24, %v3090_v16  ;;  %3290 = vmatpush.bf16.msrb.mxu0 %v4256_v17 }
0x1709   : > { %v4586_v44 = vpop.eup %4585 }
0x170a   : > { %v3012_v45 = vsel %vm660_vm1, %v4586_v44, 0.0  ;;  %v3161_v20 = vpack.c.bf16 %v3091_v30, %v3089_v28 }
0x170b   : > { %3013 = vadd.xlane.f32.xlu1 %v3012_v45 }
0x1713   : > { %4138 = vmatmul.msk.bf16.vlgmr.msrb.gmra.mxu0 %vm547_vm0, %v5717_v2 }
0x1776   : > { %v3011_v58 = vpop.xlane.xlu0 %3010 }
0x1777   : > { %4587 = vrcp.f32 %v3011_v58 }
0x177d   : > { %v4588_v60 = vpop.eup %4587 }
0x177e   : > { %v3014_v59 = vpop.xlane.xlu1 %3013  ;;  %v3017_v33 = vmul.f32 %v4588_v60, %v4584_v38 }
0x177f   : > { %4589 = vrcp.f32 %v3014_v59 }
0x1785   : > { %v4590_v18 = vpop.eup %4589 }
0x1786   : > { %v3018_v22 = vmul.f32 %v4590_v18, %v4586_v44 }
0x1788   : > { %v3019_v23 = vpack.c.bf16 %v3018_v22, %v3017_v33 }
0x178a   : > { %4086 = vmatmul.msk.bf16.vlgmr.msrb.gmra.mxu1 %vm660_vm1, %v3019_v23 }
0x179a   : > { %4118 = vmatmul.msk.bf16.vlgmr.msra.gmra.mxu1 %vm547_vm0, %v3161_v20  ;;  %v4476_v20 = vld [vmem:[%s6013_s3 + $0x1] ss:$0 sm:$0xff] }
0x1807   : > { %v5741_v6 = vpop.f32.mrf.mxu1 }
0x180f   : > { %v5745_v36 = vpop.f32.mrf.mxu1 }
0x1817   : > { %v3180_v38 = vpop.f32.mrf.mxu1 }
0x1818   : > { %v3181_v41 = vadd.f32 %v3180_v38, %v5675_v54  ;;  %v3156_v54 = vpop.f32.mrf.mxu0 }
0x181a   : > { %v3186_v42 = vadd.f32 %v5748_v25, %v3181_v41 }
0x181c   : > { %v3188_v43 = vsel %vm660_vm1, %v3186_v42, -inf }
0x181d   : > { %3189 = vmax.xlane.f32.xlu2 %v3188_v43 }
0x181f   : > { %v3182_v44 = vpop.f32.mrf.mxu1 }
0x1820   : > { %v3183_v45 = vadd.f32 %v3182_v44, %v5684_v39  ;;  %v3157_v39 = vadd.f32 %v4475_v52, %v3156_v54  ;;  %v3158_v59 = vpop.f32.mrf.mxu0 }
0x1821   : > { %v3159_v60 = vadd.f32 %v4475_v52, %v3158_v59 }
0x1822   : > { %v3187_v47 = vadd.f32 %v5748_v25, %v3183_v45 }
0x1823   : > { %v3211_v18 = vpack.c.bf16 %v3159_v60, %v3157_v39 }
0x1824   : > { %v3191_v48 = vsel %vm660_vm1, %v3187_v47, -inf }
0x1825   : > { %3192 = vmax.xlane.f32.xlu0 %v3191_v48  ;;  %3222 = vmatpush.bf16.msra.mxu2 %v3211_v18  ;;  %v3258_v48 = vpop.f32.mrf.mxu3 }
0x1826   : > { %v3259_v52 = vadd.f32 %v4477_v51, %v3258_v48 }
0x1828   : > { %v3292_v30 = vpop.f32.mrf.mxu0 }
0x1829   : > { %v3293_v35 = vadd.f32 %v4476_v20, %v3292_v30 }
0x182d   : > { %v3260_v54 = vpop.f32.mrf.mxu3 }
0x1830   : > { %v3294_v26 = vpop.f32.mrf.mxu0 }
0x1831   : > { %v3295_v34 = vadd.f32 %v4476_v20, %v3294_v26 }
0x1833   : > { %v3332_v17 = vpack.c.bf16 %v3295_v34, %v3293_v35 }
0x1835   : > { %v3339_v38 = vsel %vm547_vm0, %v3332_v17, 0 }
0x1836   : > { %3348 = vmatpush.bf16.xpose.msrb.mxu2 %v3339_v38 }
0x1890   : > { %v3190_v57 = vpop.xlane.xlu2 %3189 }
0x1891   : > { %v3194_v31 = vsub.f32 %v3186_v42, %v3190_v57  ;;  %v3261_v57 = vadd.f32 %v4477_v51, %v3260_v54 }
0x1893   : > { %v3196_v58 = vmul.f32 1.442695, %v3194_v31  ;;  %v3331_v31 = vpack.c.bf16 %v3261_v57, %v3259_v52 }
0x1895   : > { %4591 = vpow2.f32 %v3196_v58 }
0x1898   : > { %v3193_v33 = vpop.xlane.xlu0 %3192 }
0x1899   : > { %v3195_v22 = vsub.f32 %v3187_v47, %v3193_v33 }
0x189b   : > { %v4592_v27 = vpop.eup %4591  ;;  %v3198_v23 = vmul.f32 1.442695, %v3195_v22 }
0x189c   : > { %v3200_v24 = vsel %vm660_vm1, %v4592_v27, 0.0 }
0x189d   : > { %4593 = vpow2.f32 %v3198_v23  ;;  %3201 = vadd.xlane.f32.xlu1 %v3200_v24 }
0x18a3   : > { %v4594_v16 = vpop.eup %4593 }
0x18a4   : > { %v3203_v28 = vsel %vm660_vm1, %v4594_v16, 0.0 }
0x18a5   : > { %3204 = vadd.xlane.f32.xlu2 %v3203_v28 }
0x1910   : > { %v3202_v41 = vpop.xlane.xlu1 %3201 }
0x1911   : > { %4595 = vrcp.f32 %v3202_v41 }
0x1917   : > { %v4596_v43 = vpop.eup %4595 }
0x1918   : > { %v3205_v42 = vpop.xlane.xlu2 %3204  ;;  %v3208_v45 = vmul.f32 %v4596_v43, %v4592_v27 }
0x1919   : > { %4597 = vrcp.f32 %v3205_v42 }
0x191f   : > { %v4598_v44 = vpop.eup %4597 }
0x1920   : > { %v3209_v47 = vmul.f32 %v4598_v44, %v4594_v16  ;;  %v4259_v16 = vld [vmem:[#allocation10 + $0x18] sm:$0xff] }
0x1921   : > { %3323 = vmatpush.bf16.msrb.mxu1 %v4259_v16 }
0x1922   : > { %v3210_v50 = vpack.c.bf16 %v3209_v47, %v3208_v45 }
0x1924   : > { %4119 = vmatmul.msk.bf16.vlgmr.msra.gmra.mxu2 %vm660_vm1, %v3210_v50 }
0x1934   : > { %4151 = vmatmul.msk.bf16.vlgmr.msrb.gmra.mxu2 %vm547_vm0, %v3331_v31 }
0x19a7   : > { %v5771_v39 = vpop.f32.mrf.mxu2 }
0x19af   : > { %v5773_v58 = vpop.f32.mrf.mxu2 }
0x19b7   : > { %v3350_v59 = vpop.f32.mrf.mxu2 }
0x19b8   : > { %v3351_v60 = vadd.f32 %v5711_v56, %v3350_v59  ;;  %v4258_v56 = vld [vmem:[#allocation10 + $0x10] sm:$0xff] }
0x19b9   : > { %3324 = vmatpush.bf16.msrb.mxu1 %v4258_v56 }
0x19ba   : > { %v3355_v18 = vadd.f32 %v5748_v25, %v3351_v60 }
0x19bc   : > { %v3357_v33 = vsel %vm660_vm1, %v3355_v18, -inf  ;;  %4148 = vmatmul.msk.bf16.vlgmr.msrb.gmra.mxu1 %vm547_vm0, %v5717_v2 }
0x19bd   : > { %3358 = vmax.xlane.f32.xlu0 %v3357_v33 }
0x19bf   : > { %v3352_v22 = vpop.f32.mrf.mxu2 }
0x19c0   : > { %v3353_v27 = vadd.f32 %v5721_v14, %v3352_v22 }
0x19c2   : > { %v3356_v23 = vadd.f32 %v5748_v25, %v3353_v27 }
0x19c4   : > { %v3360_v24 = vsel %vm660_vm1, %v3356_v23, -inf }
0x19c5   : > { %3361 = vmax.xlane.f32.xlu1 %v3360_v24 }
0x19de   : > { %880 = vrot.lane.b32.xlu1 %v5351_v5, %s4967_s20 }
0x19e6   : > { %1600 = vrot.lane.b32.xlu1 %v5473_v61, %s4967_s20 }
0x19ee   : > { %1962 = vrot.lane.b32.xlu1 %v5550_v9, %s4967_s20 }
0x19f6   : > { %2680 = vrot.lane.b32.xlu1 %v5668_v46, %s4967_s20 }
0x19fe   : > { %3042 = vrot.lane.b32.xlu1 %v5745_v36, %s4967_s20 }
0x1a30   : > { %v3359_v5 = vpop.xlane.xlu0 %3358 }
0x1a31   : > { %v3363_v14 = vsub.f32 %v3355_v18, %v3359_v5 }
0x1a33   : > { %v3365_v25 = vmul.f32 1.442695, %v3363_v14 }
0x1a35   : > { %4599 = vpow2.f32 %v3365_v25 }
0x1a38   : > { %v3362_v28 = vpop.xlane.xlu1 %3361 }
0x1a39   : > { %v3364_v30 = vsub.f32 %v3356_v23, %v3362_v28 }
0x1a3b   : > { %v4600_v61 = vpop.eup %4599  ;;  %v3367_v20 = vmul.f32 1.442695, %v3364_v30 }
0x1a3c   : > { %v3369_v2 = vsel %vm660_vm1, %v4600_v61, 0.0 }
0x1a3d   : > { %4601 = vpow2.f32 %v3367_v20  ;;  %3370 = vadd.xlane.f32.xlu2 %v3369_v2 }
0x1a43   : > { %v4602_v9 = vpop.eup %4601 }
0x1a44   : > { %v3372_v26 = vsel %vm660_vm1, %v4602_v9, 0.0 }
0x1a45   : > { %3373 = vadd.xlane.f32.xlu0 %v3372_v26 }
0x1a50   : > { %v881_v46 = vpop.permute.xlu1 %880 }
0x1a51   : > { %v886_v36 = vsel %vm547_vm0, %v5314_v11, %v881_v46 }
0x1a52   : > { %889 = vst.msk [vmem:[%s5799_s16] sm:$0xff] %vm888_vm2, %v886_v36 }
0x1a55   : > { %882 = vrot.lane.b32.xlu2 %v5355_v10, %s4967_s20  ;;  %v3326_v10 = vpop.f32.mrf.mxu1 }
0x1a58   : > { %v1601_v35 = vpop.permute.xlu1 %1600 }
0x1a59   : > { %v1606_v34 = vsel %vm547_vm0, %v5442_v62, %v1601_v35  ;;  %1240 = vrot.lane.b32.xlu0 %v5412_v0, %s4967_s20  ;;  %v4478_v0 = vld [vmem:[%s6014_s27 + $0x1] ss:$0 sm:$0xff] }
0x1a5a   : > { %3823 = vst.msk [vmem:[%s5799_s16 + $0x20] sm:$0xff] %vm888_vm2, %v1606_v34 }
0x1a5d   : > { %1242 = vrot.lane.b32.xlu2 %v5416_v8, %s4967_s20 }
0x1a60   : > { %v1963_v11 = vpop.permute.xlu1 %1962 }
0x1a61   : > { %v1967_v17 = vsel %vm547_vm0, %v5513_v21, %v1963_v11  ;;  %1602 = vrot.lane.b32.xlu0 %v5477_v13, %s4967_s20  ;;  %v3327_v13 = vadd.f32 %v4478_v0, %v3326_v10  ;;  %v3328_v21 = vpop.f32.mrf.mxu1 }
0x1a62   : > { %3890 = vst.msk [vmem:[%s5799_s16 + $0x38] sm:$0xff] %vm888_vm2, %v1967_v17 }
0x1a65   : > { %1960 = vrot.lane.b32.xlu2 %v5546_v29, %s4967_s20  ;;  %v3329_v29 = vadd.f32 %v4478_v0, %v3328_v21 }
0x1a67   : > { %v3380_v38 = vpack.c.bf16 %v3329_v29, %v3327_v13 }
0x1a68   : > { %v2681_v62 = vpop.permute.xlu1 %2680 }
0x1a69   : > { %v2686_v8 = vsel %vm547_vm0, %v5637_v63, %v2681_v62  ;;  %2320 = vrot.lane.b32.xlu0 %v5607_v49, %s4967_s20  ;;  %3391 = vmatpush.bf16.msrb.mxu3 %v3380_v38 }
0x1a6a   : > { %4021 = vst.msk [vmem:[%s5799_s16 + $0x50] sm:$0xff] %vm888_vm2, %v2686_v8 }
0x1a6d   : > { %2322 = vrot.lane.b32.xlu2 %v5611_v53, %s4967_s20 }
0x1a70   : > { %v3043_v41 = vpop.permute.xlu1 %3042 }
0x1a71   : > { %v3047_v42 = vsel %vm547_vm0, %v5708_v55, %v3043_v41  ;;  %2682 = vrot.lane.b32.xlu0 %v5672_v12, %s4967_s20 }
0x1a72   : > { %4088 = vst.msk [vmem:[%s5799_s16 + $0x68] sm:$0xff] %vm888_vm2, %v3047_v42 }
0x1a75   : > { %3040 = vrot.lane.b32.xlu2 %v5741_v6, %s4967_s20 }
0x1ab0   : > { %v3371_v49 = vpop.xlane.xlu2 %3370 }
0x1ab1   : > { %4603 = vrcp.f32 %v3371_v49 }
0x1ab7   : > { %v4604_v12 = vpop.eup %4603 }
0x1ab8   : > { %v883_v63 = vpop.permute.xlu2 %882  ;;  %v3374_v53 = vpop.xlane.xlu0 %3373  ;;  %v3377_v44 = vmul.f32 %v4604_v12, %v4600_v61 }
0x1ab9   : > { %v887_v43 = vsel %vm547_vm0, %v5318_v15, %v883_v63  ;;  %4605 = vrcp.f32 %v3374_v53 }
0x1aba   : > { %890 = vst.msk [vmem:[%s5799_s16 + $0x8] sm:$0xff] %vm888_vm2, %v887_v43 }
0x1abf   : > { %v4606_v55 = vpop.eup %4605 }
0x1ac0   : > { %v3378_v45 = vmul.f32 %v4606_v55, %v4602_v9  ;;  %v1243_v47 = vpop.permute.xlu2 %1242 }
0x1ac1   : > { %v1247_v6 = vsel %vm547_vm0, %v5385_v7, %v1243_v47 }
0x1ac2   : > { %v3379_v48 = vpack.c.bf16 %v3378_v45, %v3377_v44  ;;  %3758 = vst.msk [vmem:[%s5799_s16 + $0x18] sm:$0xff] %vm888_vm2, %v1247_v6 }
0x1ac4   : > { %4152 = vmatmul.msk.bf16.vlgmr.msrb.gmra.mxu3 %vm660_vm1, %v3379_v48 }
0x1ac8   : > { %v1961_v15 = vpop.permute.xlu2 %1960 }
0x1ac9   : > { %v1966_v50 = vsel %vm547_vm0, %v5509_v3, %v1961_v15 }
0x1aca   : > { %3889 = vst.msk [vmem:[%s5799_s16 + $0x30] sm:$0xff] %vm888_vm2, %v1966_v50 }
0x1acb   : > { %v1241_v51 = vpop.permute.xlu0 %1240 }
0x1acc   : > { %v1246_v54 = vsel %vm547_vm0, %v5381_v1, %v1241_v51 }
0x1acd   : > { %3757 = vst.msk [vmem:[%s5799_s16 + $0x10] sm:$0xff] %vm888_vm2, %v1246_v54 }
0x1ad0   : > { %v2323_v7 = vpop.permute.xlu2 %2322 }
0x1ad1   : > { %v2327_v52 = vsel %vm547_vm0, %v5580_v40, %v2323_v7 }
0x1ad2   : > { %3956 = vst.msk [vmem:[%s5799_s16 + $0x48] sm:$0xff] %vm888_vm2, %v2327_v52 }
0x1ad3   : > { %v1603_v57 = vpop.permute.xlu0 %1602 }
0x1ad4   : > { %v1607_v3 = vsel %vm547_vm0, %v5446_v4, %v1603_v57 }
0x1ad5   : > { %3824 = vst.msk [vmem:[%s5799_s16 + $0x28] sm:$0xff] %vm888_vm2, %v1607_v3 }
0x1ad8   : > { %v3041_v31 = vpop.permute.xlu2 %3040 }
0x1ad9   : > { %v3046_v1 = vsel %vm547_vm0, %v5704_v32, %v3041_v31 }
0x1ada   : > { %4087 = vst.msk [vmem:[%s5799_s16 + $0x60] sm:$0xff] %vm888_vm2, %v3046_v1 }
0x1adb   : > { %v2321_v59 = vpop.permute.xlu0 %2320 }
0x1adc   : > { %v2326_v40 = vsel %vm547_vm0, %v5576_v37, %v2321_v59 }
0x1add   : > { %3955 = vst.msk [vmem:[%s5799_s16 + $0x40] sm:$0xff] %vm888_vm2, %v2326_v40 }
0x1ae3   : > { %v2683_v60 = vpop.permute.xlu0 %2682 }
0x1ae4   : > { %v2687_v4 = vsel %vm547_vm0, %v5641_v19, %v2683_v60 }
0x1ae5   : > { %4022 = vst.msk [vmem:[%s5799_s16 + $0x58] sm:$0xff] %vm888_vm2, %v2687_v4 }
0x1b47   : > { %v3393_v18 = vpop.f32.mrf.mxu3 }
0x1b48   : > { %3400 = vrot.lane.b32.xlu0 %v3393_v18, %s4967_s20 }
0x1b4f   : > { %v3395_v32 = vpop.f32.mrf.mxu3 }
0x1b50   : > { %3402 = vrot.lane.b32.xlu2 %v3395_v32, %s4967_s20  ;;  %s4833_s20 = scalar_lea.hbm %s4832_s5, 128 }
0x1b51   : > { %p4834_p12 = scmp.ne.s32.totalorder %s4832_s5, %s4833_s20  ;;  %p4839_p9 = scmp.lt.s32.totalorder %s4837_s15, %s4833_s20 }
0x1b53   : > { %p4835_p5 = pnand %p4834_p12, %p5183_p11  ;;  %p4840_p13 = por %p4839_p9, %p4838_p8 }
0x1b55   : > { %p4836_p6 = pneg %p4835_p5 }
0x1b57   : > { %p4841_p0 = pnand %p4840_p13, %p4836_p6 }
0x1baa   : > { %v3403_v33 = vpop.permute.xlu2 %3402 }
0x1bab   : > { %v3407_v37 = vsel %vm547_vm0, %v5773_v58, %v3403_v33 }
0x1bac   : > { %4154 = vst.msk [vmem:[%s5799_s16 + $0x78] sm:$0xff] %vm888_vm2, %v3407_v37 }
0x1bba   : > { %v3401_v19 = vpop.permute.xlu0 %3400 }
0x1bbb   : > { %v3406_v22 = vsel %vm547_vm0, %v5771_v39, %v3401_v19 }
0x1bbc   : > { %4153 = vst.msk [vmem:[%s5799_s16 + $0x70] sm:$0xff] %vm888_vm2, %v3406_v22 }
0x1bbd   : > { %4844 = shalt.err (!%p4841_p0)
}
0x1bbe   : > { %s4968_s23 = smov 128   ;;  %s4969_s16 = smov 8  }
0x1bbf   : > { %4283 = dma.vmem_to_hbm [thread:$0]  (%p5183_p11), %s3428_s7, 2048, %s3430_s9, %s3412_s22, %s4968_s23, %s4968_s23, %s4969_s16  }
0x1bc0 PF: > { %s6019_s28 = sld [smem:[#allocation21_spill]]  ;;  %p4321_p2 = scmp.ge.s32.totalorder %s4955_s19, 2 }
0x1bc2   : > { %p4309_p1 = pnand %p4321_p2, %p5189_p7 }
0x1bc4   : > { %p4310_p4 = pneg %p4309_p1 }
0x1bc6   : > { %s3444_s0 = sand.u32 1, %s6019_s28  }
0x1bc7   : > { %s3445_s1 = scalar_lea.sflag [#allocation4], %s3444_s0 }
0x1bc8   : > { %4910 = dma.done.wait (%p4310_p4), %s3445_s1, 2048  }
0x1bc9   : > { %4912 = vsyncadd (%p4310_p4), %s3445_s1, 4294965248  ;;  %s30_s19 = sadd.s32 1, %s4955_s19   ;;  %s6021_s26 = sld [smem:[#allocation29_spill]] }
0x1bca   : > { %p27_p10 = scmp.ge.s32.totalorder %s30_s19, 6   ;;  %s6022_s21 = sld [smem:[#allocation25_spill]] }
0x1bcb   : > { %s6023_s7 = sld [smem:[#allocation27_spill]]  ;;  %s6024_s30 = smov %s4919_s10 }
0x1bcc   : > { %s6025_s10 = smov %s4923_s11  ;;  %s6026_s11 = smov %s5199_s2 }
0x1bcd   : > { %s6027_s12 = smov %s4931_s13  ;;  %s6028_s13 = smov %s4935_s14 }
0x1bce   : > { %s6030_s15 = smov %s4947_s17  ;;  %s6031_s16 = smov %s4951_s18 }
0x1bcf   : > { %s6029_s14 = smov %s6021_s26  ;;  %29 = sbr.rel (!%p27_p10) target bundleno = 23 (0x17), region = 162 }
0x1bd0   : > { %s6032_s17 = smov %s6022_s21 }
0x1bd1   : > { %s6033_s18 = smov %s6023_s7 }
0x1bd4   :  { %3451 = vsyncpa [#allocation3], 1 }
0x1bd5   :  { %3453 = vsyncpa [#allocation3 + $0x1], 1 }
0x1bd6   :  { %3454 = vsyncpa [#allocation6], 1 }
0x1bd7   :  { %3455 = vsyncpa [#allocation9], 1 }
0x1bd8   :  { %3456 = vsyncpa [#allocation12], 1 }
0x1bd9   :  { %3458 = vsyncpa [#allocation12 + $0x1], 1 }
0x1bda   :  { %3459 = vsyncpa [#allocation4], 1 }
0x1bdb   :  { %3461 = vsyncpa [#allocation4 + $0x1], 1 }

</bundles_post_ra>
